<compile_context>
chip_gen: v6e
topology: v6e:2x2x1
jax: 0.10.0
libtpu: 0.0.40
codegen_flags: <defaults>
</compile_context>

<pallas_src>
import functools
import math

import jax
import jax.numpy as jnp
from jax import lax
from jax.experimental import pallas as pl
from jax.experimental.pallas import tpu as pltpu

KTAPS = 5                               # (1,5)/(5,1) separable taps, padding = 2
_POS_BUDGET_BYTES = 10 * 1024 * 1024    # per-step block+temps budget (v7x-safe)
_VMEM_LIMIT_BYTES = 40 * 1024 * 1024    # raise v5e's 16 MiB scoped default
_MIN_GRID_STEPS = 4                     # >=2 pipelined steps per core on v7x megacore


# ----------------------------- kernel body ------------------------------------
def _gru1d_kernel(h_ref, x_ref, wah_ref, wax_ref, wb_ref, b_ref, out_ref,
                  *, conv_len, stride):
    """One GRU half-step: 5-tap 'same' conv along one spatial axis + gate math.

    The block holds `m` spatial positions flattened along the sublane axis.
    Position p's conv coordinate is (p // stride) mod conv_len:
      * horizontal stage: stride == 1  -> coordinate = w within each image row,
      * vertical stage:   stride == wt -> coordinate = h (wt columns per block).
    A tap with offset s contributes y_k[p - s*stride]; realized as one static
    pltpu.roll per tap plus an edge mask derived from a single hoisted (m, 1)
    iota (blocks always contain whole conv rows, so the masks also kill any
    wrap-around from the ragged last block of a cdiv grid).

    h_ref  : (..., hd)      f32   hidden state block
    x_ref  : (..., cin)     bf16  input block
    wah_ref: (5, hd, 3*hd)  bf16  h-rows of fused [z|r|q_x] weights (q zeroed)
    wax_ref: (5, cin, 3*hd) bf16  x-rows of fused [z|r|q_x] weights
    wb_ref : (hd, 5*hd)     bf16  q-gate h-side taps, fused along the out axis
    b_ref  : (1, 3*hd)      f32   fused biases [bz|br|bq]
    out_ref: (..., hd)      f32   updated hidden state block
    """
    hd = h_ref.shape[-1]
    cin = x_ref.shape[-1]
    m = 1
    for d in h_ref.shape[:-1]:
        m *= d

    h32 = h_ref[...].reshape(m, hd)                 # free: leading dims merge on
    x = x_ref[...].reshape(m, cin)                  # 8-aligned sublane boundaries
    hbf = h32.astype(jnp.bfloat16)

    # Conv coordinate (pre-scaled by stride) of every flattened position,
    # computed once and shared by both conv passes.
    period = conv_len * stride
    pos = lax.broadcasted_iota(jnp.int32, (m, 1), 0)
    if period != m:
        pos = pos % period

    def shifted(y, s):
        # out[p] += y[p - s*stride], zero where the source falls off the row.
        if s == 0:
            return y
        # Static roll: constant sublane rotates lower to free vreg re-indexing
        # plus a single rotate by (amount % 8), so m-1 / m-2 cost the same as
        # 1 / 2; in the vertical stage the amount is a multiple of 8 (pure
        # re-index) whenever wt % 8 == 0 (the tiler's default).
        rolled = pltpu.roll(y, (s * stride) % m, axis=0)
        if s > 0:
            valid = pos >= s * stride
        else:
            valid = pos < (conv_len + s) * stride
        return jnp.where(valid, rolled, 0.0)

    # ---- pass A: fused [z | r | q_x] gate conv ------------------------------
    def tap_a(k):
        return (jnp.dot(hbf, wah_ref[k], preferred_element_type=jnp.float32) +
                jnp.dot(x, wax_ref[k], preferred_element_type=jnp.float32))

    gates = tap_a(2) + b_ref[...]                   # center tap inits; bias folded
    for k in (0, 1, 3, 4):
        gates = gates + shifted(tap_a(k), 2 - k)

    def sigmoid(g):
        # EUP exp + approx reciprocal (+1 Newton step) instead of a VPU divide.
        den = 1.0 + jnp.exp(jnp.minimum(-g, 80.0))
        inv = pl.reciprocal(den, approx=True)
        return inv * (2.0 - den * inv)

    z = sigmoid(gates[:, :hd])
    r = sigmoid(gates[:, hd:2 * hd])

    # ---- pass B: q-gate h-side conv over r*h (5 taps in one matmul) ---------
    rh = (r * h32).astype(jnp.bfloat16)
    yb = jnp.dot(rh, wb_ref[...], preferred_element_type=jnp.float32)  # (m, 5*hd)
    q_acc = gates[:, 2 * hd:] + yb[:, 2 * hd:3 * hd]
    for k in (0, 1, 3, 4):
        q_acc = q_acc + shifted(yb[:, k * hd:(k + 1) * hd], 2 - k)
    q = jnp.tanh(q_acc)

    h_new = (1.0 - z) * h32 + z * q                 # blend in f32
    out_ref[...] = h_new.reshape(out_ref.shape)


# ----------------------------- tiling helpers ----------------------------------
def _budget_positions(hd, cin):
    """Spatial positions per block fitting the VMEM budget (double-buffered
    h/x/out blocks + rough in-kernel f32 temporaries)."""
    per_pos = 2 * (4 * hd + 2 * cin + 4 * hd) + 4 * 12 * hd + 2 * (hd + cin)
    return max(8, _POS_BUDGET_BYTES // per_pos)


def _stage1_rows(rows, w, budget_pos):
    """Conv-rows per block for the horizontal stage (block = rt*w flat positions)."""
    align = 8 // math.gcd(w, 8)              # rt*w must be a multiple of 8
    cap = max(1, budget_pos // max(w, 1))
    if rows >= _MIN_GRID_STEPS:
        cap = min(cap, max(1, rows // _MIN_GRID_STEPS))
    cap = min(cap, rows)
    rt = (cap // align) * align
    if rt == 0:
        # Can't satisfy alignment within the cap: either `align` rows (still a
        # multiple-of-8 block) or one block covering everything (full-extent
        # block shapes are always legal).
        rt = align if align <= rows else rows
    return rt


def _stage2_cols(n, h, w, budget_pos):
    """Image columns per block for the vertical stage (block = (h, wt) positions)."""
    cap = max(1, budget_pos // max(h, 1))
    want_tiles = pl.cdiv(_MIN_GRID_STEPS, max(n, 1))
    if w >= want_tiles:
        cap = min(cap, max(1, w // want_tiles))
    cap = min(cap, w)
    wt = (cap // 8) * 8                      # multiple of 8: free flatten, 8-aligned rolls
    if wt == 0:
        wt = 8 if w >= 8 else w              # narrow images: fall back (still legal)
    return wt


# ----------------------------- pallas_call wrappers ----------------------------
def _gru_half_rows(h_flat, x_flat, wah, wax, wb, b, *, conv_len, block_rows):
    """Horizontal half-step: arrays are (N*H*W, ch); conv along W (= conv_len)."""
    total, hd = h_flat.shape
    cin = x_flat.shape[-1]
    bm = block_rows * conv_len
    assert bm % conv_len == 0              # blocks must hold whole conv rows
    grid = (pl.cdiv(total, bm),)
    kern = functools.partial(_gru1d_kernel, conv_len=conv_len, stride=1)
    return pl.pallas_call(
        kern,
        out_shape=jax.ShapeDtypeStruct((total, hd), jnp.float32),
        grid=grid,
        in_specs=[
            pl.BlockSpec((bm, hd), lambda i: (i, 0)),
            pl.BlockSpec((bm, cin), lambda i: (i, 0)),
            # constant index maps -> weights stay resident across the grid
            pl.BlockSpec((KTAPS, hd, 3 * hd), lambda i: (0, 0, 0)),
            pl.BlockSpec((KTAPS, cin, 3 * hd), lambda i: (0, 0, 0)),
            pl.BlockSpec((hd, KTAPS * hd), lambda i: (0, 0)),
            pl.BlockSpec((1, 3 * hd), lambda i: (0, 0)),
        ],
        out_specs=pl.BlockSpec((bm, hd), lambda i: (i, 0)),
        compiler_params=pltpu.CompilerParams(
            dimension_semantics=("parallel",),
            vmem_limit_bytes=_VMEM_LIMIT_BYTES),
    )(h_flat, x_flat, wah, wax, wb, b)


def _gru_half_cols(h_rows, x_rows, wah, wax, wb, b, *, img_h, block_cols):
    """Vertical half-step: arrays are (N*H, W, ch); conv along H; one block is a
    full-height (H, block_cols) column band of a single image."""
    nh, w, hd = h_rows.shape
    cin = x_rows.shape[-1]
    n = nh // img_h
    wt = block_cols
    grid = (n, pl.cdiv(w, wt))
    kern = functools.partial(_gru1d_kernel, conv_len=img_h, stride=wt)
    return pl.pallas_call(
        kern,
        out_shape=jax.ShapeDtypeStruct((nh, w, hd), jnp.float32),
        grid=grid,
        in_specs=[
            pl.BlockSpec((img_h, wt, hd), lambda i, j: (i, j, 0)),
            pl.BlockSpec((img_h, wt, cin), lambda i, j: (i, j, 0)),
            pl.BlockSpec((KTAPS, hd, 3 * hd), lambda i, j: (0, 0, 0)),
            pl.BlockSpec((KTAPS, cin, 3 * hd), lambda i, j: (0, 0, 0)),
            pl.BlockSpec((hd, KTAPS * hd), lambda i, j: (0, 0)),
            pl.BlockSpec((1, 3 * hd), lambda i, j: (0, 0)),
        ],
        out_specs=pl.BlockSpec((img_h, wt, hd), lambda i, j: (i, j, 0)),
        compiler_params=pltpu.CompilerParams(
            dimension_semantics=("parallel", "parallel"),
            vmem_limit_bytes=_VMEM_LIMIT_BYTES),
    )(h_rows, x_rows, wah, wax, wb, b)


# ----------------------------- weight packing ----------------------------------
def _taps(w, hd):
    """PyTorch conv weight (hd, C, 1, 5) or (hd, C, 5, 1) -> (5, C, hd) per-tap
    matmul matrices laid out (c_in, c_out); tap k corresponds to offset k-2."""
    c = w.shape[1]
    return jnp.transpose(w.reshape(hd, c, KTAPS), (2, 1, 0))


def _pack_gate_weights(wz, wr, wq, hd):
    """Split the fused [z | r | q_x] weights into h-rows (q columns zeroed: its
    h-side is applied to r*h in pass B) and x-rows, plus the pass-B weight with
    its 5 taps fused along the output axis."""
    tz, tr, tq = _taps(wz, hd), _taps(wr, hd), _taps(wq, hd)
    wah = jnp.concatenate([tz[:, :hd, :], tr[:, :hd, :],
                           jnp.zeros_like(tq[:, :hd, :])], axis=-1)       # (5, hd, 3hd)
    wax = jnp.concatenate([tz[:, hd:, :], tr[:, hd:, :], tq[:, hd:, :]],
                          axis=-1)                                         # (5, cin, 3hd)
    wb = jnp.concatenate([tq[k, :hd, :] for k in range(KTAPS)], axis=-1)   # (hd, 5hd)
    return wah, wax, wb


# ----------------------------- public forward ----------------------------------
def sep_conv_gru(h_nchw, x_nchw, params):
    """SepConvGRU forward.  h: (N, hd, H, W), x: (N, cin, H, W); returns NCHW."""
    n, hd, hh, ww = h_nchw.shape
    cin = x_nchw.shape[1]

    # NCHW -> NHWC only at the boundary; both stages read/write the channels-last
    # HBM buffers directly (no inter-stage transpose passes).
    h_nhwc = jnp.transpose(h_nchw, (0, 2, 3, 1)).astype(jnp.float32)
    x_nhwc = jnp.transpose(x_nchw, (0, 2, 3, 1)).astype(jnp.bfloat16)

    budget_pos = _budget_positions(hd, cin)

    # ---- stage 1: horizontal (1,5) conv along W (flat row blocks) -----------
    wah1, wax1, wb1 = _pack_gate_weights(params["convz1_w"], params["convr1_w"],
                                         params["convq1_w"], hd)
    b1 = jnp.concatenate([params["convz1_b"], params["convr1_b"],
                          params["convq1_b"]])[None, :].astype(jnp.float32)
    rt = _stage1_rows(n * hh, ww, budget_pos)
    h1 = _gru_half_rows(h_nhwc.reshape(n * hh * ww, hd),
                        x_nhwc.reshape(n * hh * ww, cin),
                        wah1.astype(jnp.bfloat16), wax1.astype(jnp.bfloat16),
                        wb1.astype(jnp.bfloat16), b1,
                        conv_len=ww, block_rows=rt)

    # ---- stage 2: vertical (5,1) conv along H, reading the NHWC stage-1 output
    # in full-height column bands (conv realized with stride-wt rolls). --------
    wah2, wax2, wb2 = _pack_gate_weights(params["convz2_w"], params["convr2_w"],
                                         params["convq2_w"], hd)
    b2 = jnp.concatenate([params["convz2_b"], params["convr2_b"],
                          params["convq2_b"]])[None, :].astype(jnp.float32)
    wt = _stage2_cols(n, hh, ww, budget_pos)
    h2 = _gru_half_cols(h1.reshape(n * hh, ww, hd),
                        x_nhwc.reshape(n * hh, ww, cin),
                        wah2.astype(jnp.bfloat16), wax2.astype(jnp.bfloat16),
                        wb2.astype(jnp.bfloat16), b2,
                        img_h=hh, block_cols=wt)

    return jnp.transpose(h2.reshape(n, hh, ww, hd), (0, 3, 1, 2))


# ------------------------------ pure-JAX reference -----------------------------
def ref_forward(h_nchw, x_nchw, params, matmul_dtype=jnp.float32):
    """XLA reference.  matmul_dtype=bfloat16 mimics the kernel's MXU input
    precision (f32 accumulation either way)."""
    prec = lax.Precision.HIGHEST if matmul_dtype == jnp.float32 else None

    def conv(inp, w, b, pad_h, pad_w):
        y = lax.conv_general_dilated(
            inp.astype(matmul_dtype),
            jnp.transpose(w, (2, 3, 1, 0)).astype(matmul_dtype),
            window_strides=(1, 1),
            padding=((pad_h, pad_h), (pad_w, pad_w)),
            dimension_numbers=("NHWC", "HWIO", "NHWC"),
            preferred_element_type=jnp.float32,
            precision=prec)
        return y + b

    h = jnp.transpose(h_nchw, (0, 2, 3, 1)).astype(jnp.float32)
    x = jnp.transpose(x_nchw, (0, 2, 3, 1)).astype(jnp.float32)

    hx = jnp.concatenate([h, x], axis=-1)
    z = jax.nn.sigmoid(conv(hx, params["convz1_w"], params["convz1_b"], 0, 2))
    r = jax.nn.sigmoid(conv(hx, params["convr1_w"], params["convr1_b"], 0, 2))
    q = jnp.tanh(conv(jnp.concatenate([r * h, x], -1),
                      params["convq1_w"], params["convq1_b"], 0, 2))
    h = (1 - z) * h + z * q

    hx = jnp.concatenate([h, x], axis=-1)
    z = jax.nn.sigmoid(conv(hx, params["convz2_w"], params["convz2_b"], 2, 0))
    r = jax.nn.sigmoid(conv(hx, params["convr2_w"], params["convr2_b"], 2, 0))
    q = jnp.tanh(conv(jnp.concatenate([r * h, x], -1),
                      params["convq2_w"], params["convq2_b"], 2, 0))
    h = (1 - z) * h + z * q
    return jnp.transpose(h, (0, 3, 1, 2))


if __name__ == "__main__":
    N, H, W = 2, 16, 16
    hd, cin = 32, 64           # small stand-ins for hidden_dim=128, input_dim=320
    C = hd + cin

    key = jax.random.PRNGKey(0)
    ks = jax.random.split(key, 14)

    def init(k, shape, scale=0.1):
        return jax.random.normal(k, shape, jnp.float32) * scale

    params = {
        "convz1_w": init(ks[0], (hd, C, 1, 5)), "convz1_b": init(ks[1], (hd,)),
        "convr1_w": init(ks[2], (hd, C, 1, 5)), "convr1_b": init(ks[3], (hd,)),
        "convq1_w": init(ks[4], (hd, C, 1, 5)), "convq1_b": init(ks[5], (hd,)),
        "convz2_w": init(ks[6], (hd, C, 5, 1)), "convz2_b": init(ks[7], (hd,)),
        "convr2_w": init(ks[8], (hd, C, 5, 1)), "convr2_b": init(ks[9], (hd,)),
        "convq2_w": init(ks[10], (hd, C, 5, 1)), "convq2_b": init(ks[11], (hd,)),
    }
    h0 = jax.random.normal(ks[12], (N, hd, H, W), jnp.float32)
    x0 = jax.random.normal(ks[13], (N, cin, H, W), jnp.float32)

    out = jax.jit(sep_conv_gru)(h0, x0, params)
    out = jax.block_until_ready(out)
    assert out.shape == (N, hd, H, W)

    # The kernel feeds the MXU bf16 operands (f32 accumulation): check tightly
    # against a bf16-matmul reference and loosely against the pure-f32 module.
    ref_bf = ref_forward(h0, x0, params, jnp.bfloat16)
    ref_32 = ref_forward(h0, x0, params, jnp.float32)
    err_bf = float(jnp.max(jnp.abs(out - ref_bf)))
    err_32 = float(jnp.max(jnp.abs(out - ref_32)))
    if err_bf > 2e-2:
        raise AssertionError(f"mismatch vs bf16-matmul reference, max abs err = {err_bf}")
    if err_32 > 1e-1:
        raise AssertionError(f"mismatch vs f32 reference, max abs err = {err_32}")

    print("KERNEL_OK")
</pallas_src>

<mosaic_0001>
module attributes {stable_mosaic.version = 11 : i64} {
  func.func @_gru1d_kernel(%arg0: i32, %arg1: memref<128x32xf32, #tpu.memory_space<vmem>>, %arg2: memref<128x64xbf16, #tpu.memory_space<vmem>>, %arg3: memref<5x32x96xbf16, #tpu.memory_space<vmem>>, %arg4: memref<5x64x96xbf16, #tpu.memory_space<vmem>>, %arg5: memref<32x160xbf16, #tpu.memory_space<vmem>>, %arg6: memref<1x96xf32, #tpu.memory_space<vmem>>, %arg7: memref<128x32xf32, #tpu.memory_space<vmem>>) attributes {dimension_semantics = [#tpu.dimension_semantics<parallel>], iteration_bounds = array<i64: 4>, scalar_prefetch = 0 : i64, scratch_operands = 0 : i64, tpu.core_type = #tpu.core_type<tc>, window_params = [{transform_indices = @transform_0, window_bounds = array<i64: 128, 32>}, {transform_indices = @transform_1, window_bounds = array<i64: 128, 64>}, {pipeline_mode = #tpu.pipeline_mode<synchronous>, transform_indices = @transform_2, window_bounds = array<i64: 5, 32, 96>}, {pipeline_mode = #tpu.pipeline_mode<synchronous>, transform_indices = @transform_3, window_bounds = array<i64: 5, 64, 96>}, {pipeline_mode = #tpu.pipeline_mode<synchronous>, transform_indices = @transform_4, window_bounds = array<i64: 32, 160>}, {pipeline_mode = #tpu.pipeline_mode<synchronous>, transform_indices = @transform_5, window_bounds = array<i64: 1, 96>}, {transform_indices = @transform_6, window_bounds = array<i64: 128, 32>}]} {
    %c0 = arith.constant 0 : index
    %c0_0 = arith.constant 0 : index
    %0 = vector.load %arg1[%c0, %c0_0] : memref<128x32xf32, #tpu.memory_space<vmem>>, vector<128x32xf32>
    %c0_1 = arith.constant 0 : index
    %c0_2 = arith.constant 0 : index
    %1 = vector.load %arg2[%c0_1, %c0_2] : memref<128x64xbf16, #tpu.memory_space<vmem>>, vector<128x64xbf16>
    %2 = arith.truncf %0 : vector<128x32xf32> to vector<128x32xbf16>
    %3 = tpu.iota {dimensions = array<i32: 0>} : vector<128x1xi32>
    %c16_i32 = arith.constant 16 : i32
    %c0_i32 = arith.constant 0 : i32
    %4 = arith.cmpi eq, %c16_i32, %c0_i32 : i32
    %c1_i32 = arith.constant 1 : i32
    %5 = arith.select %4, %c1_i32, %c16_i32 : i32
    %6 = vector.broadcast %5 : i32 to vector<128x1xi32>
    %7 = arith.remsi %3, %6 : vector<128x1xi32>
    %c0_i32_3 = arith.constant 0 : i32
    %8 = vector.broadcast %c0_i32_3 : i32 to vector<128x1xi32>
    %9 = arith.cmpi ne, %7, %8 : vector<128x1xi32>
    %c0_i32_4 = arith.constant 0 : i32
    %10 = vector.broadcast %c0_i32_4 : i32 to vector<128x1xi32>
    %11 = arith.cmpi slt, %7, %10 : vector<128x1xi32>
    %c0_i32_5 = arith.constant 0 : i32
    %12 = arith.cmpi slt, %5, %c0_i32_5 : i32
    %13 = vector.broadcast %12 : i1 to vector<128x1xi1>
    %14 = vector.broadcast %13 : vector<128x1xi1> to vector<128x1xi1>
    %15 = arith.xori %11, %14 : vector<128x1xi1>
    %16 = arith.andi %15, %9 : vector<128x1xi1>
    %17 = vector.broadcast %5 : i32 to vector<128x1xi32>
    %18 = arith.addi %7, %17 : vector<128x1xi32>
    %19 = arith.select %16, %18, %7 : vector<128x1xi1>, vector<128x1xi32>
    %c2 = arith.constant 2 : index
    %c0_6 = arith.constant 0 : index
    %c0_7 = arith.constant 0 : index
    %20 = vector.load %arg3[%c2, %c0_6, %c0_7] : memref<5x32x96xbf16, #tpu.memory_space<vmem>>, vector<1x32x96xbf16>
    %21 = vector.shape_cast %20 : vector<1x32x96xbf16> to vector<32x96xbf16>
    %cst = arith.constant dense<0.000000e+00> : vector<128x96xf32>
    %22 = tpu.matmul %2, %21, %cst {dimension_numbers = #tpu.dot_dimension_numbers<[1], [0], [0], [1], [0, 0, 1, 1], [], []>} : vector<128x32xbf16>, vector<32x96xbf16>, vector<128x96xf32> -> vector<128x96xf32>
    %c2_8 = arith.constant 2 : index
    %c0_9 = arith.constant 0 : index
    %c0_10 = arith.constant 0 : index
    %23 = vector.load %arg4[%c2_8, %c0_9, %c0_10] : memref<5x64x96xbf16, #tpu.memory_space<vmem>>, vector<1x64x96xbf16>
    %24 = vector.shape_cast %23 : vector<1x64x96xbf16> to vector<64x96xbf16>
    %cst_11 = arith.constant dense<0.000000e+00> : vector<128x96xf32>
    %25 = tpu.matmul %1, %24, %cst_11 {dimension_numbers = #tpu.dot_dimension_numbers<[1], [0], [0], [1], [0, 0, 1, 1], [], []>} : vector<128x64xbf16>, vector<64x96xbf16>, vector<128x96xf32> -> vector<128x96xf32>
    %26 = arith.addf %22, %25 : vector<128x96xf32>
    %c0_12 = arith.constant 0 : index
    %c0_13 = arith.constant 0 : index
    %27 = vector.load %arg6[%c0_12, %c0_13] : memref<1x96xf32, #tpu.memory_space<vmem>>, vector<1x96xf32>
    %28 = vector.broadcast %27 : vector<1x96xf32> to vector<128x96xf32>
    %29 = arith.addf %26, %28 : vector<128x96xf32>
    %c0_14 = arith.constant 0 : index
    %c0_15 = arith.constant 0 : index
    %c0_16 = arith.constant 0 : index
    %30 = vector.load %arg3[%c0_14, %c0_15, %c0_16] : memref<5x32x96xbf16, #tpu.memory_space<vmem>>, vector<1x32x96xbf16>
    %31 = vector.shape_cast %30 : vector<1x32x96xbf16> to vector<32x96xbf16>
    %cst_17 = arith.constant dense<0.000000e+00> : vector<128x96xf32>
    %32 = tpu.matmul %2, %31, %cst_17 {dimension_numbers = #tpu.dot_dimension_numbers<[1], [0], [0], [1], [0, 0, 1, 1], [], []>} : vector<128x32xbf16>, vector<32x96xbf16>, vector<128x96xf32> -> vector<128x96xf32>
    %c0_18 = arith.constant 0 : index
    %c0_19 = arith.constant 0 : index
    %c0_20 = arith.constant 0 : index
    %33 = vector.load %arg4[%c0_18, %c0_19, %c0_20] : memref<5x64x96xbf16, #tpu.memory_space<vmem>>, vector<1x64x96xbf16>
    %34 = vector.shape_cast %33 : vector<1x64x96xbf16> to vector<64x96xbf16>
    %cst_21 = arith.constant dense<0.000000e+00> : vector<128x96xf32>
    %35 = tpu.matmul %1, %34, %cst_21 {dimension_numbers = #tpu.dot_dimension_numbers<[1], [0], [0], [1], [0, 0, 1, 1], [], []>} : vector<128x64xbf16>, vector<64x96xbf16>, vector<128x96xf32> -> vector<128x96xf32>
    %36 = arith.addf %32, %35 : vector<128x96xf32>
    %c2_i32 = arith.constant 2 : i32
    %37 = tpu.dynamic_rotate %36 by %c2_i32 dim 0 : vector<128x96xf32>, i32 -> vector<128x96xf32>
    %c2_i32_22 = arith.constant 2 : i32
    %38 = vector.broadcast %c2_i32_22 : i32 to vector<128x1xi32>
    %39 = arith.cmpi sge, %19, %38 : vector<128x1xi32>
    %cst_23 = arith.constant 0.000000e+00 : f32
    %40 = vector.shape_cast %39 : vector<128x1xi1> to vector<128x1xi1>
    %41 = vector.broadcast %40 : vector<128x1xi1> to vector<128x96xi1>
    %42 = vector.broadcast %cst_23 : f32 to vector<128x96xf32>
    %43 = arith.select %41, %37, %42 : vector<128x96xi1>, vector<128x96xf32>
    %44 = arith.addf %29, %43 : vector<128x96xf32>
    %c1 = arith.constant 1 : index
    %c0_24 = arith.constant 0 : index
    %c0_25 = arith.constant 0 : index
    %45 = vector.load %arg3[%c1, %c0_24, %c0_25] : memref<5x32x96xbf16, #tpu.memory_space<vmem>>, vector<1x32x96xbf16>
    %46 = vector.shape_cast %45 : vector<1x32x96xbf16> to vector<32x96xbf16>
    %cst_26 = arith.constant dense<0.000000e+00> : vector<128x96xf32>
    %47 = tpu.matmul %2, %46, %cst_26 {dimension_numbers = #tpu.dot_dimension_numbers<[1], [0], [0], [1], [0, 0, 1, 1], [], []>} : vector<128x32xbf16>, vector<32x96xbf16>, vector<128x96xf32> -> vector<128x96xf32>
    %c1_27 = arith.constant 1 : index
    %c0_28 = arith.constant 0 : index
    %c0_29 = arith.constant 0 : index
    %48 = vector.load %arg4[%c1_27, %c0_28, %c0_29] : memref<5x64x96xbf16, #tpu.memory_space<vmem>>, vector<1x64x96xbf16>
    %49 = vector.shape_cast %48 : vector<1x64x96xbf16> to vector<64x96xbf16>
    %cst_30 = arith.constant dense<0.000000e+00> : vector<128x96xf32>
    %50 = tpu.matmul %1, %49, %cst_30 {dimension_numbers = #tpu.dot_dimension_numbers<[1], [0], [0], [1], [0, 0, 1, 1], [], []>} : vector<128x64xbf16>, vector<64x96xbf16>, vector<128x96xf32> -> vector<128x96xf32>
    %51 = arith.addf %47, %50 : vector<128x96xf32>
    %c1_i32_31 = arith.constant 1 : i32
    %52 = tpu.dynamic_rotate %51 by %c1_i32_31 dim 0 : vector<128x96xf32>, i32 -> vector<128x96xf32>
    %c1_i32_32 = arith.constant 1 : i32
    %53 = vector.broadcast %c1_i32_32 : i32 to vector<128x1xi32>
    %54 = arith.cmpi sge, %19, %53 : vector<128x1xi32>
    %cst_33 = arith.constant 0.000000e+00 : f32
    %55 = vector.shape_cast %54 : vector<128x1xi1> to vector<128x1xi1>
    %56 = vector.broadcast %55 : vector<128x1xi1> to vector<128x96xi1>
    %57 = vector.broadcast %cst_33 : f32 to vector<128x96xf32>
    %58 = arith.select %56, %52, %57 : vector<128x96xi1>, vector<128x96xf32>
    %59 = arith.addf %44, %58 : vector<128x96xf32>
    %c3 = arith.constant 3 : index
    %c0_34 = arith.constant 0 : index
    %c0_35 = arith.constant 0 : index
    %60 = vector.load %arg3[%c3, %c0_34, %c0_35] : memref<5x32x96xbf16, #tpu.memory_space<vmem>>, vector<1x32x96xbf16>
    %61 = vector.shape_cast %60 : vector<1x32x96xbf16> to vector<32x96xbf16>
    %cst_36 = arith.constant dense<0.000000e+00> : vector<128x96xf32>
    %62 = tpu.matmul %2, %61, %cst_36 {dimension_numbers = #tpu.dot_dimension_numbers<[1], [0], [0], [1], [0, 0, 1, 1], [], []>} : vector<128x32xbf16>, vector<32x96xbf16>, vector<128x96xf32> -> vector<128x96xf32>
    %c3_37 = arith.constant 3 : index
    %c0_38 = arith.constant 0 : index
    %c0_39 = arith.constant 0 : index
    %63 = vector.load %arg4[%c3_37, %c0_38, %c0_39] : memref<5x64x96xbf16, #tpu.memory_space<vmem>>, vector<1x64x96xbf16>
    %64 = vector.shape_cast %63 : vector<1x64x96xbf16> to vector<64x96xbf16>
    %cst_40 = arith.constant dense<0.000000e+00> : vector<128x96xf32>
    %65 = tpu.matmul %1, %64, %cst_40 {dimension_numbers = #tpu.dot_dimension_numbers<[1], [0], [0], [1], [0, 0, 1, 1], [], []>} : vector<128x64xbf16>, vector<64x96xbf16>, vector<128x96xf32> -> vector<128x96xf32>
    %66 = arith.addf %62, %65 : vector<128x96xf32>
    %c127_i32 = arith.constant 127 : i32
    %67 = tpu.dynamic_rotate %66 by %c127_i32 dim 0 : vector<128x96xf32>, i32 -> vector<128x96xf32>
    %c15_i32 = arith.constant 15 : i32
    %68 = vector.broadcast %c15_i32 : i32 to vector<128x1xi32>
    %69 = arith.cmpi slt, %19, %68 : vector<128x1xi32>
    %cst_41 = arith.constant 0.000000e+00 : f32
    %70 = vector.shape_cast %69 : vector<128x1xi1> to vector<128x1xi1>
    %71 = vector.broadcast %70 : vector<128x1xi1> to vector<128x96xi1>
    %72 = vector.broadcast %cst_41 : f32 to vector<128x96xf32>
    %73 = arith.select %71, %67, %72 : vector<128x96xi1>, vector<128x96xf32>
    %74 = arith.addf %59, %73 : vector<128x96xf32>
    %c4 = arith.constant 4 : index
    %c0_42 = arith.constant 0 : index
    %c0_43 = arith.constant 0 : index
    %75 = vector.load %arg3[%c4, %c0_42, %c0_43] : memref<5x32x96xbf16, #tpu.memory_space<vmem>>, vector<1x32x96xbf16>
    %76 = vector.shape_cast %75 : vector<1x32x96xbf16> to vector<32x96xbf16>
    %cst_44 = arith.constant dense<0.000000e+00> : vector<128x96xf32>
    %77 = tpu.matmul %2, %76, %cst_44 {dimension_numbers = #tpu.dot_dimension_numbers<[1], [0], [0], [1], [0, 0, 1, 1], [], []>} : vector<128x32xbf16>, vector<32x96xbf16>, vector<128x96xf32> -> vector<128x96xf32>
    %c4_45 = arith.constant 4 : index
    %c0_46 = arith.constant 0 : index
    %c0_47 = arith.constant 0 : index
    %78 = vector.load %arg4[%c4_45, %c0_46, %c0_47] : memref<5x64x96xbf16, #tpu.memory_space<vmem>>, vector<1x64x96xbf16>
    %79 = vector.shape_cast %78 : vector<1x64x96xbf16> to vector<64x96xbf16>
    %cst_48 = arith.constant dense<0.000000e+00> : vector<128x96xf32>
    %80 = tpu.matmul %1, %79, %cst_48 {dimension_numbers = #tpu.dot_dimension_numbers<[1], [0], [0], [1], [0, 0, 1, 1], [], []>} : vector<128x64xbf16>, vector<64x96xbf16>, vector<128x96xf32> -> vector<128x96xf32>
    %81 = arith.addf %77, %80 : vector<128x96xf32>
    %c126_i32 = arith.constant 126 : i32
    %82 = tpu.dynamic_rotate %81 by %c126_i32 dim 0 : vector<128x96xf32>, i32 -> vector<128x96xf32>
    %c14_i32 = arith.constant 14 : i32
    %83 = vector.broadcast %c14_i32 : i32 to vector<128x1xi32>
    %84 = arith.cmpi slt, %19, %83 : vector<128x1xi32>
    %cst_49 = arith.constant 0.000000e+00 : f32
    %85 = vector.shape_cast %84 : vector<128x1xi1> to vector<128x1xi1>
    %86 = vector.broadcast %85 : vector<128x1xi1> to vector<128x96xi1>
    %87 = vector.broadcast %cst_49 : f32 to vector<128x96xf32>
    %88 = arith.select %86, %82, %87 : vector<128x96xi1>, vector<128x96xf32>
    %89 = arith.addf %74, %88 : vector<128x96xf32>
    %90 = vector.extract_strided_slice %89 {offsets = [0, 0], sizes = [128, 32], strides = [1, 1]} : vector<128x96xf32> to vector<128x32xf32>
    %cst_50 = arith.constant 0.000000e+00 : f32
    %91 = vector.broadcast %cst_50 : f32 to vector<128x32xf32>
    %92 = arith.subf %91, %90 : vector<128x32xf32>
    %cst_51 = arith.constant 8.000000e+01 : f32
    %93 = vector.broadcast %cst_51 : f32 to vector<128x32xf32>
    %94 = arith.minimumf %92, %93 : vector<128x32xf32>
    %95 = math.exp %94 : vector<128x32xf32>
    %cst_52 = arith.constant 1.000000e+00 : f32
    %96 = vector.broadcast %cst_52 : f32 to vector<128x32xf32>
    %97 = arith.addf %96, %95 : vector<128x32xf32>
    %98 = tpu.reciprocal %97 {approx = true} : vector<128x32xf32> -> vector<128x32xf32>
    %99 = arith.mulf %97, %98 : vector<128x32xf32>
    %cst_53 = arith.constant 2.000000e+00 : f32
    %100 = vector.broadcast %cst_53 : f32 to vector<128x32xf32>
    %101 = arith.subf %100, %99 : vector<128x32xf32>
    %102 = arith.mulf %98, %101 : vector<128x32xf32>
    %103 = vector.extract_strided_slice %89 {offsets = [0, 32], sizes = [128, 32], strides = [1, 1]} : vector<128x96xf32> to vector<128x32xf32>
    %cst_54 = arith.constant 0.000000e+00 : f32
    %104 = vector.broadcast %cst_54 : f32 to vector<128x32xf32>
    %105 = arith.subf %104, %103 : vector<128x32xf32>
    %cst_55 = arith.constant 8.000000e+01 : f32
    %106 = vector.broadcast %cst_55 : f32 to vector<128x32xf32>
    %107 = arith.minimumf %105, %106 : vector<128x32xf32>
    %108 = math.exp %107 : vector<128x32xf32>
    %cst_56 = arith.constant 1.000000e+00 : f32
    %109 = vector.broadcast %cst_56 : f32 to vector<128x32xf32>
    %110 = arith.addf %109, %108 : vector<128x32xf32>
    %111 = tpu.reciprocal %110 {approx = true} : vector<128x32xf32> -> vector<128x32xf32>
    %112 = arith.mulf %110, %111 : vector<128x32xf32>
    %cst_57 = arith.constant 2.000000e+00 : f32
    %113 = vector.broadcast %cst_57 : f32 to vector<128x32xf32>
    %114 = arith.subf %113, %112 : vector<128x32xf32>
    %115 = arith.mulf %111, %114 : vector<128x32xf32>
    %116 = arith.mulf %115, %0 : vector<128x32xf32>
    %117 = arith.truncf %116 : vector<128x32xf32> to vector<128x32xbf16>
    %c0_58 = arith.constant 0 : index
    %c0_59 = arith.constant 0 : index
    %118 = vector.load %arg5[%c0_58, %c0_59] : memref<32x160xbf16, #tpu.memory_space<vmem>>, vector<32x160xbf16>
    %cst_60 = arith.constant dense<0.000000e+00> : vector<128x160xf32>
    %119 = tpu.matmul %117, %118, %cst_60 {dimension_numbers = #tpu.dot_dimension_numbers<[1], [0], [0], [1], [0, 0, 1, 1], [], []>} : vector<128x32xbf16>, vector<32x160xbf16>, vector<128x160xf32> -> vector<128x160xf32>
    %120 = vector.extract_strided_slice %89 {offsets = [0, 64], sizes = [128, 32], strides = [1, 1]} : vector<128x96xf32> to vector<128x32xf32>
    %121 = vector.extract_strided_slice %119 {offsets = [0, 64], sizes = [128, 32], strides = [1, 1]} : vector<128x160xf32> to vector<128x32xf32>
    %122 = arith.addf %120, %121 : vector<128x32xf32>
    %123 = vector.extract_strided_slice %119 {offsets = [0, 0], sizes = [128, 32], strides = [1, 1]} : vector<128x160xf32> to vector<128x32xf32>
    %c2_i32_61 = arith.constant 2 : i32
    %124 = tpu.dynamic_rotate %123 by %c2_i32_61 dim 0 : vector<128x32xf32>, i32 -> vector<128x32xf32>
    %c2_i32_62 = arith.constant 2 : i32
    %125 = vector.broadcast %c2_i32_62 : i32 to vector<128x1xi32>
    %126 = arith.cmpi sge, %19, %125 : vector<128x1xi32>
    %cst_63 = arith.constant 0.000000e+00 : f32
    %127 = vector.shape_cast %126 : vector<128x1xi1> to vector<128x1xi1>
    %128 = vector.broadcast %127 : vector<128x1xi1> to vector<128x32xi1>
    %129 = vector.broadcast %cst_63 : f32 to vector<128x32xf32>
    %130 = arith.select %128, %124, %129 : vector<128x32xi1>, vector<128x32xf32>
    %131 = arith.addf %122, %130 : vector<128x32xf32>
    %132 = vector.extract_strided_slice %119 {offsets = [0, 32], sizes = [128, 32], strides = [1, 1]} : vector<128x160xf32> to vector<128x32xf32>
    %c1_i32_64 = arith.constant 1 : i32
    %133 = tpu.dynamic_rotate %132 by %c1_i32_64 dim 0 : vector<128x32xf32>, i32 -> vector<128x32xf32>
    %c1_i32_65 = arith.constant 1 : i32
    %134 = vector.broadcast %c1_i32_65 : i32 to vector<128x1xi32>
    %135 = arith.cmpi sge, %19, %134 : vector<128x1xi32>
    %cst_66 = arith.constant 0.000000e+00 : f32
    %136 = vector.shape_cast %135 : vector<128x1xi1> to vector<128x1xi1>
    %137 = vector.broadcast %136 : vector<128x1xi1> to vector<128x32xi1>
    %138 = vector.broadcast %cst_66 : f32 to vector<128x32xf32>
    %139 = arith.select %137, %133, %138 : vector<128x32xi1>, vector<128x32xf32>
    %140 = arith.addf %131, %139 : vector<128x32xf32>
    %141 = vector.extract_strided_slice %119 {offsets = [0, 96], sizes = [128, 32], strides = [1, 1]} : vector<128x160xf32> to vector<128x32xf32>
    %c127_i32_67 = arith.constant 127 : i32
    %142 = tpu.dynamic_rotate %141 by %c127_i32_67 dim 0 : vector<128x32xf32>, i32 -> vector<128x32xf32>
    %c15_i32_68 = arith.constant 15 : i32
    %143 = vector.broadcast %c15_i32_68 : i32 to vector<128x1xi32>
    %144 = arith.cmpi slt, %19, %143 : vector<128x1xi32>
    %cst_69 = arith.constant 0.000000e+00 : f32
    %145 = vector.shape_cast %144 : vector<128x1xi1> to vector<128x1xi1>
    %146 = vector.broadcast %145 : vector<128x1xi1> to vector<128x32xi1>
    %147 = vector.broadcast %cst_69 : f32 to vector<128x32xf32>
    %148 = arith.select %146, %142, %147 : vector<128x32xi1>, vector<128x32xf32>
    %149 = arith.addf %140, %148 : vector<128x32xf32>
    %150 = vector.extract_strided_slice %119 {offsets = [0, 128], sizes = [128, 32], strides = [1, 1]} : vector<128x160xf32> to vector<128x32xf32>
    %c126_i32_70 = arith.constant 126 : i32
    %151 = tpu.dynamic_rotate %150 by %c126_i32_70 dim 0 : vector<128x32xf32>, i32 -> vector<128x32xf32>
    %c14_i32_71 = arith.constant 14 : i32
    %152 = vector.broadcast %c14_i32_71 : i32 to vector<128x1xi32>
    %153 = arith.cmpi slt, %19, %152 : vector<128x1xi32>
    %cst_72 = arith.constant 0.000000e+00 : f32
    %154 = vector.shape_cast %153 : vector<128x1xi1> to vector<128x1xi1>
    %155 = vector.broadcast %154 : vector<128x1xi1> to vector<128x32xi1>
    %156 = vector.broadcast %cst_72 : f32 to vector<128x32xf32>
    %157 = arith.select %155, %151, %156 : vector<128x32xi1>, vector<128x32xf32>
    %158 = arith.addf %149, %157 : vector<128x32xf32>
    %159 = math.tanh %158 : vector<128x32xf32>
    %cst_73 = arith.constant 1.000000e+00 : f32
    %160 = vector.broadcast %cst_73 : f32 to vector<128x32xf32>
    %161 = arith.subf %160, %102 : vector<128x32xf32>
    %162 = arith.mulf %161, %0 : vector<128x32xf32>
    %163 = arith.mulf %102, %159 : vector<128x32xf32>
    %164 = arith.addf %162, %163 : vector<128x32xf32>
    %c0_74 = arith.constant 0 : index
    %c0_75 = arith.constant 0 : index
    %165 = vector.load %arg7[%c0_74, %c0_75] : memref<128x32xf32, #tpu.memory_space<vmem>>, vector<128x32xf32>
    tpu.vector_store %arg7[%c0_74, %c0_75], %164 {strides = array<i32>} : memref<128x32xf32, #tpu.memory_space<vmem>>, vector<128x32xf32>,
    return
  }
  func.func @transform_0(%arg0: i32) -> (i32, i32) {
    %c0_i32 = arith.constant 0 : i32
    %c0_i32_0 = arith.constant 0 : i32
    return %arg0, %c0_i32 : i32, i32
  }
  func.func @transform_1(%arg0: i32) -> (i32, i32) {
    %c0_i32 = arith.constant 0 : i32
    %c0_i32_0 = arith.constant 0 : i32
    return %arg0, %c0_i32 : i32, i32
  }
  func.func @transform_2(%arg0: i32) -> (i32, i32, i32) {
    %c0_i32 = arith.constant 0 : i32
    %c0_i32_0 = arith.constant 0 : i32
    %c0_i32_1 = arith.constant 0 : i32
    %c0_i32_2 = arith.constant 0 : i32
    return %c0_i32, %c0_i32_0, %c0_i32_1 : i32, i32, i32
  }
  func.func @transform_3(%arg0: i32) -> (i32, i32, i32) {
    %c0_i32 = arith.constant 0 : i32
    %c0_i32_0 = arith.constant 0 : i32
    %c0_i32_1 = arith.constant 0 : i32
    %c0_i32_2 = arith.constant 0 : i32
    return %c0_i32, %c0_i32_0, %c0_i32_1 : i32, i32, i32
  }
  func.func @transform_4(%arg0: i32) -> (i32, i32) {
    %c0_i32 = arith.constant 0 : i32
    %c0_i32_0 = arith.constant 0 : i32
    %c0_i32_1 = arith.constant 0 : i32
    return %c0_i32, %c0_i32_0 : i32, i32
  }
  func.func @transform_5(%arg0: i32) -> (i32, i32) {
    %c0_i32 = arith.constant 0 : i32
    %c0_i32_0 = arith.constant 0 : i32
    %c0_i32_1 = arith.constant 0 : i32
    return %c0_i32, %c0_i32_0 : i32, i32
  }
  func.func @transform_6(%arg0: i32) -> (i32, i32) {
    %c0_i32 = arith.constant 0 : i32
    %c0_i32_0 = arith.constant 0 : i32
    return %arg0, %c0_i32 : i32, i32
  }
}

module attributes {stable_mosaic.version = 11 : i64} {
  func.func @_gru1d_kernel(%arg0: i32, %arg1: i32, %arg2: memref<16x8x32xf32, #tpu.memory_space<vmem>>, %arg3: memref<16x8x64xbf16, #tpu.memory_space<vmem>>, %arg4: memref<5x32x96xbf16, #tpu.memory_space<vmem>>, %arg5: memref<5x64x96xbf16, #tpu.memory_space<vmem>>, %arg6: memref<32x160xbf16, #tpu.memory_space<vmem>>, %arg7: memref<1x96xf32, #tpu.memory_space<vmem>>, %arg8: memref<16x8x32xf32, #tpu.memory_space<vmem>>) attributes {dimension_semantics = [#tpu.dimension_semantics<parallel>, #tpu.dimension_semantics<parallel>], iteration_bounds = array<i64: 2, 2>, scalar_prefetch = 0 : i64, scratch_operands = 0 : i64, tpu.core_type = #tpu.core_type<tc>, window_params = [{transform_indices = @transform_0, window_bounds = array<i64: 16, 8, 32>}, {transform_indices = @transform_1, window_bounds = array<i64: 16, 8, 64>}, {pipeline_mode = #tpu.pipeline_mode<synchronous>, transform_indices = @transform_2, window_bounds = array<i64: 5, 32, 96>}, {pipeline_mode = #tpu.pipeline_mode<synchronous>, transform_indices = @transform_3, window_bounds = array<i64: 5, 64, 96>}, {pipeline_mode = #tpu.pipeline_mode<synchronous>, transform_indices = @transform_4, window_bounds = array<i64: 32, 160>}, {pipeline_mode = #tpu.pipeline_mode<synchronous>, transform_indices = @transform_5, window_bounds = array<i64: 1, 96>}, {transform_indices = @transform_6, window_bounds = array<i64: 16, 8, 32>}]} {
    %c0 = arith.constant 0 : index
    %c0_0 = arith.constant 0 : index
    %c0_1 = arith.constant 0 : index
    %0 = vector.load %arg2[%c0, %c0_0, %c0_1] : memref<16x8x32xf32, #tpu.memory_space<vmem>>, vector<16x8x32xf32>
    %1 = vector.shape_cast %0 : vector<16x8x32xf32> to vector<128x32xf32>
    %c0_2 = arith.constant 0 : index
    %c0_3 = arith.constant 0 : index
    %c0_4 = arith.constant 0 : index
    %2 = vector.load %arg3[%c0_2, %c0_3, %c0_4] : memref<16x8x64xbf16, #tpu.memory_space<vmem>>, vector<16x8x64xbf16>
    %3 = vector.shape_cast %2 : vector<16x8x64xbf16> to vector<128x64xbf16>
    %4 = arith.truncf %1 : vector<128x32xf32> to vector<128x32xbf16>
    %5 = tpu.iota {dimensions = array<i32: 0>} : vector<128x1xi32>
    %c2 = arith.constant 2 : index
    %c0_5 = arith.constant 0 : index
    %c0_6 = arith.constant 0 : index
    %6 = vector.load %arg4[%c2, %c0_5, %c0_6] : memref<5x32x96xbf16, #tpu.memory_space<vmem>>, vector<1x32x96xbf16>
    %7 = vector.shape_cast %6 : vector<1x32x96xbf16> to vector<32x96xbf16>
    %cst = arith.constant dense<0.000000e+00> : vector<128x96xf32>
    %8 = tpu.matmul %4, %7, %cst {dimension_numbers = #tpu.dot_dimension_numbers<[1], [0], [0], [1], [0, 0, 1, 1], [], []>} : vector<128x32xbf16>, vector<32x96xbf16>, vector<128x96xf32> -> vector<128x96xf32>
    %c2_7 = arith.constant 2 : index
    %c0_8 = arith.constant 0 : index
    %c0_9 = arith.constant 0 : index
    %9 = vector.load %arg5[%c2_7, %c0_8, %c0_9] : memref<5x64x96xbf16, #tpu.memory_space<vmem>>, vector<1x64x96xbf16>
    %10 = vector.shape_cast %9 : vector<1x64x96xbf16> to vector<64x96xbf16>
    %cst_10 = arith.constant dense<0.000000e+00> : vector<128x96xf32>
    %11 = tpu.matmul %3, %10, %cst_10 {dimension_numbers = #tpu.dot_dimension_numbers<[1], [0], [0], [1], [0, 0, 1, 1], [], []>} : vector<128x64xbf16>, vector<64x96xbf16>, vector<128x96xf32> -> vector<128x96xf32>
    %12 = arith.addf %8, %11 : vector<128x96xf32>
    %c0_11 = arith.constant 0 : index
    %c0_12 = arith.constant 0 : index
    %13 = vector.load %arg7[%c0_11, %c0_12] : memref<1x96xf32, #tpu.memory_space<vmem>>, vector<1x96xf32>
    %14 = vector.broadcast %13 : vector<1x96xf32> to vector<128x96xf32>
    %15 = arith.addf %12, %14 : vector<128x96xf32>
    %c0_13 = arith.constant 0 : index
    %c0_14 = arith.constant 0 : index
    %c0_15 = arith.constant 0 : index
    %16 = vector.load %arg4[%c0_13, %c0_14, %c0_15] : memref<5x32x96xbf16, #tpu.memory_space<vmem>>, vector<1x32x96xbf16>
    %17 = vector.shape_cast %16 : vector<1x32x96xbf16> to vector<32x96xbf16>
    %cst_16 = arith.constant dense<0.000000e+00> : vector<128x96xf32>
    %18 = tpu.matmul %4, %17, %cst_16 {dimension_numbers = #tpu.dot_dimension_numbers<[1], [0], [0], [1], [0, 0, 1, 1], [], []>} : vector<128x32xbf16>, vector<32x96xbf16>, vector<128x96xf32> -> vector<128x96xf32>
    %c0_17 = arith.constant 0 : index
    %c0_18 = arith.constant 0 : index
    %c0_19 = arith.constant 0 : index
    %19 = vector.load %arg5[%c0_17, %c0_18, %c0_19] : memref<5x64x96xbf16, #tpu.memory_space<vmem>>, vector<1x64x96xbf16>
    %20 = vector.shape_cast %19 : vector<1x64x96xbf16> to vector<64x96xbf16>
    %cst_20 = arith.constant dense<0.000000e+00> : vector<128x96xf32>
    %21 = tpu.matmul %3, %20, %cst_20 {dimension_numbers = #tpu.dot_dimension_numbers<[1], [0], [0], [1], [0, 0, 1, 1], [], []>} : vector<128x64xbf16>, vector<64x96xbf16>, vector<128x96xf32> -> vector<128x96xf32>
    %22 = arith.addf %18, %21 : vector<128x96xf32>
    %c16_i32 = arith.constant 16 : i32
    %23 = tpu.dynamic_rotate %22 by %c16_i32 dim 0 : vector<128x96xf32>, i32 -> vector<128x96xf32>
    %c16_i32_21 = arith.constant 16 : i32
    %24 = vector.broadcast %c16_i32_21 : i32 to vector<128x1xi32>
    %25 = arith.cmpi sge, %5, %24 : vector<128x1xi32>
    %cst_22 = arith.constant 0.000000e+00 : f32
    %26 = vector.shape_cast %25 : vector<128x1xi1> to vector<128x1xi1>
    %27 = vector.broadcast %26 : vector<128x1xi1> to vector<128x96xi1>
    %28 = vector.broadcast %cst_22 : f32 to vector<128x96xf32>
    %29 = arith.select %27, %23, %28 : vector<128x96xi1>, vector<128x96xf32>
    %30 = arith.addf %15, %29 : vector<128x96xf32>
    %c1 = arith.constant 1 : index
    %c0_23 = arith.constant 0 : index
    %c0_24 = arith.constant 0 : index
    %31 = vector.load %arg4[%c1, %c0_23, %c0_24] : memref<5x32x96xbf16, #tpu.memory_space<vmem>>, vector<1x32x96xbf16>
    %32 = vector.shape_cast %31 : vector<1x32x96xbf16> to vector<32x96xbf16>
    %cst_25 = arith.constant dense<0.000000e+00> : vector<128x96xf32>
    %33 = tpu.matmul %4, %32, %cst_25 {dimension_numbers = #tpu.dot_dimension_numbers<[1], [0], [0], [1], [0, 0, 1, 1], [], []>} : vector<128x32xbf16>, vector<32x96xbf16>, vector<128x96xf32> -> vector<128x96xf32>
    %c1_26 = arith.constant 1 : index
    %c0_27 = arith.constant 0 : index
    %c0_28 = arith.constant 0 : index
    %34 = vector.load %arg5[%c1_26, %c0_27, %c0_28] : memref<5x64x96xbf16, #tpu.memory_space<vmem>>, vector<1x64x96xbf16>
    %35 = vector.shape_cast %34 : vector<1x64x96xbf16> to vector<64x96xbf16>
    %cst_29 = arith.constant dense<0.000000e+00> : vector<128x96xf32>
    %36 = tpu.matmul %3, %35, %cst_29 {dimension_numbers = #tpu.dot_dimension_numbers<[1], [0], [0], [1], [0, 0, 1, 1], [], []>} : vector<128x64xbf16>, vector<64x96xbf16>, vector<128x96xf32> -> vector<128x96xf32>
    %37 = arith.addf %33, %36 : vector<128x96xf32>
    %c8_i32 = arith.constant 8 : i32
    %38 = tpu.dynamic_rotate %37 by %c8_i32 dim 0 : vector<128x96xf32>, i32 -> vector<128x96xf32>
    %c8_i32_30 = arith.constant 8 : i32
    %39 = vector.broadcast %c8_i32_30 : i32 to vector<128x1xi32>
    %40 = arith.cmpi sge, %5, %39 : vector<128x1xi32>
    %cst_31 = arith.constant 0.000000e+00 : f32
    %41 = vector.shape_cast %40 : vector<128x1xi1> to vector<128x1xi1>
    %42 = vector.broadcast %41 : vector<128x1xi1> to vector<128x96xi1>
    %43 = vector.broadcast %cst_31 : f32 to vector<128x96xf32>
    %44 = arith.select %42, %38, %43 : vector<128x96xi1>, vector<128x96xf32>
    %45 = arith.addf %30, %44 : vector<128x96xf32>
    %c3 = arith.constant 3 : index
    %c0_32 = arith.constant 0 : index
    %c0_33 = arith.constant 0 : index
    %46 = vector.load %arg4[%c3, %c0_32, %c0_33] : memref<5x32x96xbf16, #tpu.memory_space<vmem>>, vector<1x32x96xbf16>
    %47 = vector.shape_cast %46 : vector<1x32x96xbf16> to vector<32x96xbf16>
    %cst_34 = arith.constant dense<0.000000e+00> : vector<128x96xf32>
    %48 = tpu.matmul %4, %47, %cst_34 {dimension_numbers = #tpu.dot_dimension_numbers<[1], [0], [0], [1], [0, 0, 1, 1], [], []>} : vector<128x32xbf16>, vector<32x96xbf16>, vector<128x96xf32> -> vector<128x96xf32>
    %c3_35 = arith.constant 3 : index
    %c0_36 = arith.constant 0 : index
    %c0_37 = arith.constant 0 : index
    %49 = vector.load %arg5[%c3_35, %c0_36, %c0_37] : memref<5x64x96xbf16, #tpu.memory_space<vmem>>, vector<1x64x96xbf16>
    %50 = vector.shape_cast %49 : vector<1x64x96xbf16> to vector<64x96xbf16>
    %cst_38 = arith.constant dense<0.000000e+00> : vector<128x96xf32>
    %51 = tpu.matmul %3, %50, %cst_38 {dimension_numbers = #tpu.dot_dimension_numbers<[1], [0], [0], [1], [0, 0, 1, 1], [], []>} : vector<128x64xbf16>, vector<64x96xbf16>, vector<128x96xf32> -> vector<128x96xf32>
    %52 = arith.addf %48, %51 : vector<128x96xf32>
    %c120_i32 = arith.constant 120 : i32
    %53 = tpu.dynamic_rotate %52 by %c120_i32 dim 0 : vector<128x96xf32>, i32 -> vector<128x96xf32>
    %c120_i32_39 = arith.constant 120 : i32
    %54 = vector.broadcast %c120_i32_39 : i32 to vector<128x1xi32>
    %55 = arith.cmpi slt, %5, %54 : vector<128x1xi32>
    %cst_40 = arith.constant 0.000000e+00 : f32
    %56 = vector.shape_cast %55 : vector<128x1xi1> to vector<128x1xi1>
    %57 = vector.broadcast %56 : vector<128x1xi1> to vector<128x96xi1>
    %58 = vector.broadcast %cst_40 : f32 to vector<128x96xf32>
    %59 = arith.select %57, %53, %58 : vector<128x96xi1>, vector<128x96xf32>
    %60 = arith.addf %45, %59 : vector<128x96xf32>
    %c4 = arith.constant 4 : index
    %c0_41 = arith.constant 0 : index
    %c0_42 = arith.constant 0 : index
    %61 = vector.load %arg4[%c4, %c0_41, %c0_42] : memref<5x32x96xbf16, #tpu.memory_space<vmem>>, vector<1x32x96xbf16>
    %62 = vector.shape_cast %61 : vector<1x32x96xbf16> to vector<32x96xbf16>
    %cst_43 = arith.constant dense<0.000000e+00> : vector<128x96xf32>
    %63 = tpu.matmul %4, %62, %cst_43 {dimension_numbers = #tpu.dot_dimension_numbers<[1], [0], [0], [1], [0, 0, 1, 1], [], []>} : vector<128x32xbf16>, vector<32x96xbf16>, vector<128x96xf32> -> vector<128x96xf32>
    %c4_44 = arith.constant 4 : index
    %c0_45 = arith.constant 0 : index
    %c0_46 = arith.constant 0 : index
    %64 = vector.load %arg5[%c4_44, %c0_45, %c0_46] : memref<5x64x96xbf16, #tpu.memory_space<vmem>>, vector<1x64x96xbf16>
    %65 = vector.shape_cast %64 : vector<1x64x96xbf16> to vector<64x96xbf16>
    %cst_47 = arith.constant dense<0.000000e+00> : vector<128x96xf32>
    %66 = tpu.matmul %3, %65, %cst_47 {dimension_numbers = #tpu.dot_dimension_numbers<[1], [0], [0], [1], [0, 0, 1, 1], [], []>} : vector<128x64xbf16>, vector<64x96xbf16>, vector<128x96xf32> -> vector<128x96xf32>
    %67 = arith.addf %63, %66 : vector<128x96xf32>
    %c112_i32 = arith.constant 112 : i32
    %68 = tpu.dynamic_rotate %67 by %c112_i32 dim 0 : vector<128x96xf32>, i32 -> vector<128x96xf32>
    %c112_i32_48 = arith.constant 112 : i32
    %69 = vector.broadcast %c112_i32_48 : i32 to vector<128x1xi32>
    %70 = arith.cmpi slt, %5, %69 : vector<128x1xi32>
    %cst_49 = arith.constant 0.000000e+00 : f32
    %71 = vector.shape_cast %70 : vector<128x1xi1> to vector<128x1xi1>
    %72 = vector.broadcast %71 : vector<128x1xi1> to vector<128x96xi1>
    %73 = vector.broadcast %cst_49 : f32 to vector<128x96xf32>
    %74 = arith.select %72, %68, %73 : vector<128x96xi1>, vector<128x96xf32>
    %75 = arith.addf %60, %74 : vector<128x96xf32>
    %76 = vector.extract_strided_slice %75 {offsets = [0, 0], sizes = [128, 32], strides = [1, 1]} : vector<128x96xf32> to vector<128x32xf32>
    %cst_50 = arith.constant 0.000000e+00 : f32
    %77 = vector.broadcast %cst_50 : f32 to vector<128x32xf32>
    %78 = arith.subf %77, %76 : vector<128x32xf32>
    %cst_51 = arith.constant 8.000000e+01 : f32
    %79 = vector.broadcast %cst_51 : f32 to vector<128x32xf32>
    %80 = arith.minimumf %78, %79 : vector<128x32xf32>
    %81 = math.exp %80 : vector<128x32xf32>
    %cst_52 = arith.constant 1.000000e+00 : f32
    %82 = vector.broadcast %cst_52 : f32 to vector<128x32xf32>
    %83 = arith.addf %82, %81 : vector<128x32xf32>
    %84 = tpu.reciprocal %83 {approx = true} : vector<128x32xf32> -> vector<128x32xf32>
    %85 = arith.mulf %83, %84 : vector<128x32xf32>
    %cst_53 = arith.constant 2.000000e+00 : f32
    %86 = vector.broadcast %cst_53 : f32 to vector<128x32xf32>
    %87 = arith.subf %86, %85 : vector<128x32xf32>
    %88 = arith.mulf %84, %87 : vector<128x32xf32>
    %89 = vector.extract_strided_slice %75 {offsets = [0, 32], sizes = [128, 32], strides = [1, 1]} : vector<128x96xf32> to vector<128x32xf32>
    %cst_54 = arith.constant 0.000000e+00 : f32
    %90 = vector.broadcast %cst_54 : f32 to vector<128x32xf32>
    %91 = arith.subf %90, %89 : vector<128x32xf32>
    %cst_55 = arith.constant 8.000000e+01 : f32
    %92 = vector.broadcast %cst_55 : f32 to vector<128x32xf32>
    %93 = arith.minimumf %91, %92 : vector<128x32xf32>
    %94 = math.exp %93 : vector<128x32xf32>
    %cst_56 = arith.constant 1.000000e+00 : f32
    %95 = vector.broadcast %cst_56 : f32 to vector<128x32xf32>
    %96 = arith.addf %95, %94 : vector<128x32xf32>
    %97 = tpu.reciprocal %96 {approx = true} : vector<128x32xf32> -> vector<128x32xf32>
    %98 = arith.mulf %96, %97 : vector<128x32xf32>
    %cst_57 = arith.constant 2.000000e+00 : f32
    %99 = vector.broadcast %cst_57 : f32 to vector<128x32xf32>
    %100 = arith.subf %99, %98 : vector<128x32xf32>
    %101 = arith.mulf %97, %100 : vector<128x32xf32>
    %102 = arith.mulf %101, %1 : vector<128x32xf32>
    %103 = arith.truncf %102 : vector<128x32xf32> to vector<128x32xbf16>
    %c0_58 = arith.constant 0 : index
    %c0_59 = arith.constant 0 : index
    %104 = vector.load %arg6[%c0_58, %c0_59] : memref<32x160xbf16, #tpu.memory_space<vmem>>, vector<32x160xbf16>
    %cst_60 = arith.constant dense<0.000000e+00> : vector<128x160xf32>
    %105 = tpu.matmul %103, %104, %cst_60 {dimension_numbers = #tpu.dot_dimension_numbers<[1], [0], [0], [1], [0, 0, 1, 1], [], []>} : vector<128x32xbf16>, vector<32x160xbf16>, vector<128x160xf32> -> vector<128x160xf32>
    %106 = vector.extract_strided_slice %75 {offsets = [0, 64], sizes = [128, 32], strides = [1, 1]} : vector<128x96xf32> to vector<128x32xf32>
    %107 = vector.extract_strided_slice %105 {offsets = [0, 64], sizes = [128, 32], strides = [1, 1]} : vector<128x160xf32> to vector<128x32xf32>
    %108 = arith.addf %106, %107 : vector<128x32xf32>
    %109 = vector.extract_strided_slice %105 {offsets = [0, 0], sizes = [128, 32], strides = [1, 1]} : vector<128x160xf32> to vector<128x32xf32>
    %c16_i32_61 = arith.constant 16 : i32
    %110 = tpu.dynamic_rotate %109 by %c16_i32_61 dim 0 : vector<128x32xf32>, i32 -> vector<128x32xf32>
    %c16_i32_62 = arith.constant 16 : i32
    %111 = vector.broadcast %c16_i32_62 : i32 to vector<128x1xi32>
    %112 = arith.cmpi sge, %5, %111 : vector<128x1xi32>
    %cst_63 = arith.constant 0.000000e+00 : f32
    %113 = vector.shape_cast %112 : vector<128x1xi1> to vector<128x1xi1>
    %114 = vector.broadcast %113 : vector<128x1xi1> to vector<128x32xi1>
    %115 = vector.broadcast %cst_63 : f32 to vector<128x32xf32>
    %116 = arith.select %114, %110, %115 : vector<128x32xi1>, vector<128x32xf32>
    %117 = arith.addf %108, %116 : vector<128x32xf32>
    %118 = vector.extract_strided_slice %105 {offsets = [0, 32], sizes = [128, 32], strides = [1, 1]} : vector<128x160xf32> to vector<128x32xf32>
    %c8_i32_64 = arith.constant 8 : i32
    %119 = tpu.dynamic_rotate %118 by %c8_i32_64 dim 0 : vector<128x32xf32>, i32 -> vector<128x32xf32>
    %c8_i32_65 = arith.constant 8 : i32
    %120 = vector.broadcast %c8_i32_65 : i32 to vector<128x1xi32>
    %121 = arith.cmpi sge, %5, %120 : vector<128x1xi32>
    %cst_66 = arith.constant 0.000000e+00 : f32
    %122 = vector.shape_cast %121 : vector<128x1xi1> to vector<128x1xi1>
    %123 = vector.broadcast %122 : vector<128x1xi1> to vector<128x32xi1>
    %124 = vector.broadcast %cst_66 : f32 to vector<128x32xf32>
    %125 = arith.select %123, %119, %124 : vector<128x32xi1>, vector<128x32xf32>
    %126 = arith.addf %117, %125 : vector<128x32xf32>
    %127 = vector.extract_strided_slice %105 {offsets = [0, 96], sizes = [128, 32], strides = [1, 1]} : vector<128x160xf32> to vector<128x32xf32>
    %c120_i32_67 = arith.constant 120 : i32
    %128 = tpu.dynamic_rotate %127 by %c120_i32_67 dim 0 : vector<128x32xf32>, i32 -> vector<128x32xf32>
    %c120_i32_68 = arith.constant 120 : i32
    %129 = vector.broadcast %c120_i32_68 : i32 to vector<128x1xi32>
    %130 = arith.cmpi slt, %5, %129 : vector<128x1xi32>
    %cst_69 = arith.constant 0.000000e+00 : f32
    %131 = vector.shape_cast %130 : vector<128x1xi1> to vector<128x1xi1>
    %132 = vector.broadcast %131 : vector<128x1xi1> to vector<128x32xi1>
    %133 = vector.broadcast %cst_69 : f32 to vector<128x32xf32>
    %134 = arith.select %132, %128, %133 : vector<128x32xi1>, vector<128x32xf32>
    %135 = arith.addf %126, %134 : vector<128x32xf32>
    %136 = vector.extract_strided_slice %105 {offsets = [0, 128], sizes = [128, 32], strides = [1, 1]} : vector<128x160xf32> to vector<128x32xf32>
    %c112_i32_70 = arith.constant 112 : i32
    %137 = tpu.dynamic_rotate %136 by %c112_i32_70 dim 0 : vector<128x32xf32>, i32 -> vector<128x32xf32>
    %c112_i32_71 = arith.constant 112 : i32
    %138 = vector.broadcast %c112_i32_71 : i32 to vector<128x1xi32>
    %139 = arith.cmpi slt, %5, %138 : vector<128x1xi32>
    %cst_72 = arith.constant 0.000000e+00 : f32
    %140 = vector.shape_cast %139 : vector<128x1xi1> to vector<128x1xi1>
    %141 = vector.broadcast %140 : vector<128x1xi1> to vector<128x32xi1>
    %142 = vector.broadcast %cst_72 : f32 to vector<128x32xf32>
    %143 = arith.select %141, %137, %142 : vector<128x32xi1>, vector<128x32xf32>
    %144 = arith.addf %135, %143 : vector<128x32xf32>
    %145 = math.tanh %144 : vector<128x32xf32>
    %cst_73 = arith.constant 1.000000e+00 : f32
    %146 = vector.broadcast %cst_73 : f32 to vector<128x32xf32>
    %147 = arith.subf %146, %88 : vector<128x32xf32>
    %148 = arith.mulf %147, %1 : vector<128x32xf32>
    %149 = arith.mulf %88, %145 : vector<128x32xf32>
    %150 = arith.addf %148, %149 : vector<128x32xf32>
    %151 = vector.shape_cast %150 : vector<128x32xf32> to vector<16x8x32xf32>
    %c0_74 = arith.constant 0 : index
    %c0_75 = arith.constant 0 : index
    %c0_76 = arith.constant 0 : index
    %152 = vector.load %arg8[%c0_74, %c0_75, %c0_76] : memref<16x8x32xf32, #tpu.memory_space<vmem>>, vector<16x8x32xf32>
    tpu.vector_store %arg8[%c0_74, %c0_75, %c0_76], %151 {strides = array<i32>} : memref<16x8x32xf32, #tpu.memory_space<vmem>>, vector<16x8x32xf32>,
    return
  }
  func.func @transform_0(%arg0: i32, %arg1: i32) -> (i32, i32, i32) {
    %c0_i32 = arith.constant 0 : i32
    %c0_i32_0 = arith.constant 0 : i32
    return %arg0, %arg1, %c0_i32 : i32, i32, i32
  }
  func.func @transform_1(%arg0: i32, %arg1: i32) -> (i32, i32, i32) {
    %c0_i32 = arith.constant 0 : i32
    %c0_i32_0 = arith.constant 0 : i32
    return %arg0, %arg1, %c0_i32 : i32, i32, i32
  }
  func.func @transform_2(%arg0: i32, %arg1: i32) -> (i32, i32, i32) {
    %c0_i32 = arith.constant 0 : i32
    %c0_i32_0 = arith.constant 0 : i32
    %c0_i32_1 = arith.constant 0 : i32
    %c0_i32_2 = arith.constant 0 : i32
    return %c0_i32, %c0_i32_0, %c0_i32_1 : i32, i32, i32
  }
  func.func @transform_3(%arg0: i32, %arg1: i32) -> (i32, i32, i32) {
    %c0_i32 = arith.constant 0 : i32
    %c0_i32_0 = arith.constant 0 : i32
    %c0_i32_1 = arith.constant 0 : i32
    %c0_i32_2 = arith.constant 0 : i32
    return %c0_i32, %c0_i32_0, %c0_i32_1 : i32, i32, i32
  }
  func.func @transform_4(%arg0: i32, %arg1: i32) -> (i32, i32) {
    %c0_i32 = arith.constant 0 : i32
    %c0_i32_0 = arith.constant 0 : i32
    %c0_i32_1 = arith.constant 0 : i32
    return %c0_i32, %c0_i32_0 : i32, i32
  }
  func.func @transform_5(%arg0: i32, %arg1: i32) -> (i32, i32) {
    %c0_i32 = arith.constant 0 : i32
    %c0_i32_0 = arith.constant 0 : i32
    %c0_i32_1 = arith.constant 0 : i32
    return %c0_i32, %c0_i32_0 : i32, i32
  }
  func.func @transform_6(%arg0: i32, %arg1: i32) -> (i32, i32, i32) {
    %c0_i32 = arith.constant 0 : i32
    %c0_i32_0 = arith.constant 0 : i32
    return %arg0, %arg1, %c0_i32 : i32, i32, i32
  }
}

</mosaic_0001>

<bundles_post_ra>
// kernel: sep_conv_gru.3
= control target key start
LH: loop header
LB: loop body
LE: loop exit
PB: predicated region body
PF: predicated region fallthrough
CT: control target
= control target key end

     0   :  { %11 = vsyncpa [#allocation5], 0  ;;  %s5729_s0 = inlined_call_operand.vmem [shape: f32[32,16,32], index: 0, kind: input, shape index: {}]   ;;  %s5730_s1 = inlined_call_operand.vmem [shape: bf16[32,16,64], index: 1, kind: input, shape index: {}]   ;;  %s5731_s2 = inlined_call_operand.vmem [shape: bf16[5,32,96], index: 2, kind: input, shape index: {}]   ;;  %s5732_s3 = inlined_call_operand.vmem [shape: bf16[5,64,96], index: 3, kind: input, shape index: {}]   ;;  %s5733_s4 = inlined_call_operand.vmem [shape: bf16[32,160], index: 4, kind: input, shape index: {}]   ;;  %s5734_s5 = inlined_call_operand.vmem [shape: f32[1,96], index: 5, kind: input, shape index: {}]   ;;  %s5735_s6 = inlined_call_operand.hbm [shape: f32[32,16,32], index: 6, kind: output, shape index: {}]  }
   0x1   :  { %13 = vsyncpa [#allocation5 + $0x1], 0  ;;  %s4340_s21 = smov 0   ;;  %s4342_s22 = smov 0  }
   0x2   :  { %s4344_s23 = smov 0   ;;  %s4346_s24 = smov 0  }
   0x3   :  { %s4348_s25 = smov 0   ;;  %s4350_s26 = smov 0  }
   0x4   :  { %s4352_s27 = smov 0   ;;  %s4354_s28 = smov 0  }
   0x5 LB: > { %s3412_s29 = sadd.s32 4294967295, %s4294_s28   ;;  %s3413_s30 = sadd.s32 4294967294, %s4294_s28   ;;  %s4294_s28 = sphi %s4354_s28, %s19_s28   ;;  %s4290_s27 = sphi %s4352_s27, %s5761_s27   ;;  %s4286_s26 = sphi %s4350_s26, %s5760_s26   ;;  %s4282_s25 = sphi %s4348_s25, %s5759_s25   ;;  %s4278_s24 = sphi %s4346_s24, %s5758_s24   ;;  %s4274_s23 = sphi %s4344_s23, %s5757_s23   ;;  %s4270_s22 = sphi %s4342_s22, %s5756_s22   ;;  %s4266_s21 = sphi %s4340_s21, %s5755_s21  }
   0x6   : > { %s28_s7 = sadd.s32 1, %s4286_s26  ;;  %s31_s8 = sadd.s32 1, %s4290_s27 }
   0x7   : > { %p29_p0 = scmp.ge.s32.totalorder %s28_s7, 2  ;;  %p47_p1 = scmp.ne.s32.totalorder %s4274_s23, %s4270_s22 }
   0x8   : > { %p48_p2 = scmp.eq.s32.totalorder %s4294_s28, 0  ;;  %p191_p5 = scmp.eq.s32.totalorder %s3412_s29, 3 }
   0x9   : > { %s5763_s7 = smov (%p29_p0, %s28_s7), 0  ;;  %s5765_s8 = smov (!%p29_p0, %s31_s8), %s4290_s27 }
   0xa   : > { %s36_s9 = ssub.s32 %s4286_s26, %s5763_s7  ;;  %p4392_p3 = por %p48_p2, %p47_p1 }
   0xb   : > { %p33_p4 = scmp.ge.s32.totalorder %s5765_s8, 2  ;;  %p196_p6 = scmp.ne.s32.totalorder %s4270_s22, %s4266_s21 }
   0xc   : > { %p197_p7 = scmp.eq.s32.totalorder %s3413_s30, 3  ;;  %p4400_p8 = por %p191_p5, %p47_p1 }
   0xd   : > { %s5767_s8 = smov (%p33_p4, %s5765_s8), 0  ;;  %s40_s15 = sadd.s32 1, %s4274_s23 }
   0xe   : > { %p4404_p9 = por %p197_p7, %p196_p6  ;;  %s35_s13 = ssub.s32 %s4290_s27, %s5767_s8 }
   0xf   : > { %s37_s14 = sor.u32 %s36_s9, %s35_s13  ;;  %p3415_p11 = scmp.ge.s32.totalorder %s4294_s28, 4 }
  0x10   : > { %p38_p10 = scmp.eq.s32.totalorder %s37_s14, 0 }
  0x11   : > { %225 = sbr.rel (%p3415_p11) target bundleno = 52 (0x34), region = 32 }
  0x12   : > { %s4412_s16 = scalar_select %p38_p10, %s4274_s23, %s40_s15  }
  0x16   : > { %228 = sbr.rel (!%p4392_p3) target bundleno = 36 (0x24), region = 36  ;;  %s230_s17 = sand.u32 (%p4392_p3), 1, %s4274_s23  }
  0x17   : > { %s3613_s18 = sshll.u32 (%p4392_p3), %s4290_s27, 5  ;;  %s3416_s19 = sshll.u32 (%p4392_p3), %s230_s17, 7 }
  0x18   : > { %s235_s20 = sadd.s32 (%p4392_p3), %s4286_s26, %s3613_s18  ;;  %s232_s14 = scalar_lea.vmem (%p4392_p3), [#allocation2], %s3416_s19 }
  0x19   : > { %s3419_s29 = sshll.u32 (%p4392_p3), %s235_s20, 3 }
  0x1a   : > { %s4423_s13 = scalar_lea.vmem (%p4392_p3), %s5729_s0, %s3419_s29 }
  0x1b   : > { %v296_v0 = vld [vmem:[%s4423_s13] sm:$0xff]  ;;  %v298_v1 = vld [vmem:[%s4423_s13 + $0x10] sm:$0xff] }
  0x1c   : > { %v300_v2 = vld [vmem:[%s4423_s13 + $0x20] sm:$0xff]  ;;  %297 = vst [vmem:[%s232_s14] sm:$0xff] %v296_v0  ;;  %299 = vst [vmem:[%s232_s14 + $0x8] sm:$0xff] %v298_v1  ;;  %v302_v3 = vld [vmem:[%s4423_s13 + $0x30] sm:$0xff] }
  0x1d   : > { %301 = vst [vmem:[%s232_s14 + $0x10] sm:$0xff] %v300_v2  ;;  %v304_v4 = vld [vmem:[%s4423_s13 + $0x40] sm:$0xff]  ;;  %v306_v5 = vld [vmem:[%s4423_s13 + $0x50] sm:$0xff]  ;;  %303 = vst [vmem:[%s232_s14 + $0x18] sm:$0xff] %v302_v3 }
  0x1e   : > { %305 = vst [vmem:[%s232_s14 + $0x20] sm:$0xff] %v304_v4  ;;  %307 = vst [vmem:[%s232_s14 + $0x28] sm:$0xff] %v306_v5  ;;  %v308_v6 = vld [vmem:[%s4423_s13 + $0x60] sm:$0xff]  ;;  %v310_v7 = vld [vmem:[%s4423_s13 + $0x70] sm:$0xff] }
  0x1f   : > { %v312_v8 = vld [vmem:[%s4423_s13 + $0x80] sm:$0xff]  ;;  %309 = vst [vmem:[%s232_s14 + $0x30] sm:$0xff] %v308_v6  ;;  %311 = vst [vmem:[%s232_s14 + $0x38] sm:$0xff] %v310_v7  ;;  %v314_v9 = vld [vmem:[%s4423_s13 + $0x90] sm:$0xff] }
  0x20   : > { %313 = vst [vmem:[%s232_s14 + $0x40] sm:$0xff] %v312_v8  ;;  %v316_v10 = vld [vmem:[%s4423_s13 + $0xa0] sm:$0xff]  ;;  %v318_v11 = vld [vmem:[%s4423_s13 + $0xb0] sm:$0xff]  ;;  %315 = vst [vmem:[%s232_s14 + $0x48] sm:$0xff] %v314_v9 }
  0x21   : > { %317 = vst [vmem:[%s232_s14 + $0x50] sm:$0xff] %v316_v10  ;;  %319 = vst [vmem:[%s232_s14 + $0x58] sm:$0xff] %v318_v11  ;;  %v320_v12 = vld [vmem:[%s4423_s13 + $0xc0] sm:$0xff]  ;;  %v322_v13 = vld [vmem:[%s4423_s13 + $0xd0] sm:$0xff] }
  0x22   : > { %v324_v14 = vld [vmem:[%s4423_s13 + $0xe0] sm:$0xff]  ;;  %321 = vst [vmem:[%s232_s14 + $0x60] sm:$0xff] %v320_v12  ;;  %323 = vst [vmem:[%s232_s14 + $0x68] sm:$0xff] %v322_v13  ;;  %v326_v15 = vld [vmem:[%s4423_s13 + $0xf0] sm:$0xff] }
  0x23   : > { %325 = vst [vmem:[%s232_s14 + $0x70] sm:$0xff] %v324_v14  ;;  %327 = vst [vmem:[%s232_s14 + $0x78] sm:$0xff] %v326_v15 }
  0x24 PF: > { %333 = sbr.rel (!%p4392_p3) target bundleno = 52 (0x34), region = 74  ;;  %s335_s15 = sand.u32 (%p4392_p3), 1, %s4274_s23  }
  0x25   : > { %s3614_s17 = sshll.u32 (%p4392_p3), %s4290_s27, 5  ;;  %s3420_s18 = sshll.u32 (%p4392_p3), %s335_s15, 6 }
  0x26   : > { %s340_s19 = sadd.s32 (%p4392_p3), %s4286_s26, %s3614_s17  ;;  %s337_s10 = scalar_lea.vmem (%p4392_p3), [#allocation3], %s3420_s18 }
  0x27   : > { %s3423_s20 = sshll.u32 (%p4392_p3), %s340_s19, 2 }
  0x28   : > { %s4449_s9 = scalar_lea.vmem (%p4392_p3), %s5730_s1, %s3423_s20 }
  0x29   : > { %v359_v16 = vld [vmem:[%s4449_s9] sm:$0xf]  ;;  %v361_v17 = vld [vmem:[%s4449_s9 + $0x8] sm:$0xf]  ;;  %v363_v18 = vld [vmem:[%s4449_s9 + $0x10] sm:$0xf] }
  0x2a   : > { %360 = vst [vmem:[%s337_s10] sm:$0xf] %v359_v16  ;;  %362 = vst [vmem:[%s337_s10 + $0x4] sm:$0xf] %v361_v17  ;;  %v365_v19 = vld [vmem:[%s4449_s9 + $0x18] sm:$0xf] }
  0x2b   : > { %364 = vst [vmem:[%s337_s10 + $0x8] sm:$0xf] %v363_v18  ;;  %v367_v20 = vld [vmem:[%s4449_s9 + $0x20] sm:$0xf]  ;;  %v369_v21 = vld [vmem:[%s4449_s9 + $0x28] sm:$0xf] }
  0x2c   : > { %366 = vst [vmem:[%s337_s10 + $0xc] sm:$0xf] %v365_v19  ;;  %368 = vst [vmem:[%s337_s10 + $0x10] sm:$0xf] %v367_v20  ;;  %v371_v22 = vld [vmem:[%s4449_s9 + $0x30] sm:$0xf] }
  0x2d   : > { %370 = vst [vmem:[%s337_s10 + $0x14] sm:$0xf] %v369_v21  ;;  %v373_v23 = vld [vmem:[%s4449_s9 + $0x38] sm:$0xf]  ;;  %v375_v24 = vld [vmem:[%s4449_s9 + $0x40] sm:$0xf] }
  0x2e   : > { %372 = vst [vmem:[%s337_s10 + $0x18] sm:$0xf] %v371_v22  ;;  %374 = vst [vmem:[%s337_s10 + $0x1c] sm:$0xf] %v373_v23  ;;  %v377_v25 = vld [vmem:[%s4449_s9 + $0x48] sm:$0xf] }
  0x2f   : > { %376 = vst [vmem:[%s337_s10 + $0x20] sm:$0xf] %v375_v24  ;;  %v379_v26 = vld [vmem:[%s4449_s9 + $0x50] sm:$0xf]  ;;  %v381_v27 = vld [vmem:[%s4449_s9 + $0x58] sm:$0xf] }
  0x30   : > { %378 = vst [vmem:[%s337_s10 + $0x24] sm:$0xf] %v377_v25  ;;  %380 = vst [vmem:[%s337_s10 + $0x28] sm:$0xf] %v379_v26  ;;  %v383_v28 = vld [vmem:[%s4449_s9 + $0x60] sm:$0xf] }
  0x31   : > { %382 = vst [vmem:[%s337_s10 + $0x2c] sm:$0xf] %v381_v27  ;;  %v385_v29 = vld [vmem:[%s4449_s9 + $0x68] sm:$0xf]  ;;  %v387_v30 = vld [vmem:[%s4449_s9 + $0x70] sm:$0xf] }
  0x32   : > { %384 = vst [vmem:[%s337_s10 + $0x30] sm:$0xf] %v383_v28  ;;  %386 = vst [vmem:[%s337_s10 + $0x34] sm:$0xf] %v385_v29  ;;  %v389_v31 = vld [vmem:[%s4449_s9 + $0x78] sm:$0xf] }
  0x33   : > { %388 = vst [vmem:[%s337_s10 + $0x38] sm:$0xf] %v387_v30  ;;  %390 = vst [vmem:[%s337_s10 + $0x3c] sm:$0xf] %v389_v31 }
  0x34 PF: > { %p3424_p12 = scmp.ge.s32.totalorder %s4294_s28, 1  ;;  %p445_p13 = scmp.lt.s32.totalorder %s4294_s28, 5 }
  0x36   : > { %p446_p0 = pnand %p3424_p12, %p445_p13 }
  0x38   : > { %449 = sbr.rel (%p446_p0) target bundleno = 1290 (0x50a), region = 115 }
  0x3d   : > { %v4040_v32 = vld [vmem:[%s5732_s3 + $0x58] sm:$0xff]   ;;  %s4473_s15 = sand.u32 1, %s4270_s22   ;;  %v4041_v33 = vld [vmem:[%s5732_s3 + $0x50] sm:$0xff]   ;;  %v4042_v34 = vld [vmem:[%s5732_s3 + $0x48] sm:$0xff]   ;;  %vm631_vm0 = vcmask 523264   ;;  %vm765_vm1 = vcmask 261120  }
  0x3e   : > { %s3426_s19 = sshll.u32 %s4473_s15, 6  ;;  %3726 = vmatprep.subr.bf16.mxu0 %v4040_v32  ;;  %v4043_v36 = vld [vmem:[%s5732_s3 + $0x40] sm:$0xff]   ;;  %v4046_v37 = vld [vmem:[%s5731_s2 + $0x28] sm:$0xff]   ;;  %v4055_v41 = vld [vmem:[%s5732_s3 + $0x18] sm:$0xff]   ;;  %s3425_s20 = sshll.u32 %s4473_s15, 7 }
  0x3f   : > { %3727 = vmatpush3.bf16.msra.mxu0 %v4040_v32  ;;  %s4482_s30 = scalar_lea.vmem [#allocation3], %s3426_s19  ;;  %v4051_v40 = vld [vmem:[%s5731_s2 + $0x20] sm:$0xff]   ;;  %v4054_v42 = vld [vmem:[%s5731_s2 + $0x8] sm:$0xff]   ;;  %3770 = vmatprep.subr.bf16.mxu1 %v4055_v41  ;;  %v4056_v43 = vld [vmem:[%s5732_s3 + $0x10] sm:$0xff]   ;;  %s4554_s14 = scalar_lea.vmem [#allocation2], %s3425_s20 }
  0x40   : > { %3728 = vmatprep.subr.bf16.mxu0 %v4041_v33  ;;  %v4485_v35 = vld [vmem:[%s4482_s30] sm:$0xff]   ;;  %v4498_v38 = vld [vmem:[%s4482_s30 + $0x8] sm:$0xff]   ;;  %v4501_v39 = vld [vmem:[%s4482_s30 + $0x10] sm:$0xff]   ;;  %3771 = vmatpush3.bf16.msra.mxu1 %v4055_v41  ;;  %s4296_s29 = smov 32   ;;  %s4298_s13 = smov 96  }
  0x41   : > { %3734 = vmatprep.mubr.msk.bf16.mxu0 %vm631_vm0, %v4485_v35  ;;  %3778 = vmatprep.mubr.msk.bf16.mxu1 %vm631_vm0, %v4485_v35  ;;  %v4520_v44 = vld [vmem:[%s4482_s30 + $0x18] sm:$0xff]   ;;  %v4058_v45 = vld [vmem:[%s5732_s3 + $0x8] sm:$0xff]   ;;  %v4526_v46 = vld [vmem:[%s4482_s30 + $0x20] sm:$0xff]   ;;  %s4300_s17 = smov 64  }
  0x42   : > { %3772 = vmatprep.subr.bf16.mxu1 %v4056_v43  ;;  %v4059_v47 = vld [vmem:[%s5732_s3] sm:$0xff]   ;;  %v4536_v48 = vld [vmem:[%s4482_s30 + $0x28] sm:$0xff]   ;;  %v4060_v49 = vld [vmem:[%s5732_s3 + $0x38] sm:$0xff]  }
  0x43   : > { %3729 = vmatpush3.bf16.msra.mxu0 %v4041_v33  ;;  %v4543_v50 = vld [vmem:[%s4482_s30 + $0x30] sm:$0xff]   ;;  %v4557_v52 = vld [vmem:[%s4554_s14] sm:$0xff]  ;;  %v4560_v53 = vld [vmem:[%s4554_s14 + $0x8] sm:$0xff] }
  0x44   : > { %3730 = vmatprep.subr.bf16.mxu0 %v4042_v34  ;;  %3773 = vmatpush3.bf16.msra.mxu1 %v4056_v43  ;;  %v4062_v51 = vld [vmem:[%s5732_s3 + $0x30] sm:$0xff]   ;;  %v4565_v54 = vld [vmem:[%s4482_s30 + $0x38] sm:$0xff]   ;;  %v4063_v55 = vld [vmem:[%s5732_s3 + $0x28] sm:$0xff]   ;;  %v4574_v56 = vpack.c.bf16 %v4560_v53, %v4557_v52 }
  0x45   : > { %3774 = vmatprep.subr.bf16.mxu1 %v4058_v45  ;;  %v4577_v57 = vld [vmem:[%s4554_s14 + $0x10] sm:$0xff]  ;;  %v4580_v58 = vld [vmem:[%s4554_s14 + $0x18] sm:$0xff]  ;;  %v4065_v59 = vld [vmem:[%s5732_s3 + $0x20] sm:$0xff]   ;;  %2364 = vrot.lane.b32.xlu0 %v4557_v52, %s4296_s29 }
  0x46   : > { %v4590_v60 = vld [vmem:[%s4554_s14 + $0x20] sm:$0xff]  ;;  %v4593_v61 = vld [vmem:[%s4554_s14 + $0x28] sm:$0xff]  ;;  %v4601_v62 = vpack.c.bf16 %v4580_v58, %v4577_v57  ;;  %v4066_v63 = vld [vmem:[%s5732_s3 + $0x78] sm:$0xff]   ;;  %2368 = vrot.lane.b32.xlu1 %v4577_v57, %s4296_s29 }
  0x47   : > { %3731 = vmatpush3.bf16.msra.mxu0 %v4042_v34  ;;  %v4608_v0 = vpack.c.bf16 %v4593_v61, %v4590_v60  ;;  %v4057_v1 = vld [vmem:[%s5731_s2] sm:$0xff]   ;;  %v4618_v2 = vld [vmem:[%s4554_s14 + $0x30] sm:$0xff]  ;;  %v4621_v3 = vld [vmem:[%s4554_s14 + $0x38] sm:$0xff] }
  0x48   : > { %3732 = vmatprep.subr.bf16.mxu0 %v4043_v36  ;;  %3775 = vmatpush3.bf16.msra.mxu1 %v4058_v45  ;;  %v4624_v4 = vld [vmem:[%s4554_s14 + $0x40] sm:$0xff]  ;;  %v4627_v5 = vld [vmem:[%s4554_s14 + $0x48] sm:$0xff]  ;;  %v4061_v6 = vld [vmem:[%s5731_s2 + $0x18] sm:$0xff]   ;;  %v4638_v7 = vpack.c.bf16 %v4621_v3, %v4618_v2 }
  0x49   : > { %3776 = vmatprep.subr.bf16.mxu1 %v4059_v47  ;;  %v4642_v8 = vpack.c.bf16 %v4627_v5, %v4624_v4  ;;  %v4649_v9 = vld [vmem:[%s4554_s14 + $0x50] sm:$0xff]  ;;  %v4652_v10 = vld [vmem:[%s4554_s14 + $0x58] sm:$0xff]  ;;  %v4655_v11 = vld [vmem:[%s4554_s14 + $0x60] sm:$0xff]  ;;  %2366 = vrot.lane.b32.xlu0 %v4560_v53, %s4296_s29 }
  0x4a   : > { %v4658_v12 = vld [vmem:[%s4554_s14 + $0x68] sm:$0xff]  ;;  %v4666_v13 = vpack.c.bf16 %v4652_v10, %v4649_v9  ;;  %v4068_v15 = vld [vmem:[%s5732_s3 + $0x70] sm:$0xff]   ;;  %v4683_v17 = vld [vmem:[%s4554_s14 + $0x78] sm:$0xff]  ;;  %2370 = vrot.lane.b32.xlu1 %v4580_v58, %s4296_s29 }
  0x4b   : > { %3733 = vmatpush3.bf16.msra.mxu0 %v4043_v36  ;;  %v4670_v14 = vpack.c.bf16 %v4658_v12, %v4655_v11  ;;  %v4680_v16 = vld [vmem:[%s4554_s14 + $0x70] sm:$0xff]  ;;  %v4069_v19 = vld [vmem:[%s5732_s3 + $0x68] sm:$0xff]   ;;  %v4071_v20 = vld [vmem:[%s5732_s3 + $0x60] sm:$0xff]  }
  0x4c   : > { %3750 = vmatprep.subr.bf16.mxu0 %v4046_v37  ;;  %3777 = vmatpush3.bf16.msra.mxu1 %v4059_v47  ;;  %v4691_v18 = vpack.c.bf16 %v4683_v17, %v4680_v16  ;;  %v4072_v21 = vld [vmem:[%s5732_s3 + $0x98] sm:$0xff]   ;;  %v4064_v22 = vld [vmem:[%s5731_s2 + $0x10] sm:$0xff]   ;;  %v4075_v25 = vld [vmem:[%s5732_s3 + $0x88] sm:$0xff]  }
  0x4d   : > { %3814 = vmatprep.subr.bf16.mxu1 %v4060_v49  ;;  %v4067_v23 = vld [vmem:[%s5731_s2 + $0x38] sm:$0xff]   ;;  %v4074_v24 = vld [vmem:[%s5732_s3 + $0x90] sm:$0xff]   ;;  %v4077_v26 = vld [vmem:[%s5732_s3 + $0x80] sm:$0xff]   ;;  %2372 = vrot.lane.b32.xlu0 %v4590_v60, %s4296_s29 }
  0x4e   : > { %3735 = vmatmul.mubr.msk.bf16.vlgmr.msra.gmra.mxu0 %vm631_vm0, %v4498_v38  ;;  %v4070_v27 = vld [vmem:[%s5731_s2 + $0x30] sm:$0xff]   ;;  %v4073_v28 = vld [vmem:[%s5731_s2 + $0x48] sm:$0xff]   ;;  %2374 = vrot.lane.b32.xlu1 %v4593_v61, %s4296_s29  ;;  %v4076_v29 = vld [vmem:[%s5731_s2 + $0x40] sm:$0xff]  }
  0x4f   : > { %3751 = vmatpush3.bf16.msra.mxu0 %v4046_v37  ;;  %3738 = vmatprep.mubr.msk.bf16.mxu0 %vm631_vm0, %v4501_v39 }
  0x50   : > { %3752 = vmatprep.subr.bf16.mxu0 %v4051_v40  ;;  %3779 = vmatmul.mubr.msk.bf16.vlgmr.msra.gmra.mxu1 %vm631_vm0, %v4498_v38 }
  0x51   : > { %3815 = vmatpush3.bf16.msra.mxu1 %v4060_v49  ;;  %3782 = vmatprep.mubr.msk.bf16.mxu1 %vm631_vm0, %v4501_v39 }
  0x52   : > { %3816 = vmatprep.subr.bf16.mxu1 %v4062_v51  ;;  %2378 = vrot.lane.b32.xlu1 %v4621_v3, %s4296_s29 }
  0x53   : > { %3753 = vmatpush3.bf16.msra.mxu0 %v4051_v40  ;;  %2376 = vrot.lane.b32.xlu0 %v4618_v2, %s4296_s29 }
  0x54   : > { %3794 = vmatprep.subr.bf16.mxu0 %v4054_v42 }
  0x55   : > { %3817 = vmatpush3.bf16.msra.mxu1 %v4062_v51 }
  0x56   : > { %3739 = vmatmul.mubr.msk.bf16.gmra.mxu0 %vm631_vm0, %v4520_v44  ;;  %3818 = vmatprep.subr.bf16.mxu1 %v4063_v55 }
  0x57   : > { %3742 = vmatprep.mubr.msk.bf16.mxu0 %vm631_vm0, %v4526_v46  ;;  %2382 = vrot.lane.b32.xlu1 %v4627_v5, %s4296_s29 }
  0x58   : > { %3783 = vmatmul.mubr.msk.bf16.gmra.mxu1 %vm631_vm0, %v4520_v44  ;;  %2380 = vrot.lane.b32.xlu0 %v4624_v4, %s4296_s29 }
  0x59   : > { %3786 = vmatprep.mubr.msk.bf16.mxu1 %vm631_vm0, %v4526_v46  ;;  %3819 = vmatpush3.bf16.msra.mxu1 %v4063_v55 }
  0x5a   : > { %3820 = vmatprep.subr.bf16.mxu1 %v4065_v59 }
  0x5b   : > { %2386 = vrot.lane.b32.xlu1 %v4652_v10, %s4296_s29 }
  0x5c   : > { %2384 = vrot.lane.b32.xlu0 %v4649_v9, %s4296_s29 }
  0x5d   : > { %3821 = vmatpush3.bf16.msra.mxu1 %v4065_v59 }
  0x5e   : > { %3743 = vmatmul.mubr.msk.bf16.gmra.mxu0 %vm631_vm0, %v4536_v48  ;;  %3858 = vmatprep.subr.bf16.mxu1 %v4066_v63 }
  0x5f   : > { %3746 = vmatprep.mubr.msk.bf16.mxu0 %vm631_vm0, %v4543_v50  ;;  %2390 = vrot.lane.b32.xlu1 %v4658_v12, %s4296_s29 }
  0x60   : > { %3787 = vmatmul.mubr.msk.bf16.gmra.mxu1 %vm631_vm0, %v4536_v48  ;;  %2388 = vrot.lane.b32.xlu0 %v4655_v11, %s4296_s29 }
  0x61   : > { %3790 = vmatprep.mubr.msk.bf16.mxu1 %vm631_vm0, %v4543_v50 }
  0x63   : > { %2394 = vrot.lane.b32.xlu1 %v4683_v17, %s4296_s29 }
  0x64   : > { %2392 = vrot.lane.b32.xlu0 %v4680_v16, %s4296_s29 }
  0x66   : > { %3747 = vmatmul.mubr.msk.bf16.gmra.mxu0 %vm631_vm0, %v4565_v54 }
  0x67   : > { %3754 = vmatprep.mubr.msk.bf16.mxu0 %vm765_vm1, %v4574_v56 }
  0x68   : > { %3791 = vmatmul.mubr.msk.bf16.gmra.mxu1 %vm631_vm0, %v4565_v54 }
  0x69   : > { %3822 = vmatprep.mubr.msk.bf16.mxu1 %vm631_vm0, %v4485_v35 }
  0x6e   : > { %3755 = vmatmul.mubr.msk.bf16.vlgmr.msra.gmra.mxu0 %vm765_vm1, %v4601_v62 }
  0x6f   : > { %3795 = vmatpush3.bf16.msra.mxu0 %v4054_v42  ;;  %3758 = vmatprep.mubr.msk.bf16.mxu0 %vm765_vm1, %v4608_v0 }
  0x70   : > { %3796 = vmatprep.subr.bf16.mxu0 %v4057_v1  ;;  %3823 = vmatmul.mubr.msk.bf16.vlgmr.msra.gmra.mxu1 %vm631_vm0, %v4498_v38 }
  0x71   : > { %3859 = vmatpush3.bf16.msra.mxu1 %v4066_v63  ;;  %3826 = vmatprep.mubr.msk.bf16.mxu1 %vm631_vm0, %v4501_v39 }
  0x72   : > { %3860 = vmatprep.subr.bf16.mxu1 %v4068_v15 }
  0x73   : > { %3797 = vmatpush3.bf16.msra.mxu0 %v4057_v1 }
  0x74   : > { %3838 = vmatprep.subr.bf16.mxu0 %v4061_v6 }
  0x75   : > { %3861 = vmatpush3.bf16.msra.mxu1 %v4068_v15 }
  0x76   : > { %3759 = vmatmul.mubr.msk.bf16.gmra.mxu0 %vm765_vm1, %v4638_v7  ;;  %3862 = vmatprep.subr.bf16.mxu1 %v4069_v19 }
  0x77   : > { %3762 = vmatprep.mubr.msk.bf16.mxu0 %vm765_vm1, %v4642_v8 }
  0x78   : > { %3827 = vmatmul.mubr.msk.bf16.gmra.mxu1 %vm631_vm0, %v4520_v44 }
  0x79   : > { %3830 = vmatprep.mubr.msk.bf16.mxu1 %vm631_vm0, %v4526_v46  ;;  %3863 = vmatpush3.bf16.msra.mxu1 %v4069_v19 }
  0x7a   : > { %3864 = vmatprep.subr.bf16.mxu1 %v4071_v20 }
  0x7d   : > { %3865 = vmatpush3.bf16.msra.mxu1 %v4071_v20 }
  0x7e   : > { %3763 = vmatmul.mubr.msk.bf16.gmra.mxu0 %vm765_vm1, %v4666_v13  ;;  %3902 = vmatprep.subr.bf16.mxu1 %v4072_v21 }
  0x7f   : > { %3766 = vmatprep.mubr.msk.bf16.mxu0 %vm765_vm1, %v4670_v14 }
  0x80   : > { %3831 = vmatmul.mubr.msk.bf16.gmra.mxu1 %vm631_vm0, %v4536_v48 }
  0x81   : > { %3834 = vmatprep.mubr.msk.bf16.mxu1 %vm631_vm0, %v4543_v50 }
  0x86   : > { %3767 = vmatmul.mubr.msk.bf16.gmra.mxu0 %vm765_vm1, %v4691_v18 }
  0x87   : > { %3798 = vmatprep.mubr.msk.bf16.mxu0 %vm765_vm1, %v4574_v56 }
  0x88   : > { %3835 = vmatmul.mubr.msk.bf16.gmra.mxu1 %vm631_vm0, %v4565_v54 }
  0x89   : > { %3866 = vmatprep.mubr.msk.bf16.mxu1 %vm631_vm0, %v4485_v35 }
  0x8e   : > { %3799 = vmatmul.mubr.msk.bf16.vlgmr.msra.gmra.mxu0 %vm765_vm1, %v4601_v62 }
  0x8f   : > { %3839 = vmatpush3.bf16.msra.mxu0 %v4061_v6  ;;  %3802 = vmatprep.mubr.msk.bf16.mxu0 %vm765_vm1, %v4608_v0 }
  0x90   : > { %3840 = vmatprep.subr.bf16.mxu0 %v4064_v22  ;;  %3867 = vmatmul.mubr.msk.bf16.vlgmr.msra.gmra.mxu1 %vm631_vm0, %v4498_v38 }
  0x91   : > { %3903 = vmatpush3.bf16.msra.mxu1 %v4072_v21  ;;  %3870 = vmatprep.mubr.msk.bf16.mxu1 %vm631_vm0, %v4501_v39 }
  0x92   : > { %3904 = vmatprep.subr.bf16.mxu1 %v4074_v24 }
  0x93   : > { %3841 = vmatpush3.bf16.msra.mxu0 %v4064_v22 }
  0x94   : > { %3882 = vmatprep.subr.bf16.mxu0 %v4067_v23 }
  0x95   : > { %3905 = vmatpush3.bf16.msra.mxu1 %v4074_v24 }
  0x96   : > { %3803 = vmatmul.mubr.msk.bf16.gmra.mxu0 %vm765_vm1, %v4638_v7  ;;  %3906 = vmatprep.subr.bf16.mxu1 %v4075_v25 }
  0x97   : > { %3806 = vmatprep.mubr.msk.bf16.mxu0 %vm765_vm1, %v4642_v8 }
  0x98   : > { %3871 = vmatmul.mubr.msk.bf16.gmra.mxu1 %vm631_vm0, %v4520_v44 }
  0x99   : > { %3874 = vmatprep.mubr.msk.bf16.mxu1 %vm631_vm0, %v4526_v46  ;;  %3907 = vmatpush3.bf16.msra.mxu1 %v4075_v25 }
  0x9a   : > { %3908 = vmatprep.subr.bf16.mxu1 %v4077_v26 }
  0x9d   : > { %3909 = vmatpush3.bf16.msra.mxu1 %v4077_v26 }
  0x9e   : > { %3807 = vmatmul.mubr.msk.bf16.gmra.mxu0 %vm765_vm1, %v4666_v13 }
  0x9f   : > { %3810 = vmatprep.mubr.msk.bf16.mxu0 %vm765_vm1, %v4670_v14 }
  0xa0   : > { %3875 = vmatmul.mubr.msk.bf16.gmra.mxu1 %vm631_vm0, %v4536_v48 }
  0xa1   : > { %3878 = vmatprep.mubr.msk.bf16.mxu1 %vm631_vm0, %v4543_v50 }
  0xa6   : > { %3811 = vmatmul.mubr.msk.bf16.gmra.mxu0 %vm765_vm1, %v4691_v18 }
  0xa7   : > { %3842 = vmatprep.mubr.msk.bf16.mxu0 %vm765_vm1, %v4574_v56 }
  0xa8   : > { %3879 = vmatmul.mubr.msk.bf16.gmra.mxu1 %vm631_vm0, %v4565_v54 }
  0xa9   : > { %3910 = vmatprep.mubr.msk.bf16.mxu1 %vm631_vm0, %v4485_v35 }
  0xae   : > { %3843 = vmatmul.mubr.msk.bf16.vlgmr.msra.gmra.mxu0 %vm765_vm1, %v4601_v62 }
  0xaf   : > { %3883 = vmatpush3.bf16.msra.mxu0 %v4067_v23  ;;  %3846 = vmatprep.mubr.msk.bf16.mxu0 %vm765_vm1, %v4608_v0 }
  0xb0   : > { %3884 = vmatprep.subr.bf16.mxu0 %v4070_v27  ;;  %3911 = vmatmul.mubr.msk.bf16.vlgmr.msra.gmra.mxu1 %vm631_vm0, %v4498_v38 }
  0xb1   : > { %3914 = vmatprep.mubr.msk.bf16.mxu1 %vm631_vm0, %v4501_v39 }
  0xb3   : > { %3885 = vmatpush3.bf16.msra.mxu0 %v4070_v27 }
  0xb4   : > { %3926 = vmatprep.subr.bf16.mxu0 %v4073_v28 }
  0xb6   : > { %3847 = vmatmul.mubr.msk.bf16.gmra.mxu0 %vm765_vm1, %v4638_v7 }
  0xb7   : > { %3850 = vmatprep.mubr.msk.bf16.mxu0 %vm765_vm1, %v4642_v8 }
  0xb8   : > { %3915 = vmatmul.mubr.msk.bf16.gmra.mxu1 %vm631_vm0, %v4520_v44 }
  0xb9   : > { %3918 = vmatprep.mubr.msk.bf16.mxu1 %vm631_vm0, %v4526_v46 }
  0xbe   : > { %3851 = vmatmul.mubr.msk.bf16.gmra.mxu0 %vm765_vm1, %v4666_v13 }
  0xbf   : > { %3854 = vmatprep.mubr.msk.bf16.mxu0 %vm765_vm1, %v4670_v14 }
  0xc0   : > { %3919 = vmatmul.mubr.msk.bf16.gmra.mxu1 %vm631_vm0, %v4536_v48 }
  0xc1   : > { %3922 = vmatprep.mubr.msk.bf16.mxu1 %vm631_vm0, %v4543_v50 }
  0xc6   : > { %3855 = vmatmul.mubr.msk.bf16.gmra.mxu0 %vm765_vm1, %v4691_v18 }
  0xc7   : > { %3886 = vmatprep.mubr.msk.bf16.mxu0 %vm765_vm1, %v4574_v56 }
  0xc8   : > { %3923 = vmatmul.mubr.msk.bf16.gmra.mxu1 %vm631_vm0, %v4565_v54 }
  0xce   : > { %3887 = vmatmul.mubr.msk.bf16.vlgmr.msra.gmra.mxu0 %vm765_vm1, %v4601_v62 }
  0xcf   : > { %3927 = vmatpush3.bf16.msra.mxu0 %v4073_v28  ;;  %3890 = vmatprep.mubr.msk.bf16.mxu0 %vm765_vm1, %v4608_v0 }
  0xd0   : > { %3928 = vmatprep.subr.bf16.mxu0 %v4076_v29 }
  0xd3   : > { %3929 = vmatpush3.bf16.msra.mxu0 %v4076_v29 }
  0xd6   : > { %3891 = vmatmul.mubr.msk.bf16.gmra.mxu0 %vm765_vm1, %v4638_v7 }
  0xd7   : > { %3894 = vmatprep.mubr.msk.bf16.mxu0 %vm765_vm1, %v4642_v8 }
  0xde   : > { %3895 = vmatmul.mubr.msk.bf16.gmra.mxu0 %vm765_vm1, %v4666_v13 }
  0xdf   : > { %3898 = vmatprep.mubr.msk.bf16.mxu0 %vm765_vm1, %v4670_v14 }
  0xe6   : > { %3899 = vmatmul.mubr.msk.bf16.gmra.mxu0 %vm765_vm1, %v4691_v18 }
  0xe7   : > { %3930 = vmatprep.mubr.msk.bf16.mxu0 %vm765_vm1, %v4574_v56 }
  0xee   : > { %3931 = vmatmul.mubr.msk.bf16.vlgmr.msra.gmra.mxu0 %vm765_vm1, %v4601_v62 }
  0xef   : > { %3934 = vmatprep.mubr.msk.bf16.mxu0 %vm765_vm1, %v4608_v0 }
  0xf6   : > { %3935 = vmatmul.mubr.msk.bf16.gmra.mxu0 %vm765_vm1, %v4638_v7 }
  0xf7   : > { %3938 = vmatprep.mubr.msk.bf16.mxu0 %vm765_vm1, %v4642_v8 }
  0xfe   : > { %3939 = vmatmul.mubr.msk.bf16.gmra.mxu0 %vm765_vm1, %v4666_v13 }
  0xff   : > { %3942 = vmatprep.mubr.msk.bf16.mxu0 %vm765_vm1, %v4670_v14 }
 0x106   : > { %3943 = vmatmul.mubr.msk.bf16.gmra.mxu0 %vm765_vm1, %v4691_v18 }
 0x10e   : > { %v3736_v30 = vpop.f32.mrf.mxu0 }
 0x110   : > { %v690_v31 = vpop.f32.mrf.mxu0  ;;  %v4866_v40 = vpop.f32.mrf.mxu1 }
 0x112   : > { %v3737_v32 = vpop.f32.mrf.mxu0  ;;  %v4868_v42 = vpop.f32.mrf.mxu1 }
 0x114   : > { %v693_v33 = vpop.f32.mrf.mxu0  ;;  %v4870_v44 = vpop.f32.mrf.mxu1 }
 0x116   : > { %v3740_v34 = vpop.f32.mrf.mxu0  ;;  %v4872_v46 = vpop.f32.mrf.mxu1 }
 0x118   : > { %v706_v35 = vpop.f32.mrf.mxu0  ;;  %v4874_v48 = vpop.f32.mrf.mxu1 }
 0x11a   : > { %v3741_v36 = vpop.f32.mrf.mxu0  ;;  %v4876_v50 = vpop.f32.mrf.mxu1 }
 0x11c   : > { %v709_v37 = vpop.f32.mrf.mxu0  ;;  %v4878_v52 = vpop.f32.mrf.mxu1 }
 0x11e   : > { %v3744_v38 = vpop.f32.mrf.mxu0  ;;  %v4880_v54 = vpop.f32.mrf.mxu1 }
 0x120   : > { %v722_v39 = vpop.f32.mrf.mxu0  ;;  %v4882_v57 = vpop.f32.mrf.mxu1 }
 0x122   : > { %v3745_v41 = vpop.f32.mrf.mxu0  ;;  %v4886_v60 = vpop.f32.mrf.mxu1 }
 0x124   : > { %v725_v43 = vpop.f32.mrf.mxu0  ;;  %v4888_v63 = vpop.f32.mrf.mxu1 }
 0x126   : > { %v3748_v45 = vpop.f32.mrf.mxu0  ;;  %v4892_v2 = vpop.f32.mrf.mxu1 }
 0x128   : > { %v738_v47 = vpop.f32.mrf.mxu0  ;;  %v3792_v5 = vpop.f32.mrf.mxu1 }
 0x12a   : > { %v3749_v49 = vpop.f32.mrf.mxu0  ;;  %v4894_v8 = vpop.f32.mrf.mxu1 }
 0x12c   : > { %v741_v51 = vpop.f32.mrf.mxu0  ;;  %v3793_v11 = vpop.f32.mrf.mxu1 }
 0x12e   : > { %v3756_v53 = vpop.f32.mrf.mxu0  ;;  %v4898_v14 = vpop.f32.mrf.mxu1 }
 0x12f   : > { %v833_v55 = vadd.f32 %v3756_v53, %v3736_v30 }
 0x130   : > { %v824_v56 = vpop.f32.mrf.mxu0  ;;  %v4902_v17 = vpop.f32.mrf.mxu1 }
 0x131   : > { %v4884_v58 = vadd.f32 %v824_v56, %v690_v31 }
 0x132   : > { %v3757_v59 = vpop.f32.mrf.mxu0  ;;  %v4904_v20 = vpop.f32.mrf.mxu1 }
 0x133   : > { %v836_v61 = vadd.f32 %v3757_v59, %v3737_v32 }
 0x134   : > { %v827_v62 = vpop.f32.mrf.mxu0  ;;  %v4908_v23 = vpop.f32.mrf.mxu1 }
 0x135   : > { %v4890_v0 = vadd.f32 %v827_v62, %v693_v33 }
 0x136   : > { %v3760_v1 = vpop.f32.mrf.mxu0  ;;  %v4910_v26 = vpop.f32.mrf.mxu1 }
 0x137   : > { %v849_v3 = vadd.f32 %v3760_v1, %v3740_v34 }
 0x138   : > { %v840_v4 = vpop.f32.mrf.mxu0  ;;  %v4914_v29 = vpop.f32.mrf.mxu1 }
 0x139   : > { %v841_v6 = vadd.f32 %v840_v4, %v706_v35 }
 0x13a   : > { %v3761_v7 = vpop.f32.mrf.mxu0  ;;  %v4916_v32 = vpop.f32.mrf.mxu1 }
 0x13b   : > { %v4896_v9 = vadd.f32 %v3761_v7, %v3741_v36 }
 0x13c   : > { %v843_v10 = vpop.f32.mrf.mxu0  ;;  %v4920_v35 = vpop.f32.mrf.mxu1 }
 0x13d   : > { %v844_v12 = vadd.f32 %v843_v10, %v709_v37  ;;  %v4925_v37 = vld [vmem:[%s5734_s5] ss:$0 sm:$0xff] }
 0x13e   : > { %v3764_v13 = vpop.f32.mrf.mxu0 }
 0x13f   : > { %v4900_v15 = vadd.f32 %v3764_v13, %v3744_v38  ;;  %v899_v62 = vadd.f32 %v4925_v37, %v844_v12 }
 0x140   : > { %v856_v16 = vpop.f32.mrf.mxu0 }
 0x141   : > { %v857_v18 = vadd.f32 %v856_v16, %v722_v39  ;;  %v4927_v39 = vpop.f32.mrf.mxu1 }
 0x142   : > { %v3765_v19 = vpop.f32.mrf.mxu0 }
 0x143   : > { %v4906_v21 = vadd.f32 %v3765_v19, %v3745_v41  ;;  %v898_v41 = vadd.f32 %v4925_v37, %v841_v6  ;;  %v897_v6 = vadd.f32 %v4925_v37, %v836_v61  ;;  %v902_v11 = vadd.f32 %v4925_v37, %v857_v18 }
 0x144   : > { %v859_v22 = vpop.f32.mrf.mxu0 }
 0x145   : > { %v860_v24 = vadd.f32 %v859_v22, %v725_v43 }
 0x146   : > { %v3768_v25 = vpop.f32.mrf.mxu0 }
 0x147   : > { %v4912_v27 = vadd.f32 %v3768_v25, %v3748_v45 }
 0x148   : > { %v872_v28 = vpop.f32.mrf.mxu0 }
 0x149   : > { %v873_v30 = vadd.f32 %v872_v28, %v738_v47  ;;  %v4931_v47 = vpop.f32.mrf.mxu1 }
 0x14a   : > { %v3769_v31 = vpop.f32.mrf.mxu0 }
 0x14b   : > { %v4918_v33 = vadd.f32 %v3769_v31, %v3749_v49  ;;  %v896_v49 = vadd.f32 %v4925_v37, %v833_v55  ;;  %v4937_v59 = vpop.f32.mrf.mxu1 }
 0x14c   : > { %v875_v34 = vpop.f32.mrf.mxu0 }
 0x14d   : > { %v876_v36 = vadd.f32 %v875_v34, %v741_v51 }
 0x14e   : > { %v3800_v38 = vpop.f32.mrf.mxu0 }
 0x14f   : > { %v1098_v43 = vadd.f32 %v3800_v38, %v4866_v40  ;;  %v4943_v40 = vpop.f32.mrf.mxu1  ;;  %v901_v38 = vadd.f32 %v4925_v37, %v4896_v9 }
 0x150   : > { %v1089_v45 = vpop.f32.mrf.mxu0 }
 0x151   : > { %v4934_v53 = vadd.f32 %v1098_v43, %v898_v41  ;;  %v1090_v51 = vadd.f32 %v1089_v45, %v4868_v42  ;;  %v4949_v42 = vpop.f32.mrf.mxu1  ;;  %v906_v45 = vadd.f32 %v4925_v37, %v873_v30 }
 0x152   : > { %v3801_v56 = vpop.f32.mrf.mxu0 }
 0x153   : > { %v4940_v1 = vadd.f32 %v1090_v51, %v896_v49  ;;  %v1101_v4 = vadd.f32 %v3801_v56, %v4870_v44  ;;  %v4953_v19 = vpop.f32.mrf.mxu1  ;;  %v900_v44 = vadd.f32 %v4925_v37, %v849_v3 }
 0x154   : > { %v1092_v5 = vpop.f32.mrf.mxu0 }
 0x155   : > { %v4946_v7 = vadd.f32 %v1101_v4, %v899_v62  ;;  %v1093_v55 = vadd.f32 %v1092_v5, %v4872_v46  ;;  %v4959_v28 = vpop.f32.mrf.mxu1  ;;  %v903_v46 = vadd.f32 %v4925_v37, %v860_v24  ;;  %v907_v5 = vadd.f32 %v4925_v37, %v876_v36 }
 0x156   : > { %v3804_v10 = vpop.f32.mrf.mxu0 }
 0x157   : > { %v1219_v13 = vadd.f32 %v1093_v55, %v897_v6  ;;  %v1114_v12 = vadd.f32 %v3804_v10, %v4874_v48  ;;  %v3837_v48 = vpop.f32.mrf.mxu1  ;;  %v905_v10 = vadd.f32 %v4925_v37, %v4906_v21 }
 0x158   : > { %v1105_v16 = vpop.f32.mrf.mxu0 }
 0x159   : > { %v4956_v22 = vadd.f32 %v1114_v12, %v902_v11  ;;  %v1106_v61 = vadd.f32 %v1105_v16, %v4876_v50  ;;  %v4970_v50 = vpop.f32.mrf.mxu1 }
 0x15a   : > { %v3805_v25 = vpop.f32.mrf.mxu0 }
 0x15b   : > { %v4962_v31 = vadd.f32 %v1106_v61, %v900_v44  ;;  %v1117_v18 = vadd.f32 %v3805_v25, %v4878_v52  ;;  %v4974_v56 = vpop.f32.mrf.mxu1  ;;  %v904_v52 = vadd.f32 %v4925_v37, %v4900_v15 }
 0x15c   : > { %v1108_v34 = vpop.f32.mrf.mxu0 }
 0x15d   : > { %v4967_v41 = vadd.f32 %v1117_v18, %v903_v46  ;;  %v1109_v3 = vadd.f32 %v1108_v34, %v4880_v54  ;;  %v1628_v54 = vpop.f32.mrf.mxu1 }
 0x15e   : > { %v3808_v43 = vpop.f32.mrf.mxu0 }
 0x15f   : > { %v1223_v49 = vadd.f32 %v1109_v3, %v901_v38  ;;  %v1130_v24 = vadd.f32 %v3808_v43, %v4882_v57  ;;  %v4985_v57 = vpop.f32.mrf.mxu1 }
 0x160   : > { %v1121_v51 = vpop.f32.mrf.mxu0 }
 0x161   : > { %v4978_v62 = vadd.f32 %v1130_v24, %v906_v45  ;;  %v1122_v9 = vadd.f32 %v1121_v51, %v4886_v60  ;;  %v4992_v60 = vpop.f32.mrf.mxu1  ;;  %v895_v24 = vadd.f32 %v4925_v37, %v4890_v0 }
 0x162   : > { %v3809_v4 = vpop.f32.mrf.mxu0 }
 0x163   : > { %v4982_v6 = vadd.f32 %v1122_v9, %v904_v52  ;;  %v1133_v30 = vadd.f32 %v3809_v4, %v4888_v63  ;;  %v4994_v36 = vpop.f32.mrf.mxu1  ;;  %v908_v63 = vadd.f32 %v4925_v37, %v4912_v27 }
 0x164   : > { %v1124_v55 = vpop.f32.mrf.mxu0 }
 0x165   : > { %v4989_v11 = vadd.f32 %v1133_v30, %v907_v5  ;;  %v1125_v15 = vadd.f32 %v1124_v55, %v4892_v2  ;;  %v4999_v46 = vpop.f32.mrf.mxu1  ;;  %v909_v2 = vadd.f32 %v4925_v37, %v4918_v33 }
 0x166   : > { %v3812_v12 = vpop.f32.mrf.mxu0 }
 0x167   : > { %v1227_v16 = vadd.f32 %v1125_v15, %v905_v10  ;;  %v5003_v34 = vpop.f32.mrf.mxu1 }
 0x168   : > { %v1137_v44 = vpop.f32.mrf.mxu0 }
 0x169   : > { %v1138_v61 = vadd.f32 %v1137_v44, %v4894_v8  ;;  %v5008_v3 = vpop.f32.mrf.mxu1 }
 0x16a   : > { %v3813_v25 = vpop.f32.mrf.mxu0 }
 0x16b   : > { %v5001_v21 = vadd.f32 %v1138_v61, %v908_v63  ;;  %v5011_v45 = vpop.f32.mrf.mxu1 }
 0x16c   : > { %v1140_v18 = vpop.f32.mrf.mxu0 }
 0x16d   : > { %v1141_v48 = vadd.f32 %v1140_v18, %v4898_v14  ;;  %v5018_v33 = vpop.f32.mrf.mxu1 }
 0x16e   : > { %v3844_v38 = vpop.f32.mrf.mxu0 }
 0x16f   : > { %v1231_v43 = vadd.f32 %v1141_v48, %v909_v2  ;;  %v1422_v27 = vadd.f32 %v3844_v38, %v4902_v17  ;;  %v5023_v5 = vpop.f32.mrf.mxu1 }
 0x170   : > { %v1413_v8 = vpop.f32.mrf.mxu0 }
 0x171   : > { %v5015_v51 = vadd.f32 %v1422_v27, %v1219_v13  ;;  %v1414_v52 = vadd.f32 %v1413_v8, %v4904_v20  ;;  %v5029_v13 = vpop.f32.mrf.mxu1 }
 0x172   : > { %v3845_v9 = vpop.f32.mrf.mxu0 }
 0x173   : > { %v5020_v14 = vadd.f32 %v1414_v52, %v895_v24  ;;  %v1425_v4 = vadd.f32 %v3845_v9, %v4908_v23  ;;  %v5033_v15 = vpop.f32.mrf.mxu1 }
 0x174   : > { %v1416_v54 = vpop.f32.mrf.mxu0 }
 0x175   : > { %v5026_v17 = vadd.f32 %v1425_v4, %v4934_v53  ;;  %v1417_v30 = vadd.f32 %v1416_v54, %v4910_v26  ;;  %v5038_v63 = vpop.f32.mrf.mxu1 }
 0x176   : > { %v3848_v0 = vpop.f32.mrf.mxu0 }
 0x177   : > { %v1542_v20 = vadd.f32 %v1417_v30, %v4940_v1  ;;  %v1438_v55 = vadd.f32 %v3848_v0, %v4914_v29  ;;  %v5042_v25 = vpop.f32.mrf.mxu1  ;;  %v4081_v30 = vld [vmem:[%s5733_s4] ss:$8 sps:$4 sm:$0xff]  }
 0x178   : > { %v1429_v10 = vpop.f32.mrf.mxu0 }
 0x179   : > { %v5035_v12 = vadd.f32 %v1438_v55, %v1223_v49  ;;  %v1430_v23 = vadd.f32 %v1429_v10, %v4916_v32  ;;  %v5048_v49 = vpop.f32.mrf.mxu1 }
 0x17a   : > { %v3849_v44 = vpop.f32.mrf.mxu0 }
 0x17b   : > { %v1545_v53 = vadd.f32 %v1430_v23, %v4946_v7  ;;  %v1441_v26 = vadd.f32 %v3849_v44, %v4920_v35  ;;  %v5052_v38 = vpop.f32.mrf.mxu1 }
 0x17c   : > { %v1432_v61 = vpop.f32.mrf.mxu0 }
 0x17d   : > { %v5045_v1 = vadd.f32 %v1441_v26, %v4956_v22  ;;  %v1433_v29 = vadd.f32 %v1432_v61, %v4927_v39  ;;  %v1952_v8 = vpop.f32.mrf.mxu1 }
 0x17e   : > { %v3852_v18 = vpop.f32.mrf.mxu0 }
 0x17f   : > { %v1546_v32 = vadd.f32 %v1433_v29, %v4962_v31  ;;  %v1454_v2 = vadd.f32 %v3852_v18, %v4931_v47  ;;  %v5059_v52 = vpop.f32.mrf.mxu1 }
 0x180   : > { %v1445_v48 = vpop.f32.mrf.mxu0 }
 0x181   : > { %v5054_v7 = vadd.f32 %v1454_v2, %v1227_v16  ;;  %v1446_v35 = vadd.f32 %v1445_v48, %v4937_v59  ;;  %v4078_v16 = vld [vmem:[%s5733_s4 + $0x10] ss:$8 sps:$4 sm:$0xff]   ;;  %v4080_v59 = vld [vmem:[%s5733_s4 + $0x14] ss:$8 sps:$4 sm:$0xff]   ;;  %v894_v48 = vadd.f32 %v4925_v37, %v4884_v58 }
 0x182   : > { %v3853_v27 = vpop.f32.mrf.mxu0  ;;  %2520 = vmatprep.subr.bf16.mxu1 %v4080_v59 }
 0x183   : > { %v1549_v22 = vadd.f32 %v1446_v35, %v4967_v41  ;;  %v1457_v39 = vadd.f32 %v3853_v27, %v4943_v40  ;;  %v1955_v41 = vpop.f32.mrf.mxu1  ;;  %v4083_v40 = vld [vmem:[%s5733_s4 + $0x4] ss:$8 sps:$4 sm:$0xff]   ;;  %2521 = vmatpush1.bf16.msra.mxu1 %v4078_v16 }
 0x184   : > { %v1448_v24 = vpop.f32.mrf.mxu0  ;;  %2522 = vmatprep.subr.bf16.mxu1 %v4083_v40 }
 0x185   : > { %v5062_v31 = vadd.f32 %v1457_v39, %v4978_v62  ;;  %v1449_v47 = vadd.f32 %v1448_v24, %v4949_v42  ;;  %v4297_v42 = vmov 0   ;;  %v3916_v59 = vpop.f32.mrf.mxu1 }
 0x186   : > { %v3856_v9 = vpop.f32.mrf.mxu0  ;;  %2540 = vmatprep.mubr.bf16.mxu1 %v4297_v42 }
 0x187   : > { %v1550_v4 = vadd.f32 %v1449_v47, %v4982_v6  ;;  %v1470_v62 = vadd.f32 %v3856_v9, %v4953_v19  ;;  %2523 = vmatpush1.bf16.msra.mxu1 %v4081_v30 }
 0x188   : > { %v1461_v54 = vpop.f32.mrf.mxu0 }
 0x189   : > { %v5080_v0 = vadd.f32 %v1470_v62, %v1231_v43  ;;  %v1462_v55 = vadd.f32 %v1461_v54, %v4959_v28 }
 0x18a   : > { %v3857_v10 = vpop.f32.mrf.mxu0 }
 0x18b   : > { %v1553_v6 = vadd.f32 %v1462_v55, %v4989_v11 }
 0x18c   : > { %v1464_v23 = vpop.f32.mrf.mxu0 }
 0x18d   : > { %v1465_v19 = vadd.f32 %v1464_v23, %v4970_v50 }
 0x18e   : > { %v3888_v44 = vpop.f32.mrf.mxu0 }
 0x18f   : > { %v1554_v26 = vadd.f32 %v1465_v19, %v5001_v21  ;;  %v1746_v61 = vadd.f32 %v3888_v44, %v4974_v56 }
 0x190   : > { %v1737_v29 = vpop.f32.mrf.mxu0 }
 0x191   : > { %v1865_v18 = vadd.f32 %v1746_v61, %v5020_v14 }
 0x192   : > { %v3889_v43 = vpop.f32.mrf.mxu0 }
 0x193   : > { %v1749_v2 = vadd.f32 %v3889_v43, %v4985_v57 }
 0x194   : > { %v1740_v28 = vpop.f32.mrf.mxu0 }
 0x195   : > { %v5091_v11 = vadd.f32 %v1749_v2, %v1542_v20  ;;  %v1741_v35 = vadd.f32 %v1740_v28, %v4992_v60 }
 0x196   : > { %v3892_v50 = vpop.f32.mrf.mxu0 }
 0x197   : > { %v1864_v27 = vadd.f32 %v1741_v35, %v894_v48  ;;  %v1762_v21 = vadd.f32 %v3892_v50, %v4994_v36 }
 0x198   : > { %v1753_v8 = vpop.f32.mrf.mxu0 }
 0x199   : > { %v5095_v56 = vadd.f32 %v1762_v21, %v1545_v53  ;;  %v1754_v14 = vadd.f32 %v1753_v8, %v4999_v46 }
 0x19a   : > { %v3893_v39 = vpop.f32.mrf.mxu0 }
 0x19b   : > { %v5099_v57 = vadd.f32 %v1754_v14, %v5015_v51  ;;  %v1765_v24 = vadd.f32 %v3893_v39, %v5003_v34 }
 0x19c   : > { %v1756_v58 = vpop.f32.mrf.mxu0 }
 0x19d   : > { %v5102_v37 = vadd.f32 %v1765_v24, %v1546_v32  ;;  %v1757_v60 = vadd.f32 %v1756_v58, %v5008_v3 }
 0x19e   : > { %v3896_v20 = vpop.f32.mrf.mxu0 }
 0x19f   : > { %v1868_v47 = vadd.f32 %v1757_v60, %v5026_v17  ;;  %v1778_v36 = vadd.f32 %v3896_v20, %v5011_v45  ;;  %v1968_v17 = vpop.f32.mrf.mxu1 }
 0x1a0   : > { %v1769_v53 = vpop.f32.mrf.mxu0 }
 0x1a1   : > { %v5107_v16 = vadd.f32 %v1778_v36, %v1549_v22  ;;  %v1770_v46 = vadd.f32 %v1769_v53, %v5018_v33 }
 0x1a2   : > { %v3897_v51 = vpop.f32.mrf.mxu0 }
 0x1a3   : > { %v5111_v9 = vadd.f32 %v1770_v46, %v5035_v12  ;;  %v1781_v34 = vadd.f32 %v3897_v51, %v5023_v5  ;;  %v3917_v12 = vpop.f32.mrf.mxu1 }
 0x1a4   : > { %v1772_v32 = vpop.f32.mrf.mxu0 }
 0x1a5   : > { %v5114_v41 = vadd.f32 %v1781_v34, %v1550_v4  ;;  %v1773_v3 = vadd.f32 %v1772_v32, %v5029_v13 }
 0x1a6   : > { %v3900_v40 = vpop.f32.mrf.mxu0 }
 0x1a7   : > { %v1872_v45 = vadd.f32 %v1773_v3, %v5045_v1  ;;  %v1794_v22 = vadd.f32 %v3900_v40, %v5033_v15  ;;  %v1971_v1 = vpop.f32.mrf.mxu1 }
 0x1a8   : > { %v1785_v62 = vpop.f32.mrf.mxu0 }
 0x1a9   : > { %v5119_v33 = vadd.f32 %v1794_v22, %v1553_v6  ;;  %v1786_v54 = vadd.f32 %v1785_v62, %v5038_v63  ;;  %v3920_v63 = vpop.f32.mrf.mxu1 }
 0x1aa   : > { %v3901_v30 = vpop.f32.mrf.mxu0 }
 0x1ab   : > { %v5123_v5 = vadd.f32 %v1786_v54, %v5054_v7  ;;  %v1797_v4 = vadd.f32 %v3901_v30, %v5042_v25 }
 0x1ac   : > { %v1788_v55 = vpop.f32.mrf.mxu0 }
 0x1ad   : > { %v5126_v13 = vadd.f32 %v1797_v4, %v1554_v26  ;;  %v1789_v10 = vadd.f32 %v1788_v55, %v5048_v49  ;;  %v1984_v26 = vpop.f32.mrf.mxu1 }
 0x1ae   : > { %v3932_v23 = vpop.f32.mrf.mxu0 }
 0x1af   : > { %v5130_v15 = vadd.f32 %v1789_v10, %v5062_v31  ;;  %v2070_v6 = vadd.f32 %v3932_v23, %v5052_v38  ;;  %v3921_v38 = vpop.f32.mrf.mxu1  ;;  %v2218_v35 = vsub.f32 0.0, %v5126_v13  ;;  %v2219_v23 = vsub.f32 0.0, %v5080_v0 }
 0x1b0   : > { %v2061_v19 = vpop.f32.mrf.mxu0 }
 0x1b1   : > { %v5133_v44 = vadd.f32 %v2070_v6, %v1864_v27  ;;  %v1987_v58 = vpop.f32.mrf.mxu1  ;;  %v2234_v60 = vmin.f32 %v2218_v35, 80.0 }
 0x1b2   : > { %v3933_v7 = vpop.f32.mrf.mxu0 }
 0x1b3   : > { %v2204_v61 = vsub.f32 0.0, %v5133_v44  ;;  %v2073_v25 = vadd.f32 %v3933_v7, %v5059_v52 }
 0x1b4   : > { %v2064_v29 = vpop.f32.mrf.mxu0 }
 0x1b5   : > { %v2220_v43 = vmin.f32 %v2204_v61, 80.0  ;;  %v5137_v49 = vadd.f32 %v2073_v25, %v1865_v18 }
 0x1b6   : > { %v3936_v2 = vpop.f32.mrf.mxu0 }
 0x1b7   : > { %v2236_v28 = vmul.f32 1.442695, %v2220_v43  ;;  %v2205_v31 = vsub.f32 0.0, %v5137_v49  ;;  %v2086_v48 = vadd.f32 %v3936_v2, %v3916_v59 }
 0x1b8   : > { %v2077_v50 = vpop.f32.mrf.mxu0 }
 0x1b9   : > { %4084 = vpow2.f32 %v2236_v28  ;;  %v2221_v27 = vmin.f32 %v2205_v31, 80.0  ;;  %v5141_v21 = vadd.f32 %v2086_v48, %v1868_v47  ;;  %v2078_v8 = vadd.f32 %v2077_v50, %v1968_v17 }
 0x1ba   : > { %v3937_v52 = vpop.f32.mrf.mxu0  ;;  %v2264_v17 = vmul.f32 1.442695, %v2234_v60 }
 0x1bb   : > { %v2238_v14 = vmul.f32 1.442695, %v2221_v27  ;;  %v2208_v39 = vsub.f32 0.0, %v5141_v21  ;;  %v5145_v18 = vadd.f32 %v2078_v8, %v5091_v11  ;;  %v2089_v24 = vadd.f32 %v3937_v52, %v3917_v12  ;;  %v3924_v11 = vpop.f32.mrf.mxu1 }
 0x1bc   : > { %v2080_v20 = vpop.f32.mrf.mxu0 }
 0x1bd   : > { %4086 = vpow2.f32 %v2238_v14  ;;  %v2224_v36 = vmin.f32 %v2208_v39, 80.0  ;;  %v2206_v53 = vsub.f32 0.0, %v5145_v18  ;;  %v5149_v46 = vadd.f32 %v2089_v24, %v5095_v56 }
 0x1be   : > { %v2081_v47 = vadd.f32 %v2080_v20, %v1971_v1  ;;  %v3940_v59 = vpop.f32.mrf.mxu0  ;;  %v2000_v1 = vpop.f32.mrf.mxu1 }
 0x1bf   : > { %v2244_v51 = vmul.f32 1.442695, %v2224_v36  ;;  %v2222_v34 = vmin.f32 %v2206_v53, 80.0  ;;  %v2209_v32 = vsub.f32 0.0, %v5149_v46  ;;  %v2102_v3 = vadd.f32 %v3940_v59, %v3920_v63 }
 0x1c0   : > { %v5153_v40 = vadd.f32 %v2081_v47, %v5099_v57  ;;  %v2093_v22 = vpop.f32.mrf.mxu0  ;;  %v3925_v48 = vpop.f32.mrf.mxu1 }
 0x1c1   : > { %4088 = vpow2.f32 %v2244_v51  ;;  %v2240_v62 = vmul.f32 1.442695, %v2222_v34  ;;  %v2225_v54 = vmin.f32 %v2209_v32, 80.0  ;;  %v5155_v12 = vadd.f32 %v2102_v3, %v1872_v45 }
 0x1c2   : > { %v2207_v56 = vsub.f32 0.0, %v5153_v40  ;;  %v2094_v30 = vadd.f32 %v2093_v22, %v1984_v26  ;;  %v3941_v4 = vpop.f32.mrf.mxu0  ;;  %v2003_v53 = vpop.f32.mrf.mxu1 }
 0x1c3   : > { %4090 = vpow2.f32 %v2240_v62  ;;  %v2246_v55 = vmul.f32 1.442695, %v2225_v54  ;;  %v2212_v10 = vsub.f32 0.0, %v5155_v12  ;;  %v2105_v63 = vadd.f32 %v3941_v4, %v3921_v38 }
 0x1c4   : > { %v2223_v6 = vmin.f32 %v2207_v56, 80.0  ;;  %v5161_v57 = vadd.f32 %v2094_v30, %v5102_v37  ;;  %v2096_v19 = vpop.f32.mrf.mxu0  ;;  %4092 = vpow2.f32 %v2264_v17  ;;  %v2235_v38 = vmin.f32 %v2219_v23, 80.0  ;;  %v2365_v23 = vpop.permute.xlu0 %2364 }
 0x1c5   : > { %v2228_v45 = vmin.f32 %v2212_v10, 80.0  ;;  %v2097_v7 = vadd.f32 %v2096_v19, %v1987_v58  ;;  %4094 = vpow2.f32 %v2246_v55  ;;  %v5165_v29 = vadd.f32 %v2105_v63, %v5107_v16  ;;  %v5191_v19 = vpop.permute.xlu1 %2368 }
 0x1c6   : > { %v4085_v61 = vpop.eup %4084  ;;  %v2242_v25 = vmul.f32 1.442695, %v2223_v6  ;;  %v2210_v26 = vsub.f32 0.0, %v5161_v57  ;;  %v3944_v43 = vpop.f32.mrf.mxu0  ;;  %v2266_v47 = vmul.f32 1.442695, %v2235_v38 }
 0x1c7   : > { %v5167_v2 = vadd.f32 1.0, %v4085_v61  ;;  %v2252_v28 = vmul.f32 1.442695, %v2228_v45  ;;  %v5170_v37 = vadd.f32 %v2097_v7, %v5111_v9  ;;  %v2118_v31 = vadd.f32 %v3944_v43, %v3924_v11 }
 0x1c8   : > { %4096 = vpow2.f32 %v2242_v25  ;;  %v2226_v35 = vmin.f32 %v2210_v26, 80.0  ;;  %v2213_v50 = vsub.f32 0.0, %v5165_v29  ;;  %v2109_v27 = vpop.f32.mrf.mxu0  ;;  %v2367_v38 = vpop.permute.xlu0 %2366 }
 0x1c9   : > { %4098 = vrcp.f32 %v5167_v2  ;;  %v2211_v16 = vsub.f32 0.0, %v5170_v37  ;;  %v5176_v8 = vadd.f32 %v2118_v31, %v5130_v15  ;;  %v2110_v52 = vadd.f32 %v2109_v27, %v2000_v1 }
 0x1ca   : > { %v4087_v14 = vpop.eup %4086  ;;  %4100 = vpow2.f32 %v2252_v28  ;;  %v2248_v9 = vmul.f32 1.442695, %v2226_v35  ;;  %v2229_v39 = vmin.f32 %v2213_v50, 80.0  ;;  %v3945_v24 = vpop.f32.mrf.mxu0 }
 0x1cb   : > { %v2269_v58 = vadd.f32 1.0, %v4087_v14  ;;  %v2227_v60 = vmin.f32 %v2211_v16, 80.0  ;;  %v2216_v20 = vsub.f32 0.0, %v5176_v8  ;;  %v5180_v36 = vadd.f32 %v2110_v52, %v5114_v41  ;;  %v5194_v16 = vpop.permute.xlu1 %2370 }
 0x1cc   : > { %4102 = vpow2.f32 %v2248_v9  ;;  %v2254_v59 = vmul.f32 1.442695, %v2229_v39  ;;  %v2121_v51 = vadd.f32 %v3945_v24, %v3925_v48  ;;  %v2112_v15 = vpop.f32.mrf.mxu0 }
 0x1cd   : > { %4104 = vrcp.f32 %v2269_v58  ;;  %v2250_v34 = vmul.f32 1.442695, %v2227_v60  ;;  %v2232_v32 = vmin.f32 %v2216_v20, 80.0  ;;  %v2214_v3 = vsub.f32 0.0, %v5180_v36 }
 0x1ce   : > { %v4089_v11 = vpop.eup %4088  ;;  %4106 = vpow2.f32 %v2254_v59  ;;  %v5184_v17 = vadd.f32 %v2121_v51, %v5119_v33  ;;  %v2113_v22 = vadd.f32 %v2112_v15, %v2003_v53  ;;  %v2373_v59 = vpop.permute.xlu0 %2372 }
 0x1cf   : > { %v2272_v62 = vadd.f32 1.0, %v4089_v11  ;;  %4108 = vpow2.f32 %v2250_v34  ;;  %v2260_v41 = vmul.f32 1.442695, %v2232_v32  ;;  %v2230_v54 = vmin.f32 %v2214_v3, 80.0  ;;  %v2375_v11 = vpop.permute.xlu1 %2374 }
 0x1d0   : > { %v4091_v56 = vpop.eup %4090  ;;  %4110 = vpow2.f32 %v2266_v47  ;;  %v2217_v30 = vsub.f32 0.0, %v5184_v17  ;;  %v5188_v4 = vadd.f32 %v2113_v22, %v5123_v5 }
 0x1d1   : > { %4112 = vrcp.f32 %v2272_v62  ;;  %v2270_v55 = vadd.f32 1.0, %v4091_v56  ;;  %v2256_v10 = vmul.f32 1.442695, %v2230_v54  ;;  %v4093_v1 = vpop.eup %4092 }
 0x1d2   : > { %4114 = vpow2.f32 %v2260_v41  ;;  %v2233_v33 = vmin.f32 %v2217_v30, 80.0  ;;  %v2215_v6 = vsub.f32 0.0, %v5188_v4  ;;  %v4095_v63 = vpop.eup %4094  ;;  %v5198_v15 = vadd.f32 1.0, %v4093_v1 }
 0x1d3   : > { %4116 = vrcp.f32 %v2270_v55  ;;  %v2273_v45 = vadd.f32 1.0, %v4095_v63 }
 0x1d4   : > { %4118 = vpow2.f32 %v2256_v10  ;;  %v2262_v7 = vmul.f32 1.442695, %v2233_v33  ;;  %v2231_v61 = vmin.f32 %v2215_v6, 80.0 }
 0x1d5   : > { %v4097_v25 = vpop.eup %4096  ;;  %4120 = vrcp.f32 %v2273_v45 }
 0x1d6   : > { %v4099_v5 = vpop.eup %4098  ;;  %v2271_v26 = vadd.f32 1.0, %v4097_v25  ;;  %v2258_v43 = vmul.f32 1.442695, %v2231_v61  ;;  %4122 = vpow2.f32 %v2262_v7  ;;  %v2377_v7 = vpop.permute.xlu0 %2376 }
 0x1d7   : > { %v4101_v28 = vpop.eup %4100  ;;  %v2300_v31 = vmul.f32 %v4099_v5, %v5167_v2 }
 0x1d8   : > { %4124 = vrcp.f32 %v2271_v26  ;;  %v2276_v48 = vadd.f32 1.0, %v4101_v28 }
 0x1d9   : > { %v4103_v35 = vpop.eup %4102  ;;  %v2316_v50 = vsub.f32 2.0, %v2300_v31  ;;  %4126 = vpow2.f32 %v2258_v43  ;;  %v2379_v43 = vpop.permute.xlu1 %2378 }
 0x1da   : > { %v4105_v27 = vpop.eup %4104  ;;  %4128 = vrcp.f32 %v2276_v48  ;;  %v2274_v52 = vadd.f32 1.0, %v4103_v35 }
 0x1db   : > { %v4107_v14 = vpop.eup %4106  ;;  %v2301_v9 = vmul.f32 %v4105_v27, %v2269_v58  ;;  %v5196_v20 = vmul.f32 %v4099_v5, %v2316_v50 }
 0x1dc   : > { %v4109_v39 = vpop.eup %4108  ;;  %4130 = vrcp.f32 %v2274_v52  ;;  %v2277_v24 = vadd.f32 1.0, %v4107_v14 }
 0x1dd   : > { %v4111_v60 = vpop.eup %4110  ;;  %v2317_v2 = vsub.f32 2.0, %v2301_v9  ;;  %v2275_v53 = vadd.f32 1.0, %v4109_v39  ;;  %v2412_v56 = vmul.f32 %v2365_v23, %v5196_v20 }
 0x1de   : > { %v4113_v47 = vpop.eup %4112  ;;  %4132 = vrcp.f32 %v2277_v24  ;;  %v5202_v58 = vadd.f32 1.0, %v4111_v60 }
 0x1df   : > { %v4115_v51 = vpop.eup %4114  ;;  %v5200_v34 = vmul.f32 %v4105_v27, %v2317_v2  ;;  %v2304_v32 = vmul.f32 %v4113_v47, %v2272_v62  ;;  %4134 = vrcp.f32 %v2275_v53 }
 0x1e0   : > { %v4117_v3 = vpop.eup %4116  ;;  %v2280_v22 = vadd.f32 1.0, %v4115_v51 }
 0x1e1   : > { %v4119_v41 = vpop.eup %4118  ;;  %v2302_v54 = vmul.f32 %v4117_v3, %v2270_v55  ;;  %v2413_v30 = vmul.f32 %v2367_v38, %v5200_v34  ;;  %v2320_v10 = vsub.f32 2.0, %v2304_v32 }
 0x1e2   : > { %4136 = vrcp.f32 %v2280_v22  ;;  %v2278_v33 = vadd.f32 1.0, %v4119_v41  ;;  %v4121_v1 = vpop.eup %4120 }
 0x1e3   : > { %4138 = vrcp.f32 %v5198_v15  ;;  %v2428_v6 = vpack.c.bf16 %v2413_v30, %v2412_v56  ;;  %v4123_v62 = vpop.eup %4122  ;;  %v2305_v63 = vmul.f32 %v4121_v1, %v2273_v45  ;;  %v2318_v25 = vsub.f32 2.0, %v2302_v54  ;;  %v2383_v54 = vpop.permute.xlu1 %2382 }
 0x1e4   : > { %4140 = vrcp.f32 %v2278_v33  ;;  %v5208_v55 = vmul.f32 %v4113_v47, %v2320_v10  ;;  %v2281_v23 = vadd.f32 1.0, %v4123_v62  ;;  %v2381_v47 = vpop.permute.xlu0 %2380 }
 0x1e5   : > { %v4125_v61 = vpop.eup %4124  ;;  %4142 = vrcp.f32 %v5202_v58  ;;  %2448 = vrot.lane.b32.xlu0 %v2428_v6, %s4298_s13  ;;  %v2321_v28 = vsub.f32 2.0, %v2305_v63  ;;  %v5214_v39 = vmul.f32 %v4117_v3, %v2318_v25 }
 0x1e6   : > { %v4127_v5 = vpop.eup %4126  ;;  %v2303_v31 = vmul.f32 %v4125_v61, %v2271_v26  ;;  %4144 = vrcp.f32 %v2281_v23  ;;  %v2416_v9 = vmul.f32 %v2373_v59, %v5208_v55 }
 0x1e7   : > { %v4129_v38 = vpop.eup %4128  ;;  %v2279_v35 = vadd.f32 1.0, %v4127_v5  ;;  %v5211_v50 = vmul.f32 %v4121_v1, %v2321_v28  ;;  %v2414_v59 = vmul.f32 %v5191_v19, %v5214_v39  ;;  %v2387_v28 = vpop.permute.xlu1 %2386 }
 0x1e8   : > { %v2319_v45 = vsub.f32 2.0, %v2303_v31  ;;  %v2308_v27 = vmul.f32 %v4129_v38, %v2276_v48 }
 0x1e9   : > { %v4131_v14 = vpop.eup %4130  ;;  %4146 = vrcp.f32 %v2279_v35  ;;  %v2417_v60 = vmul.f32 %v2375_v11, %v5211_v50 }
 0x1ea   : > { %v2306_v2 = vmul.f32 %v4131_v14, %v2274_v52  ;;  %v2324_v51 = vsub.f32 2.0, %v2308_v27  ;;  %v5217_v32 = vmul.f32 %v4125_v61, %v2319_v45 }
 0x1eb   : > { %v4133_v26 = vpop.eup %4132  ;;  %v2430_v30 = vpack.c.bf16 %v2417_v60, %v2416_v9 }
 0x1ec   : > { %v4135_v41 = vpop.eup %4134  ;;  %v2309_v56 = vmul.f32 %v4133_v26, %v2277_v24  ;;  %v2322_v10 = vsub.f32 2.0, %v2306_v2  ;;  %v2415_v3 = vmul.f32 %v5194_v16, %v5217_v32  ;;  %v5223_v11 = vmul.f32 %v4129_v38, %v2324_v51 }
 0x1ed   : > { %v2307_v48 = vmul.f32 %v4135_v41, %v2275_v53  ;;  %2452 = vrot.lane.b32.xlu0 %v2430_v30, %s4298_s13  ;;  %v2385_v53 = vpop.permute.xlu0 %2384 }
 0x1ee   : > { %v2325_v1 = vsub.f32 2.0, %v2309_v56  ;;  %v5226_v62 = vmul.f32 %v4131_v14, %v2322_v10  ;;  %v2429_v63 = vpack.c.bf16 %v2415_v3, %v2414_v59  ;;  %v2420_v31 = vmul.f32 %v2381_v47, %v5223_v11 }
 0x1ef   : > { %v4137_v52 = vpop.eup %4136  ;;  %v2323_v6 = vsub.f32 2.0, %v2307_v48 }
 0x1f0   : > { %v4139_v24 = vpop.eup %4138  ;;  %v5228_v61 = vmul.f32 %v4133_v26, %v2325_v1  ;;  %v2312_v25 = vmul.f32 %v4137_v52, %v2280_v22  ;;  %2450 = vrot.lane.b32.xlu1 %v2429_v63, %s4298_s13  ;;  %v2418_v27 = vmul.f32 %v2377_v7, %v5226_v62 }
 0x1f1   : > { %v4141_v5 = vpop.eup %4140  ;;  %v5230_v19 = vmul.f32 %v4135_v41, %v2323_v6  ;;  %v2314_v60 = vmul.f32 %v4139_v24, %v5198_v15  ;;  %v2389_v10 = vpop.permute.xlu0 %2388 }
 0x1f2   : > { %v4143_v16 = vpop.eup %4142  ;;  %v2421_v38 = vmul.f32 %v2383_v54, %v5228_v61  ;;  %v2310_v45 = vmul.f32 %v4141_v5, %v2278_v33  ;;  %v2328_v9 = vsub.f32 2.0, %v2312_v25 }
 0x1f3   : > { %v2419_v14 = vmul.f32 %v2379_v43, %v5230_v19  ;;  %v4145_v22 = vpop.eup %4144  ;;  %v2315_v51 = vmul.f32 %v4143_v16, %v5202_v58  ;;  %v2330_v7 = vsub.f32 2.0, %v2314_v60  ;;  %v2391_v43 = vpop.permute.xlu1 %2390 }
 0x1f4   : > { %v2432_v2 = vpack.c.bf16 %v2421_v38, %v2420_v31  ;;  %v2313_v41 = vmul.f32 %v4145_v22, %v2281_v23  ;;  %v2326_v56 = vsub.f32 2.0, %v2310_v45  ;;  %v5240_v54 = vmul.f32 %v4137_v52, %v2328_v9 }
 0x1f5   : > { %v2431_v26 = vpack.c.bf16 %v2419_v14, %v2418_v27  ;;  %v2331_v15 = vsub.f32 2.0, %v2315_v51  ;;  %v5251_v6 = vmul.f32 %v4139_v24, %v2330_v7 }
 0x1f6   : > { %v4147_v30 = vpop.eup %4146  ;;  %2456 = vrot.lane.b32.xlu0 %v2432_v2, %s4298_s13  ;;  %v2329_v47 = vsub.f32 2.0, %v2313_v41  ;;  %5747 = vst [vmem:[#allocation7_spill] sm:$0xff] %v5240_v54  ;;  %v5243_v59 = vmul.f32 %v4141_v5, %v2326_v56  ;;  %v2424_v3 = vmul.f32 %v2389_v10, %v5240_v54 }
 0x1f7   : > { %v2311_v33 = vmul.f32 %v4147_v30, %v2279_v35  ;;  %2454 = vrot.lane.b32.xlu1 %v2431_v26, %s4298_s13  ;;  %5749 = vst [vmem:[#allocation9_spill] sm:$0xff] %v5251_v6  ;;  %v2393_v35 = vpop.permute.xlu0 %2392  ;;  %v5253_v52 = vmul.f32 %v4143_v16, %v2331_v15  ;;  %v2395_v5 = vpop.permute.xlu1 %2394  ;;  %v4299_v16 = vmov 0.0  }
 0x1f8   : > { %v5245_v58 = vmul.f32 %v4145_v22, %v2329_v47  ;;  %v2422_v63 = vmul.f32 %v2385_v53, %v5243_v59  ;;  %v2426_v45 = vmul.f32 %v2393_v35, %v5251_v6 }
 0x1f9   : > { %v2327_v48 = vsub.f32 2.0, %v2311_v33  ;;  %5750 = vst [vmem:[#allocation10_spill] sm:$0xff] %v5253_v52  ;;  %v2427_v27 = vmul.f32 %v2395_v5, %v5253_v52 }
 0x1fa   : > { %5748 = vst [vmem:[#allocation8_spill] sm:$0xff] %v5245_v58  ;;  %v2425_v1 = vmul.f32 %v2391_v43, %v5245_v58 }
 0x1fb   : > { %v5247_v23 = vmul.f32 %v4147_v30, %v2327_v48  ;;  %v2435_v24 = vpack.c.bf16 %v2427_v27, %v2426_v45 }
 0x1fc   : > { %v2434_v31 = vpack.c.bf16 %v2425_v1, %v2424_v3 }
 0x1fd   : > { %v2423_v25 = vmul.f32 %v2387_v28, %v5247_v23 }
 0x1fe   : > { %2460 = vrot.lane.b32.xlu0 %v2434_v31, %s4298_s13 }
 0x1ff   : > { %v2433_v38 = vpack.c.bf16 %v2423_v25, %v2422_v63 }
 0x201   : > { %2458 = vrot.lane.b32.xlu1 %v2433_v38, %s4298_s13 }
 0x202   : > { %4026 = vrot.lane.b32.xlu0 %v4299_v16, %s4300_s17 }
 0x205   : > { %2462 = vrot.lane.b32.xlu1 %v2435_v24, %s4298_s13 }
 0x209   : > { %4031 = vrot.lane.b32.xlu1 %v4299_v16, %s4300_s17 }
 0x257   : > { %v2449_v53 = vpop.permute.xlu0 %2448 }
 0x258   : > { %3599 = vmatmul.mubr.msk.bf16.vlgmr.msra.gmra.mxu1 %vm765_vm1, %v2449_v53 }
 0x259   : > { %2550 = vmatprep.mubr.bf16.mxu1 %v4297_v42 }
 0x25f   : > { %v2453_v14 = vpop.permute.xlu0 %2452 }
 0x262   : > { %v2451_v28 = vpop.permute.xlu1 %2450 }
 0x263   : > { %3600 = vmatmul.mubr.msk.bf16.gmra.mxu1 %vm765_vm1, %v2451_v28 }
 0x264   : > { %2560 = vmatprep.mubr.bf16.mxu1 %v4297_v42 }
 0x268   : > { %v2457_v60 = vpop.permute.xlu0 %2456 }
 0x269   : > { %v2455_v9 = vpop.permute.xlu1 %2454 }
 0x26b   : > { %3601 = vmatmul.mubr.msk.bf16.gmra.mxu1 %vm765_vm1, %v2453_v14 }
 0x26c   : > { %2570 = vmatprep.mubr.bf16.mxu1 %v4297_v42 }
 0x270   : > { %v2461_v2 = vpop.permute.xlu0 %2460 }
 0x273   : > { %3602 = vmatmul.mubr.msk.bf16.gmra.mxu1 %vm765_vm1, %v2455_v9  ;;  %v2459_v22 = vpop.permute.xlu1 %2458 }
 0x274   : > { %2580 = vmatprep.mubr.bf16.mxu1 %v4297_v42 }
 0x277   : > { %v2463_v51 = vpop.permute.xlu1 %2462 }
 0x27b   : > { %3603 = vmatmul.mubr.msk.bf16.gmra.mxu1 %vm765_vm1, %v2457_v60 }
 0x27c   : > { %2590 = vmatprep.mubr.bf16.mxu1 %v4297_v42 }
 0x283   : > { %3604 = vmatmul.mubr.msk.bf16.gmra.mxu1 %vm765_vm1, %v2459_v22 }
 0x284   : > { %2600 = vmatprep.mubr.bf16.mxu1 %v4297_v42 }
 0x28b   : > { %3605 = vmatmul.mubr.msk.bf16.gmra.mxu1 %vm765_vm1, %v2461_v2 }
 0x28c   : > { %2610 = vmatprep.mubr.bf16.mxu1 %v4297_v42 }
 0x293   : > { %3606 = vmatmul.mubr.msk.bf16.gmra.mxu1 %vm765_vm1, %v2463_v51 }
 0x318   : > { %v5281_v26 = vpop.f32.mrf.mxu1 }
 0x319   : > { %2749 = vrot.lane.b32.xlu0 %v5281_v26, %s4298_s13  ;;  %2673 = vrot.lane.b32.xlu1 %v5281_v26, %s4300_s17 }
 0x31a   : > { %v2544_v41 = vpop.f32.mrf.mxu1 }
 0x31b   : > { %v5411_v41 = vpop.permute.xlu1 %4031 }
 0x31c   : > { %v5287_v56 = vpop.f32.mrf.mxu1 }
 0x31d   : > { %2751 = vrot.lane.b32.xlu1 %v5287_v56, %s4298_s13  ;;  %2675 = vrot.lane.b32.xlu0 %v5287_v56, %s4300_s17 }
 0x31e   : > { %v2548_v42 = vpop.f32.mrf.mxu1 }
 0x31f   : > { %v5413_v42 = vpop.permute.xlu0 %4026 }
 0x321   : > { %2895 = vrot.lane.b32.xlu1 %v5287_v56, %s4296_s29 }
 0x323   : > { %v5295_v30 = vpop.f32.mrf.mxu1 }
 0x324   : > { %2753 = vrot.lane.b32.xlu0 %v5295_v30, %s4298_s13 }
 0x325   : > { %2677 = vrot.lane.b32.xlu1 %v5295_v30, %s4300_s17  ;;  %v2554_v10 = vpop.f32.mrf.mxu1 }
 0x327   : > { %v5301_v47 = vpop.f32.mrf.mxu1 }
 0x328   : > { %2897 = vrot.lane.b32.xlu0 %v5295_v30, %s4296_s29 }
 0x329   : > { %2755 = vrot.lane.b32.xlu1 %v5301_v47, %s4298_s13  ;;  %v2558_v33 = vpop.f32.mrf.mxu1 }
 0x32b   : > { %v5307_v7 = vpop.f32.mrf.mxu1 }
 0x32c   : > { %3069 = vrot.lane.b32.xlu0 %v2554_v10, %s4300_s17 }
 0x32d   : > { %2899 = vrot.lane.b32.xlu1 %v5301_v47, %s4296_s29  ;;  %v2564_v43 = vpop.f32.mrf.mxu1 }
 0x32f   : > { %v5315_v15 = vpop.f32.mrf.mxu1 }
 0x330   : > { %2679 = vrot.lane.b32.xlu0 %v5301_v47, %s4300_s17 }
 0x331   : > { %3071 = vrot.lane.b32.xlu1 %v2558_v33, %s4300_s17  ;;  %v2568_v48 = vpop.f32.mrf.mxu1 }
 0x333   : > { %v5325_v3 = vpop.f32.mrf.mxu1 }
 0x334   : > { %2757 = vrot.lane.b32.xlu0 %v5307_v7, %s4298_s13 }
 0x335   : > { %2681 = vrot.lane.b32.xlu1 %v5307_v7, %s4300_s17  ;;  %v2574_v1 = vpop.f32.mrf.mxu1 }
 0x337   : > { %v5333_v35 = vpop.f32.mrf.mxu1 }
 0x338   : > { %2901 = vrot.lane.b32.xlu0 %v5307_v7, %s4296_s29 }
 0x339   : > { %2759 = vrot.lane.b32.xlu1 %v5315_v15, %s4298_s13  ;;  %v2578_v63 = vpop.f32.mrf.mxu1 }
 0x33b   : > { %v5343_v25 = vpop.f32.mrf.mxu1 }
 0x33c   : > { %3073 = vrot.lane.b32.xlu0 %v2564_v43, %s4300_s17 }
 0x33d   : > { %2903 = vrot.lane.b32.xlu1 %v5315_v15, %s4296_s29  ;;  %v2584_v31 = vpop.f32.mrf.mxu1 }
 0x33f   : > { %v5351_v5 = vpop.f32.mrf.mxu1 }
 0x340   : > { %2683 = vrot.lane.b32.xlu0 %v5315_v15, %s4300_s17 }
 0x341   : > { %3075 = vrot.lane.b32.xlu1 %v2568_v48, %s4300_s17  ;;  %v2588_v38 = vpop.f32.mrf.mxu1 }
 0x343   : > { %v5361_v45 = vpop.f32.mrf.mxu1 }
 0x344   : > { %2761 = vrot.lane.b32.xlu0 %v5325_v3, %s4298_s13 }
 0x345   : > { %2685 = vrot.lane.b32.xlu1 %v5325_v3, %s4300_s17  ;;  %v2594_v27 = vpop.f32.mrf.mxu1 }
 0x347   : > { %v5369_v24 = vpop.f32.mrf.mxu1 }
 0x348   : > { %2905 = vrot.lane.b32.xlu0 %v5325_v3, %s4296_s29 }
 0x349   : > { %2763 = vrot.lane.b32.xlu1 %v5333_v35, %s4298_s13  ;;  %v2598_v53 = vpop.f32.mrf.mxu1 }
 0x34b   : > { %v5379_v28 = vpop.f32.mrf.mxu1 }
 0x34c   : > { %3077 = vrot.lane.b32.xlu0 %v2574_v1, %s4300_s17 }
 0x34d   : > { %2907 = vrot.lane.b32.xlu1 %v5333_v35, %s4296_s29  ;;  %v2604_v14 = vpop.f32.mrf.mxu1 }
 0x34f   : > { %v5387_v9 = vpop.f32.mrf.mxu1 }
 0x350   : > { %2687 = vrot.lane.b32.xlu0 %v5333_v35, %s4300_s17 }
 0x351   : > { %3079 = vrot.lane.b32.xlu1 %v2578_v63, %s4300_s17  ;;  %v2608_v60 = vpop.f32.mrf.mxu1  ;;  %v2625_v63 = vadd.f32 %v5307_v7, %v5141_v21  ;;  %v2626_v21 = vadd.f32 %v5315_v15, %v5149_v46 }
 0x353   : > { %v5397_v22 = vpop.f32.mrf.mxu1 }
 0x354   : > { %2765 = vrot.lane.b32.xlu0 %v5343_v25, %s4298_s13 }
 0x355   : > { %2689 = vrot.lane.b32.xlu1 %v5343_v25, %s4300_s17  ;;  %v2614_v2 = vpop.f32.mrf.mxu1 }
 0x357   : > { %v5405_v51 = vpop.f32.mrf.mxu1 }
 0x358   : > { %2909 = vrot.lane.b32.xlu0 %v5343_v25, %s4296_s29 }
 0x359   : > { %2767 = vrot.lane.b32.xlu1 %v5351_v5, %s4298_s13 }
 0x35c   : > { %3081 = vrot.lane.b32.xlu0 %v2584_v31, %s4300_s17 }
 0x35d   : > { %2911 = vrot.lane.b32.xlu1 %v5351_v5, %s4296_s29 }
 0x360   : > { %2691 = vrot.lane.b32.xlu0 %v5351_v5, %s4300_s17 }
 0x361   : > { %3083 = vrot.lane.b32.xlu1 %v2588_v38, %s4300_s17 }
 0x364   : > { %2769 = vrot.lane.b32.xlu0 %v5361_v45, %s4298_s13 }
 0x365   : > { %2693 = vrot.lane.b32.xlu1 %v5361_v45, %s4300_s17 }
 0x368   : > { %2913 = vrot.lane.b32.xlu0 %v5361_v45, %s4296_s29 }
 0x369   : > { %2771 = vrot.lane.b32.xlu1 %v5369_v24, %s4298_s13 }
 0x36c   : > { %3085 = vrot.lane.b32.xlu0 %v2594_v27, %s4300_s17 }
 0x36d   : > { %2915 = vrot.lane.b32.xlu1 %v5369_v24, %s4296_s29 }
 0x370   : > { %2695 = vrot.lane.b32.xlu0 %v5369_v24, %s4300_s17 }
 0x371   : > { %3087 = vrot.lane.b32.xlu1 %v2598_v53, %s4300_s17 }
 0x374   : > { %2773 = vrot.lane.b32.xlu0 %v5379_v28, %s4298_s13 }
 0x375   : > { %2697 = vrot.lane.b32.xlu1 %v5379_v28, %s4300_s17 }
 0x378   : > { %2917 = vrot.lane.b32.xlu0 %v5379_v28, %s4296_s29 }
 0x379   : > { %2775 = vrot.lane.b32.xlu1 %v5387_v9, %s4298_s13 }
 0x37c   : > { %3089 = vrot.lane.b32.xlu0 %v2604_v14, %s4300_s17 }
 0x37d   : > { %2919 = vrot.lane.b32.xlu1 %v5387_v9, %s4296_s29 }
 0x380   : > { %2699 = vrot.lane.b32.xlu0 %v5387_v9, %s4300_s17 }
 0x381   : > { %3091 = vrot.lane.b32.xlu1 %v2608_v60, %s4300_s17 }
 0x384   : > { %2777 = vrot.lane.b32.xlu0 %v5397_v22, %s4298_s13  ;;  %s4301_s13 = smov [#allocation4]  }
 0x385   : > { %2923 = vrot.lane.b32.xlu1 %v5405_v51, %s4296_s29 }
 0x388   : > { %2921 = vrot.lane.b32.xlu0 %v5397_v22, %s4296_s29  ;;  %s5589_s29 = scalar_lea.vmem [#allocation4], %s3425_s20  ;;  %s3615_s20 = sshll.u32 %s4282_s25, 5 }
 0x389   : > { %s3306_s18 = sadd.s32 %s4278_s24, %s3615_s20  ;;  %s3309_s19 = sshll.u32 %s5589_s29, 4  ;;  %s5672_s19 = int_to_ptr.vmem [resolvable:$true] %s3309_s19 }
 0x38a   : > { %s3610_s30 = sshll.u32 %s3306_s18, 7  ;;  %s4202_s10 = scalar_lea.vmem %s5672_s19, 2048 }
 0x38b   : > { %v5417_v10 = vpop.permute.xlu1 %2673  ;;  %v2750_v33 = vpop.permute.xlu0 %2749  ;;  %s5670_s9 = scalar_lea.hbm %s5735_s6, %s3610_s30  ;;  %p4203_p1 = scmp.ne.s32.totalorder %s5672_s19, %s4202_s10 }
 0x38c   : > { %3093 = vrot.lane.b32.xlu0 %v2614_v2, %s4300_s17 }
 0x38d   : > { %p4204_p2 = pnand %p4203_p1, %p4400_p8 }
 0x38f   : > { %v2752_v43 = vpop.permute.xlu1 %2751  ;;  %v5422_v48 = vpop.permute.xlu0 %2675  ;;  %p4205_p3 = pneg %p4204_p2 }
 0x390   : > { %2833 = vrot.lane.b32.xlu1 %v2752_v43, %s4300_s17  ;;  %2831 = vrot.lane.b32.xlu0 %v2750_v33, %s4300_s17 }
 0x393   : > { %v2896_v1 = vpop.permute.xlu1 %2895 }
 0x394   : > { %2973 = vrot.lane.b32.xlu1 %v2896_v1, %s4300_s17  ;;  %v2627_v1 = vadd.f32 %v5325_v3, %v5161_v57  ;;  %v2628_v57 = vadd.f32 %v5333_v35, %v5170_v37 }
 0x396   : > { %v2754_v31 = vpop.permute.xlu0 %2753 }
 0x397   : > { %v2678_v38 = vpop.permute.xlu1 %2677  ;;  %2835 = vrot.lane.b32.xlu0 %v2754_v31, %s4300_s17 }
 0x398   : > { %v5428_v27 = vadd.f32 %v2678_v38, %v2625_v63 }
 0x39a   : > { %v2898_v53 = vpop.permute.xlu0 %2897 }
 0x39b   : > { %v2756_v14 = vpop.permute.xlu1 %2755  ;;  %2975 = vrot.lane.b32.xlu0 %v2898_v53, %s4300_s17 }
 0x39c   : > { %2837 = vrot.lane.b32.xlu1 %v2756_v14, %s4300_s17 }
 0x39e   : > { %v5432_v60 = vpop.permute.xlu0 %3069 }
 0x39f   : > { %v2900_v2 = vpop.permute.xlu1 %2899 }
 0x3a0   : > { %2977 = vrot.lane.b32.xlu1 %v2900_v2, %s4300_s17 }
 0x3a2   : > { %v2680_v7 = vpop.permute.xlu0 %2679 }
 0x3a3   : > { %v5437_v33 = vpop.permute.xlu1 %3071  ;;  %v5439_v43 = vadd.f32 %v2680_v7, %v2626_v21  ;;  %v2629_v7 = vadd.f32 %v5343_v25, %v5155_v12  ;;  %v2630_v12 = vadd.f32 %v5351_v5, %v5165_v29 }
 0x3a6   : > { %v2758_v63 = vpop.permute.xlu0 %2757 }
 0x3a7   : > { %v2682_v31 = vpop.permute.xlu1 %2681  ;;  %2839 = vrot.lane.b32.xlu0 %v2758_v63, %s4300_s17 }
 0x3a8   : > { %v5444_v38 = vadd.f32 %v2682_v31, %v2627_v1 }
 0x3aa   : > { %v2902_v53 = vpop.permute.xlu0 %2901 }
 0x3ab   : > { %v2760_v14 = vpop.permute.xlu1 %2759  ;;  %2979 = vrot.lane.b32.xlu0 %v2902_v53, %s4300_s17 }
 0x3ac   : > { %2841 = vrot.lane.b32.xlu1 %v2760_v14, %s4300_s17 }
 0x3ae   : > { %v5448_v46 = vpop.permute.xlu0 %3073 }
 0x3af   : > { %v2904_v15 = vpop.permute.xlu1 %2903 }
 0x3b0   : > { %2981 = vrot.lane.b32.xlu1 %v2904_v15, %s4300_s17 }
 0x3b2   : > { %v2684_v3 = vpop.permute.xlu0 %2683 }
 0x3b3   : > { %v5453_v2 = vpop.permute.xlu1 %3075  ;;  %v5455_v21 = vadd.f32 %v2684_v3, %v2628_v57  ;;  %v2631_v3 = vadd.f32 %v5361_v45, %v5180_v36  ;;  %v2632_v36 = vadd.f32 %v5369_v24, %v5188_v4 }
 0x3b6   : > { %v2762_v1 = vpop.permute.xlu0 %2761 }
 0x3b7   : > { %v2686_v63 = vpop.permute.xlu1 %2685  ;;  %2843 = vrot.lane.b32.xlu0 %v2762_v1, %s4300_s17 }
 0x3b8   : > { %v5460_v31 = vadd.f32 %v2686_v63, %v2629_v7 }
 0x3ba   : > { %v2906_v53 = vpop.permute.xlu0 %2905 }
 0x3bb   : > { %v2764_v14 = vpop.permute.xlu1 %2763  ;;  %2983 = vrot.lane.b32.xlu0 %v2906_v53, %s4300_s17 }
 0x3bc   : > { %2845 = vrot.lane.b32.xlu1 %v2764_v14, %s4300_s17 }
 0x3be   : > { %v5464_v37 = vpop.permute.xlu0 %3077 }
 0x3bf   : > { %v2908_v35 = vpop.permute.xlu1 %2907 }
 0x3c0   : > { %2985 = vrot.lane.b32.xlu1 %v2908_v35, %s4300_s17 }
 0x3c2   : > { %v2688_v25 = vpop.permute.xlu0 %2687 }
 0x3c3   : > { %v5469_v15 = vpop.permute.xlu1 %3079  ;;  %v5471_v57 = vadd.f32 %v2688_v25, %v2630_v12  ;;  %v2633_v25 = vadd.f32 %v5379_v28, %v5176_v8  ;;  %v2634_v8 = vadd.f32 %v5387_v9, %v5184_v17 }
 0x3c6   : > { %v2766_v7 = vpop.permute.xlu0 %2765 }
 0x3c7   : > { %v2690_v1 = vpop.permute.xlu1 %2689  ;;  %2847 = vrot.lane.b32.xlu0 %v2766_v7, %s4300_s17 }
 0x3c8   : > { %v5476_v63 = vadd.f32 %v2690_v1, %v2631_v3 }
 0x3ca   : > { %v2910_v53 = vpop.permute.xlu0 %2909 }
 0x3cb   : > { %v2768_v14 = vpop.permute.xlu1 %2767  ;;  %2987 = vrot.lane.b32.xlu0 %v2910_v53, %s4300_s17 }
 0x3cc   : > { %2849 = vrot.lane.b32.xlu1 %v2768_v14, %s4300_s17 }
 0x3ce   : > { %v5480_v29 = vpop.permute.xlu0 %3081 }
 0x3cf   : > { %v2912_v5 = vpop.permute.xlu1 %2911 }
 0x3d0   : > { %2989 = vrot.lane.b32.xlu1 %v2912_v5, %s4300_s17 }
 0x3d2   : > { %v2692_v45 = vpop.permute.xlu0 %2691 }
 0x3d3   : > { %v5485_v35 = vpop.permute.xlu1 %3083  ;;  %v5487_v12 = vadd.f32 %v2692_v45, %v2632_v36  ;;  %v2635_v45 = vadd.f32 %v5397_v22, %v5126_v13  ;;  %v2636_v13 = vadd.f32 %v5405_v51, %v5080_v0  ;;  %v2621_v0 = vadd.f32 %v5281_v26, %v5133_v44 }
 0x3d6   : > { %v2770_v3 = vpop.permute.xlu0 %2769 }
 0x3d7   : > { %v2694_v7 = vpop.permute.xlu1 %2693  ;;  %2851 = vrot.lane.b32.xlu0 %v2770_v3, %s4300_s17 }
 0x3d8   : > { %v5492_v1 = vadd.f32 %v2694_v7, %v2633_v25 }
 0x3da   : > { %v2914_v53 = vpop.permute.xlu0 %2913 }
 0x3db   : > { %v2772_v14 = vpop.permute.xlu1 %2771  ;;  %2991 = vrot.lane.b32.xlu0 %v2914_v53, %s4300_s17 }
 0x3dc   : > { %2853 = vrot.lane.b32.xlu1 %v2772_v14, %s4300_s17 }
 0x3de   : > { %v5496_v4 = vpop.permute.xlu0 %3085 }
 0x3df   : > { %v2916_v24 = vpop.permute.xlu1 %2915 }
 0x3e0   : > { %2993 = vrot.lane.b32.xlu1 %v2916_v24, %s4300_s17 }
 0x3e2   : > { %v2696_v28 = vpop.permute.xlu0 %2695 }
 0x3e3   : > { %v5501_v5 = vpop.permute.xlu1 %3087  ;;  %v5503_v36 = vadd.f32 %v2696_v28, %v2634_v8 }
 0x3e6   : > { %v2774_v25 = vpop.permute.xlu0 %2773 }
 0x3e7   : > { %v2698_v3 = vpop.permute.xlu1 %2697  ;;  %2855 = vrot.lane.b32.xlu0 %v2774_v25, %s4300_s17  ;;  %v2618_v25 = vpop.f32.mrf.mxu1 }
 0x3e8   : > { %v5508_v7 = vadd.f32 %v2698_v3, %v2635_v45 }
 0x3ea   : > { %v2918_v53 = vpop.permute.xlu0 %2917 }
 0x3eb   : > { %v2776_v14 = vpop.permute.xlu1 %2775  ;;  %2995 = vrot.lane.b32.xlu0 %v2918_v53, %s4300_s17  ;;  %v4196_v53 = vadd.low.f32.bf16 %v2621_v0, %v5413_v42 }
 0x3ec   : > { %2857 = vrot.lane.b32.xlu1 %v2776_v14, %s4300_s17 }
 0x3ee   : > { %v5512_v17 = vpop.permute.xlu0 %3089 }
 0x3ef   : > { %v2920_v9 = vpop.permute.xlu1 %2919 }
 0x3f0   : > { %2997 = vrot.lane.b32.xlu1 %v2920_v9, %s4300_s17  ;;  %v4197_v9 = vadd.low.f32.bf16 %v4196_v53, %v5411_v41 }
 0x3f2   : > { %v2700_v22 = vpop.permute.xlu0 %2699 }
 0x3f3   : > { %v5517_v24 = vpop.permute.xlu1 %3091  ;;  %v5519_v8 = vadd.f32 %v2700_v22, %v2636_v13 }
 0x3f6   : > { %v2778_v28 = vpop.permute.xlu0 %2777 }
 0x3f7   : > { %v2924_v45 = vpop.permute.xlu1 %2923  ;;  %2859 = vrot.lane.b32.xlu0 %v2778_v28, %s4300_s17  ;;  %v2622_v28 = vadd.f32 %v5287_v56, %v5137_v49 }
 0x3f8   : > { %3001 = vrot.lane.b32.xlu1 %v2924_v45, %s4300_s17 }
 0x3f9   : > { %v4198_v44 = vadd.high.f32.bf16 %v2622_v28, %v5413_v42 }
 0x3fa   : > { %v2922_v3 = vpop.permute.xlu0 %2921 }
 0x3fb   : > { %2999 = vrot.lane.b32.xlu0 %v2922_v3, %s4300_s17 }
 0x3fc   : > { %3095 = vrot.lane.b32.xlu1 %v2618_v25, %s4300_s17 }
 0x3fe   : > { %v5527_v51 = vpop.permute.xlu0 %3093 }
 0x3ff   : > { %4036 = vrot.lane.b32.xlu0 %v4299_v16, %s4300_s17  ;;  %v2623_v16 = vadd.f32 %v5295_v30, %v5145_v18 }
 0x401   : > { %v2719_v53 = vadd.f32 %v5417_v10, %v2623_v16 }
 0x402   : > { %v2834_v14 = vpop.permute.xlu1 %2833  ;;  %v2832_v13 = vpop.permute.xlu0 %2831 }
 0x403   : > { %v2878_v26 = vadd.f32 %v4198_v44, %v2832_v13  ;;  %v2879_v58 = vadd.f32 %v2834_v14, %v2719_v53 }
 0x406   : > { %v2974_v22 = vpop.permute.xlu1 %2973 }
 0x407   : > { %v3021_v45 = vadd.f32 %v4197_v9, %v2974_v22  ;;  %v2624_v9 = vadd.f32 %v5301_v47, %v5153_v40 }
 0x409   : > { %v3117_v25 = vadd.f32 %v5432_v60, %v3021_v45  ;;  %v2836_v3 = vpop.permute.xlu0 %2835  ;;  %v2720_v30 = vadd.f32 %v5422_v48, %v2624_v9 }
 0x40b   : > { %4148 = vtanh.f32 %v3117_v25  ;;  %v2880_v10 = vadd.f32 %v2836_v3, %v2720_v30 }
 0x40d   : > { %v2976_v0 = vpop.permute.xlu0 %2975 }
 0x40e   : > { %v2838_v6 = vpop.permute.xlu1 %2837  ;;  %v3022_v52 = vadd.f32 %v2976_v0, %v2878_v26 }
 0x410   : > { %v3118_v54 = vadd.f32 %v5437_v33, %v3022_v52 }
 0x412   : > { %v2978_v49 = vpop.permute.xlu1 %2977  ;;  %4150 = vtanh.f32 %v3118_v54  ;;  %v2881_v54 = vadd.f32 %v2838_v6, %v5428_v27 }
 0x413   : > { %v3023_v56 = vadd.f32 %v2978_v49, %v2879_v58 }
 0x415   : > { %v3119_v60 = vadd.f32 %v5448_v46, %v3023_v56 }
 0x417   : > { %4152 = vtanh.f32 %v3119_v60 }
 0x418   : > { %v4149_v42 = vpop.eup %4148 }
 0x419   : > { %3197 = vrot.lane.b32.xlu1 %v4149_v42, %s4300_s17  ;;  %v2840_v18 = vpop.permute.xlu0 %2839 }
 0x41a   : > { %v2882_v28 = vadd.f32 %v2840_v18, %v5439_v43 }
 0x41d   : > { %v2980_v13 = vpop.permute.xlu0 %2979 }
 0x41e   : > { %v2842_v14 = vpop.permute.xlu1 %2841  ;;  %v3024_v22 = vadd.f32 %v2980_v13, %v2880_v10 }
 0x41f   : > { %v4151_v52 = vpop.eup %4150  ;;  %v2883_v27 = vadd.f32 %v2842_v14, %v5444_v38 }
 0x420   : > { %v3120_v58 = vadd.f32 %v5453_v2, %v3024_v22  ;;  %3199 = vrot.lane.b32.xlu0 %v4151_v52, %s4300_s17 }
 0x422   : > { %v2982_v33 = vpop.permute.xlu1 %2981  ;;  %4154 = vtanh.f32 %v3120_v58 }
 0x423   : > { %v3025_v46 = vadd.f32 %v2982_v33, %v2881_v54 }
 0x424   : > { %v4153_v40 = vpop.eup %4152 }
 0x425   : > { %v3121_v47 = vadd.f32 %v5464_v37, %v3025_v46  ;;  %3201 = vrot.lane.b32.xlu1 %v4153_v40, %s4300_s17 }
 0x427   : > { %4156 = vtanh.f32 %v3121_v47 }
 0x429   : > { %v2844_v48 = vpop.permute.xlu0 %2843 }
 0x42a   : > { %v2884_v0 = vadd.f32 %v2844_v48, %v5455_v21 }
 0x42d   : > { %v2984_v45 = vpop.permute.xlu0 %2983 }
 0x42e   : > { %v2846_v25 = vpop.permute.xlu1 %2845  ;;  %v3026_v3 = vadd.f32 %v2984_v45, %v2882_v28 }
 0x42f   : > { %v4155_v6 = vpop.eup %4154 }
 0x430   : > { %v3122_v2 = vadd.f32 %v5469_v15, %v3026_v3  ;;  %3203 = vrot.lane.b32.xlu0 %v4155_v6, %s4300_s17  ;;  %v2885_v15 = vadd.f32 %v2846_v25, %v5460_v31 }
 0x432   : > { %v2986_v44 = vpop.permute.xlu1 %2985  ;;  %4158 = vtanh.f32 %v3122_v2 }
 0x433   : > { %v3027_v16 = vadd.f32 %v2986_v44, %v2883_v27 }
 0x434   : > { %v4157_v37 = vpop.eup %4156 }
 0x435   : > { %v3123_v26 = vadd.f32 %v5480_v29, %v3027_v16  ;;  %3205 = vrot.lane.b32.xlu1 %v4157_v37, %s4300_s17 }
 0x437   : > { %4160 = vtanh.f32 %v3123_v26 }
 0x439   : > { %v2848_v43 = vpop.permute.xlu0 %2847 }
 0x43a   : > { %v2886_v30 = vadd.f32 %v2848_v43, %v5471_v57 }
 0x43d   : > { %v2988_v53 = vpop.permute.xlu0 %2987 }
 0x43e   : > { %v2850_v49 = vpop.permute.xlu1 %2849  ;;  %v3028_v56 = vadd.f32 %v2988_v53, %v2884_v0 }
 0x43f   : > { %v4159_v38 = vpop.eup %4158 }
 0x440   : > { %v3124_v60 = vadd.f32 %v5485_v35, %v3028_v56  ;;  %3207 = vrot.lane.b32.xlu0 %v4159_v38, %s4300_s17  ;;  %v2887_v35 = vadd.f32 %v2850_v49, %v5476_v63  ;;  %v4180_v38 = vld [vmem:[%s4554_s14] sm:$0xff] }
 0x442   : > { %v2990_v42 = vpop.permute.xlu1 %2989  ;;  %4162 = vtanh.f32 %v3124_v60 }
 0x443   : > { %v3029_v9 = vadd.f32 %v2990_v42, %v2885_v15 }
 0x444   : > { %v4161_v29 = vpop.eup %4160 }
 0x445   : > { %v3125_v18 = vadd.f32 %v5496_v4, %v3029_v9  ;;  %3209 = vrot.lane.b32.xlu1 %v4161_v29, %s4300_s17  ;;  %v3150_v9 = vsub.f32 1.0, %v5200_v34 }
 0x447   : > { %4164 = vtanh.f32 %v3125_v18  ;;  %v4181_v18 = vld [vmem:[%s4554_s14 + $0x8] sm:$0xff] }
 0x449   : > { %v2852_v21 = vpop.permute.xlu0 %2851 }
 0x44a   : > { %v2888_v33 = vadd.f32 %v2852_v21, %v5487_v12  ;;  %v3166_v21 = vmul.f32 %v4181_v18, %v3150_v9  ;;  %v4191_v9 = vld [vmem:[%s4554_s14 + $0x58] sm:$0xff] }
 0x44d   : > { %v2992_v10 = vpop.permute.xlu0 %2991 }
 0x44e   : > { %v2854_v13 = vpop.permute.xlu1 %2853  ;;  %v3030_v14 = vadd.f32 %v2992_v10, %v2886_v30  ;;  %v3151_v10 = vsub.f32 1.0, %v5214_v39 }
 0x44f   : > { %v4163_v31 = vpop.eup %4162 }
 0x450   : > { %v3126_v22 = vadd.f32 %v5501_v5, %v3030_v14  ;;  %3211 = vrot.lane.b32.xlu0 %v4163_v31, %s4300_s17  ;;  %v2889_v5 = vadd.f32 %v2854_v13, %v5492_v1  ;;  %v4182_v14 = vld [vmem:[%s4554_s14 + $0x10] sm:$0xff] }
 0x451   : > { %v3167_v31 = vmul.f32 %v4182_v14, %v3151_v10 }
 0x452   : > { %v2994_v52 = vpop.permute.xlu1 %2993  ;;  %4166 = vtanh.f32 %v3126_v22 }
 0x453   : > { %v3031_v54 = vadd.f32 %v2994_v52, %v2887_v35  ;;  %v3152_v52 = vsub.f32 1.0, %v5217_v32 }
 0x454   : > { %v4165_v4 = vpop.eup %4164 }
 0x455   : > { %v3127_v58 = vadd.f32 %v5512_v17, %v3031_v54  ;;  %3213 = vrot.lane.b32.xlu1 %v4165_v4, %s4300_s17  ;;  %v4183_v54 = vld [vmem:[%s4554_s14 + $0x18] sm:$0xff] }
 0x456   : > { %v3168_v4 = vmul.f32 %v4183_v54, %v3152_v52  ;;  %v4193_v52 = vld [vmem:[%s4554_s14 + $0x68] sm:$0xff] }
 0x457   : > { %4168 = vtanh.f32 %v3127_v58 }
 0x459   : > { %v2856_v57 = vpop.permute.xlu0 %2855 }
 0x45a   : > { %v2890_v6 = vadd.f32 %v2856_v57, %v5503_v36  ;;  %v3153_v57 = vsub.f32 1.0, %v5208_v55 }
 0x45d   : > { %v2996_v46 = vpop.permute.xlu0 %2995 }
 0x45e   : > { %v2858_v40 = vpop.permute.xlu1 %2857  ;;  %v3032_v47 = vadd.f32 %v2996_v46, %v2888_v33 }
 0x45f   : > { %v4167_v63 = vpop.eup %4166  ;;  %v2891_v16 = vadd.f32 %v2858_v40, %v5508_v7 }
 0x460   : > { %v3128_v48 = vadd.f32 %v5517_v24, %v3032_v47  ;;  %3215 = vrot.lane.b32.xlu0 %v4167_v63, %s4300_s17 }
 0x462   : > { %v2998_v28 = vpop.permute.xlu1 %2997  ;;  %4170 = vtanh.f32 %v3128_v48  ;;  %v4185_v48 = vld [vmem:[%s4554_s14 + $0x28] sm:$0xff] }
 0x463   : > { %v3033_v45 = vadd.f32 %v2998_v28, %v2889_v5  ;;  %v3154_v5 = vsub.f32 1.0, %v5211_v50 }
 0x464   : > { %v4169_v17 = vpop.eup %4168 }
 0x465   : > { %v3129_v25 = vadd.f32 %v5527_v51, %v3033_v45  ;;  %3217 = vrot.lane.b32.xlu1 %v4169_v17, %s4300_s17  ;;  %v3170_v28 = vmul.f32 %v4185_v48, %v3154_v5  ;;  %v3155_v17 = vsub.f32 1.0, %v5226_v62 }
 0x467   : > { %4172 = vtanh.f32 %v3129_v25 }
 0x469   : > { %v2860_v12 = vpop.permute.xlu0 %2859 }
 0x46a   : > { %v3002_v3 = vpop.permute.xlu1 %3001  ;;  %v2892_v1 = vadd.f32 %v2860_v12, %v5519_v8 }
 0x46b   : > { %v3035_v26 = vadd.f32 %v3002_v3, %v2891_v16  ;;  %v3157_v16 = vsub.f32 1.0, %v5223_v11 }
 0x46c   : > { %v4199_v43 = vadd.high.f32.bf16 %v2892_v1, %v5411_v41  ;;  %v3149_v41 = vsub.f32 1.0, %v5196_v20  ;;  %v4187_v1 = vld [vmem:[%s4554_s14 + $0x38] sm:$0xff] }
 0x46d   : > { %v3000_v27 = vpop.permute.xlu0 %2999 }
 0x46e   : > { %v3096_v2 = vpop.permute.xlu1 %3095  ;;  %v3034_v24 = vadd.f32 %v3000_v27, %v2890_v6  ;;  %v3165_v15 = vmul.f32 %v4180_v38, %v3149_v41 }
 0x46f   : > { %v4171_v44 = vpop.eup %4170 }
 0x470   : > { %v3130_v37 = vadd.f32 %v3096_v2, %v3034_v24  ;;  %3219 = vrot.lane.b32.xlu0 %v4171_v44, %s4300_s17  ;;  %v3156_v2 = vsub.f32 1.0, %v5230_v19 }
 0x471   : > { %v4037_v51 = vpop.permute.xlu0 %4036 }
 0x472   : > { %4174 = vtanh.f32 %v3130_v37  ;;  %v4200_v53 = vadd.high.f32.bf16 %v4199_v43, %v4037_v51  ;;  %v4201_v36 = vadd.low.f32.bf16 %v3035_v26, %v4037_v51  ;;  %v3172_v24 = vmul.f32 %v4187_v1, %v3156_v2 }
 0x474   : > { %v4173_v0 = vpop.eup %4172  ;;  %4176 = vtanh.f32 %v4200_v53  ;;  %v3158_v53 = vsub.f32 1.0, %v5228_v61 }
 0x475   : > { %3221 = vrot.lane.b32.xlu1 %v4173_v0, %s4300_s17  ;;  %4178 = vtanh.f32 %v4201_v36  ;;  %v4189_v36 = vld [vmem:[%s4554_s14 + $0x48] sm:$0xff] }
 0x47f   : > { %v4175_v8 = vpop.eup %4174 }
 0x480   : > { %3223 = vrot.lane.b32.xlu0 %v4175_v8, %s4300_s17  ;;  %v3174_v8 = vmul.f32 %v4189_v36, %v3158_v53 }
 0x481   : > { %v4177_v7 = vpop.eup %4176 }
 0x482   : > { %v4179_v49 = vpop.eup %4178 }
 0x483   : > { %3225 = vrot.lane.b32.xlu1 %v4179_v49, %s4300_s17  ;;  %v3159_v49 = vsub.f32 1.0, %v5243_v59 }
 0x484   : > { %3227 = vrot.lane.b32.xlu0 %v4177_v7, %s4300_s17  ;;  %s4206_s17 = sshll.u32 %s4301_s13, 4  ;;  %s4207_s17 = int_to_ptr.vmem [resolvable:$false] %s4206_s17 }
 0x485   : > { %s4208_s20 = scalar_lea.vmem %s4207_s17, 4096  ;;  %p4209_p4 = scmp.lt.s32.totalorder %s5672_s19, %s4207_s17 }
 0x486   : > { %p4210_p5 = scmp.lt.s32.totalorder %s4208_s20, %s4202_s10 }
 0x488   : > { %p4211_p6 = por %p4210_p5, %p4209_p4 }
 0x48a   : > { %p4212_p7 = pnand %p4211_p6, %p4205_p3 }
 0x48b   : > { %v3198_v56 = vpop.permute.xlu1 %3197 }
 0x48c   : > { %v3245_v60 = vmul.f32 %v3198_v56, %v5196_v20 }
 0x48e   : > { %v3261_v42 = vadd.f32 %v3245_v60, %v3165_v15 }
 0x490   : > { %3277 = vst.msk [vmem:[%s5589_s29] sm:$0xff] %vm765_vm1, %v3261_v42  ;;  %v3160_v42 = vsub.f32 1.0, %v5247_v23 }
 0x492   : > { %v3200_v29 = vpop.permute.xlu0 %3199 }
 0x493   : > { %v3246_v30 = vmul.f32 %v3200_v29, %v5200_v34  ;;  %v3176_v29 = vmul.f32 %v4191_v9, %v3160_v42 }
 0x495   : > { %v3262_v20 = vadd.f32 %v3246_v30, %v3166_v21  ;;  %v5751_v21 = vld [vmem:[#allocation7_spill] sm:$0xff] }
 0x496   : > { %v3161_v30 = vsub.f32 1.0, %v5751_v21 }
 0x497   : > { %v3202_v13 = vpop.permute.xlu1 %3201  ;;  %3278 = vst.msk [vmem:[%s5589_s29 + $0x8] sm:$0xff] %vm765_vm1, %v3262_v20 }
 0x498   : > { %v3247_v35 = vmul.f32 %v3202_v13, %v5214_v39  ;;  %v4184_v39 = vld [vmem:[%s4554_s14 + $0x20] sm:$0xff] }
 0x499   : > { %v3169_v40 = vmul.f32 %v4184_v39, %v3153_v57  ;;  %v5754_v57 = vld [vmem:[#allocation9_spill] sm:$0xff] }
 0x49a   : > { %v3263_v22 = vadd.f32 %v3247_v35, %v3167_v31  ;;  %v5752_v35 = vld [vmem:[#allocation8_spill] sm:$0xff] }
 0x49c   : > { %3279 = vst.msk [vmem:[%s5589_s29 + $0x10] sm:$0xff] %vm765_vm1, %v3263_v22  ;;  %v3162_v22 = vsub.f32 1.0, %v5752_v35 }
 0x4a2   : > { %v3204_v34 = vpop.permute.xlu0 %3203 }
 0x4a3   : > { %v3248_v58 = vmul.f32 %v3204_v34, %v5217_v32  ;;  %v3178_v34 = vmul.f32 %v4193_v52, %v3162_v22 }
 0x4a5   : > { %v3264_v33 = vadd.f32 %v3248_v58, %v3168_v4  ;;  %v5753_v4 = vld [vmem:[#allocation10_spill] sm:$0xff] }
 0x4a6   : > { %v3164_v58 = vsub.f32 1.0, %v5753_v4 }
 0x4a7   : > { %v3206_v46 = vpop.permute.xlu1 %3205  ;;  %3280 = vst.msk [vmem:[%s5589_s29 + $0x18] sm:$0xff] %vm765_vm1, %v3264_v33  ;;  %v3163_v33 = vsub.f32 1.0, %v5754_v57 }
 0x4a8   : > { %v3249_v47 = vmul.f32 %v3206_v46, %v5208_v55  ;;  %v4186_v55 = vld [vmem:[%s4554_s14 + $0x30] sm:$0xff] }
 0x4a9   : > { %v3171_v3 = vmul.f32 %v4186_v55, %v3155_v17 }
 0x4aa   : > { %v3265_v63 = vadd.f32 %v3249_v47, %v3169_v40  ;;  %v4194_v40 = vld [vmem:[%s4554_s14 + $0x78] sm:$0xff] }
 0x4ab   : > { %v3180_v47 = vmul.f32 %v4194_v40, %v3164_v58 }
 0x4ac   : > { %3281 = vst.msk [vmem:[%s5589_s29 + $0x20] sm:$0xff] %vm765_vm1, %v3265_v63 }
 0x4b2   : > { %v3208_v32 = vpop.permute.xlu0 %3207 }
 0x4b3   : > { %v3250_v45 = vmul.f32 %v3208_v32, %v5211_v50  ;;  %v4195_v32 = vld [vmem:[%s4554_s14 + $0x70] sm:$0xff] }
 0x4b4   : > { %v3179_v48 = vmul.f32 %v4195_v32, %v3163_v33 }
 0x4b5   : > { %v3266_v25 = vadd.f32 %v3250_v45, %v3170_v28 }
 0x4b7   : > { %v3210_v12 = vpop.permute.xlu1 %3209  ;;  %3282 = vst.msk [vmem:[%s5589_s29 + $0x28] sm:$0xff] %vm765_vm1, %v3266_v25 }
 0x4b8   : > { %v3251_v6 = vmul.f32 %v3210_v12, %v5226_v62  ;;  %v4188_v62 = vld [vmem:[%s4554_s14 + $0x40] sm:$0xff] }
 0x4b9   : > { %v3173_v51 = vmul.f32 %v4188_v62, %v3157_v16 }
 0x4ba   : > { %v3267_v27 = vadd.f32 %v3251_v6, %v3171_v3 }
 0x4bc   : > { %3283 = vst.msk [vmem:[%s5589_s29 + $0x30] sm:$0xff] %vm765_vm1, %v3267_v27 }
 0x4c2   : > { %v3212_v50 = vpop.permute.xlu0 %3211 }
 0x4c3   : > { %v3252_v44 = vmul.f32 %v3212_v50, %v5230_v19 }
 0x4c5   : > { %v3268_v37 = vadd.f32 %v3252_v44, %v3172_v24 }
 0x4c7   : > { %v3214_v26 = vpop.permute.xlu1 %3213  ;;  %3284 = vst.msk [vmem:[%s5589_s29 + $0x38] sm:$0xff] %vm765_vm1, %v3268_v37 }
 0x4c8   : > { %v3253_v43 = vmul.f32 %v3214_v26, %v5223_v11  ;;  %v4190_v11 = vld [vmem:[%s4554_s14 + $0x50] sm:$0xff] }
 0x4c9   : > { %v3175_v38 = vmul.f32 %v4190_v11, %v3159_v49 }
 0x4ca   : > { %v3269_v0 = vadd.f32 %v3253_v43, %v3173_v51 }
 0x4cc   : > { %3285 = vst.msk [vmem:[%s5589_s29 + $0x40] sm:$0xff] %vm765_vm1, %v3269_v0 }
 0x4d2   : > { %v3216_v19 = vpop.permute.xlu0 %3215 }
 0x4d3   : > { %v3254_v7 = vmul.f32 %v3216_v19, %v5228_v61 }
 0x4d5   : > { %v3270_v41 = vadd.f32 %v3254_v7, %v3174_v8 }
 0x4d7   : > { %v3218_v56 = vpop.permute.xlu1 %3217  ;;  %3286 = vst.msk [vmem:[%s5589_s29 + $0x48] sm:$0xff] %vm765_vm1, %v3270_v41 }
 0x4d8   : > { %v3255_v15 = vmul.f32 %v3218_v56, %v5243_v59  ;;  %v4192_v59 = vld [vmem:[%s4554_s14 + $0x60] sm:$0xff]  ;;  %s3294_s14 = scalar_lea.sflag [#allocation5], %s4473_s15 }
 0x4d9   : > { %v3177_v13 = vmul.f32 %v4192_v59, %v3161_v30 }
 0x4da   : > { %v3271_v60 = vadd.f32 %v3255_v15, %v3175_v38 }
 0x4dc   : > { %3287 = vst.msk [vmem:[%s5589_s29 + $0x50] sm:$0xff] %vm765_vm1, %v3271_v60 }
 0x4e2   : > { %v3220_v61 = vpop.permute.xlu0 %3219 }
 0x4e3   : > { %v3256_v18 = vmul.f32 %v3220_v61, %v5247_v23 }
 0x4e5   : > { %v3272_v10 = vadd.f32 %v3256_v18, %v3176_v29 }
 0x4e7   : > { %v3222_v20 = vpop.permute.xlu1 %3221  ;;  %3288 = vst.msk [vmem:[%s5589_s29 + $0x58] sm:$0xff] %vm765_vm1, %v3272_v10 }
 0x4e8   : > { %v3257_v14 = vmul.f32 %v3222_v20, %v5751_v21 }
 0x4ea   : > { %v3273_v31 = vadd.f32 %v3257_v14, %v3177_v13 }
 0x4ec   : > { %3289 = vst.msk [vmem:[%s5589_s29 + $0x60] sm:$0xff] %vm765_vm1, %v3273_v31 }
 0x4f2   : > { %v3224_v23 = vpop.permute.xlu0 %3223 }
 0x4f3   : > { %v3258_v54 = vmul.f32 %v3224_v23, %v5752_v35 }
 0x4f5   : > { %v3274_v46 = vadd.f32 %v3258_v54, %v3178_v34  ;;  %v3226_v5 = vpop.permute.xlu1 %3225 }
 0x4f6   : > { %v3228_v39 = vpop.permute.xlu0 %3227  ;;  %v3259_v28 = vmul.f32 %v3226_v5, %v5754_v57 }
 0x4f7   : > { %3290 = vst.msk [vmem:[%s5589_s29 + $0x68] sm:$0xff] %vm765_vm1, %v3274_v46  ;;  %v3260_v63 = vmul.f32 %v3228_v39, %v5753_v4 }
 0x4f8   : > { %v3275_v17 = vadd.f32 %v3259_v28, %v3179_v48 }
 0x4f9   : > { %v3276_v45 = vadd.f32 %v3260_v63, %v3180_v47 }
 0x4fa   : > { %3291 = vst.msk [vmem:[%s5589_s29 + $0x70] sm:$0xff] %vm765_vm1, %v3275_v17 }
 0x4fb   : > { %3292 = vst.msk [vmem:[%s5589_s29 + $0x78] sm:$0xff] %vm765_vm1, %v3276_v45 }
 0x4fc   : > { %4215 = shalt.err (!%p4212_p7)
}
 0x4fd   : > { %s4216_s29 = scalar_lea.hbm %s5670_s9, 2048  ;;  %s4220_s24 = scalar_lea.hbm %s5735_s6, 8192 }
 0x4fe   : > { %p4217_p10 = scmp.ne.s32.totalorder %s5670_s9, %s4216_s29  ;;  %p4221_p13 = scmp.lt.s32.totalorder %s5670_s9, %s5735_s6 }
 0x4ff   : > { %p4222_p0 = scmp.lt.s32.totalorder %s4220_s24, %s4216_s29 }
 0x500   : > { %p4218_p11 = pnand %p4217_p10, %p4400_p8 }
 0x501   : > { %p4223_p1 = por %p4222_p0, %p4221_p13 }
 0x502   : > { %p4219_p12 = pneg %p4218_p11 }
 0x504   : > { %p4224_p2 = pnand %p4223_p1, %p4219_p12 }
 0x506   : > { %4227 = shalt.err (!%p4224_p2)
}
 0x507   : > { %s4302_s10 = smov 128   ;;  %s4303_s17 = smov 256  }
 0x508   : > { %s4304_s20 = smov 8  }
 0x509   : > { %3946 = dma.vmem_to_hbm [thread:$0]  (%p4400_p8), %s5672_s19, 2048, %s5670_s9, %s3294_s14, %s4302_s10, %s4303_s17, %s4304_s20  }
 0x50a PF: > { %p3952_p3 = scmp.ge.s32.totalorder %s4294_s28, 2  ;;  %s3324_s18 = sand.u32 1, %s4266_s21  }
 0x50b   : > { %s3325_s29 = scalar_lea.sflag [#allocation5], %s3324_s18 }
 0x50c   : > { %p3949_p4 = pnand %p3952_p3, %p4404_p9 }
 0x50e   : > { %p3950_p5 = pneg %p3949_p4 }
 0x510   : > { %4261 = dma.done.wait (%p3950_p5), %s3325_s29, 2048  }
 0x511   : > { %4263 = vsyncadd (%p3950_p5), %s3325_s29, 4294965248  ;;  %s19_s28 = sadd.s32 1, %s4294_s28   ;;  %s5755_s21 = smov %s4270_s22 }
 0x512   : > { %p16_p6 = scmp.ge.s32.totalorder %s19_s28, 6   ;;  %s5756_s22 = smov %s4274_s23 }
 0x513   : > { %s5757_s23 = smov %s4412_s16  ;;  %s5758_s24 = smov %s4286_s26 }
 0x514   : > { %s5759_s25 = smov %s4290_s27  ;;  %s5760_s26 = smov %s5763_s7 }
 0x515   : > { %s5761_s27 = smov %s5767_s8  ;;  %18 = sbr.rel (!%p16_p6) target bundleno = 5 (0x5), region = 179 }
 0x51a   :  { %3330 = vsyncpa [#allocation5], 1 }
 0x51b   :  { %3332 = vsyncpa [#allocation5 + $0x1], 1 }

// kernel: sep_conv_gru.2
= control target key start
LH: loop header
LB: loop body
LE: loop exit
PB: predicated region body
PF: predicated region fallthrough
CT: control target
= control target key end

     0   :  { %s4332_s21 = smov 0   ;;  %s6432_s0 = inlined_call_operand.vmem [shape: f32[512,32], index: 0, kind: input, shape index: {}]   ;;  %s6433_s1 = inlined_call_operand.vmem [shape: bf16[512,64], index: 1, kind: input, shape index: {}]   ;;  %s6434_s2 = inlined_call_operand.vmem [shape: bf16[5,32,96], index: 2, kind: input, shape index: {}]   ;;  %s6435_s3 = inlined_call_operand.vmem [shape: bf16[5,64,96], index: 3, kind: input, shape index: {}]   ;;  %s6436_s4 = inlined_call_operand.vmem [shape: bf16[32,160], index: 4, kind: input, shape index: {}]   ;;  %s6437_s5 = inlined_call_operand.vmem [shape: f32[1,96], index: 5, kind: input, shape index: {}]   ;;  %s6438_s6 = inlined_call_operand.vmem [shape: f32[512,32], index: 6, kind: output, shape index: {}]  }
   0x1 LB: > { %s3595_s22 = sadd.s32 4294967295, %s4291_s21   ;;  %p3599_p0 = scmp.ge.s32.totalorder %s4291_s21, 1  ;;  %s4291_s21 = sphi %s4332_s21, %s16_s21  }
   0x2   : > { %p224_p1 = scmp.lt.s32.totalorder %s4291_s21, 5 }
   0x4   : > { %p225_p2 = pnand %p3599_p0, %p224_p1 }
   0x6   : > { %228 = sbr.rel (%p225_p2) target bundleno = 1254 (0x4e6), region = 44 }
   0xb   : > { %v4129_v0 = vld [vmem:[%s6435_s3 + $0x58] sm:$0xff]   ;;  %s3600_s25 = sshll.u32 %s3595_s22, 4  ;;  %v4130_v1 = vld [vmem:[%s6435_s3 + $0x50] sm:$0xff]   ;;  %v4131_v2 = vld [vmem:[%s6435_s3 + $0x48] sm:$0xff]   ;;  %vm605_vm0 = vcmask 523264   ;;  %vm6450_vm1 = vcmask 261120  }
   0xc   : > { %p260_p3 = scmp.lt.s32.totalorder %s3600_s25, 63  ;;  %3897 = vmatprep.subr.bf16.mxu0 %v4129_v0  ;;  %v4132_v4 = vld [vmem:[%s6435_s3 + $0x40] sm:$0xff]   ;;  %v4135_v5 = vld [vmem:[%s6434_s2 + $0x28] sm:$0xff]   ;;  %v4144_v9 = vld [vmem:[%s6435_s3 + $0x18] sm:$0xff]   ;;  %s4293_s29 = smov 32  }
   0xd   : > { %3898 = vmatpush3.bf16.msra.mxu0 %v4129_v0  ;;  %v4140_v8 = vld [vmem:[%s6434_s2 + $0x20] sm:$0xff]   ;;  %v4143_v10 = vld [vmem:[%s6434_s2 + $0x8] sm:$0xff]   ;;  %3941 = vmatprep.subr.bf16.mxu1 %v4144_v9  ;;  %v4145_v11 = vld [vmem:[%s6435_s3 + $0x10] sm:$0xff]   ;;  %s4295_s17 = smov 96   ;;  %s4296_s18 = smov 64  }
   0xe   : > { %s6838_s25 = smov (!%p260_p3, %s3600_s25), 63  ;;  %3899 = vmatprep.subr.bf16.mxu0 %v4130_v1  ;;  %3942 = vmatpush3.bf16.msra.mxu1 %v4144_v9  ;;  %v4147_v13 = vld [vmem:[%s6435_s3 + $0x8] sm:$0xff]   ;;  %v4148_v15 = vld [vmem:[%s6435_s3] sm:$0xff]   ;;  %v4149_v17 = vld [vmem:[%s6435_s3 + $0x38] sm:$0xff]  }
   0xf   : > { %s3603_s30 = sshll.u32 %s6838_s25, 2  ;;  %3943 = vmatprep.subr.bf16.mxu1 %v4145_v11  ;;  %s3601_s28 = sshll.u32 %s6838_s25, 3  ;;  %v4151_v19 = vld [vmem:[%s6435_s3 + $0x30] sm:$0xff]   ;;  %v4152_v23 = vld [vmem:[%s6435_s3 + $0x28] sm:$0xff]   ;;  %v4154_v27 = vld [vmem:[%s6435_s3 + $0x20] sm:$0xff]  }
  0x10   : > { %s4355_s9 = scalar_lea.vmem %s6433_s1, %s3603_s30  ;;  %s4423_s10 = scalar_lea.vmem %s6432_s0, %s3601_s28  ;;  %v4155_v31 = vld [vmem:[%s6435_s3 + $0x78] sm:$0xff]   ;;  %v4146_v33 = vld [vmem:[%s6434_s2] sm:$0xff]   ;;  %v4157_v47 = vld [vmem:[%s6435_s3 + $0x70] sm:$0xff]  }
  0x11   : > { %3900 = vmatpush3.bf16.msra.mxu0 %v4130_v1  ;;  %v4358_v3 = vld [vmem:[%s4355_s9] sm:$0xff]   ;;  %v4371_v6 = vld [vmem:[%s4355_s9 + $0x8] sm:$0xff]   ;;  %v4374_v7 = vld [vmem:[%s4355_s9 + $0x10] sm:$0xff]   ;;  %s6350_s22 = scalar_lea.vmem %s6438_s6, %s3601_s28 }
  0x12   : > { %3901 = vmatprep.subr.bf16.mxu0 %v4131_v2  ;;  %3905 = vmatprep.mubr.msk.bf16.mxu0 %vm605_vm0, %v4358_v3  ;;  %v4393_v12 = vld [vmem:[%s4355_s9 + $0x18] sm:$0xff]   ;;  %v4399_v14 = vld [vmem:[%s4355_s9 + $0x20] sm:$0xff]   ;;  %v4409_v16 = vld [vmem:[%s4355_s9 + $0x28] sm:$0xff]  }
  0x13   : > { %3949 = vmatprep.mubr.msk.bf16.mxu1 %vm605_vm0, %v4358_v3  ;;  %3944 = vmatpush3.bf16.msra.mxu1 %v4145_v11  ;;  %v4416_v18 = vld [vmem:[%s4355_s9 + $0x30] sm:$0xff]   ;;  %v4433_v20 = vld [vmem:[%s4423_s10] sm:$0xff]  ;;  %v4436_v21 = vld [vmem:[%s4423_s10 + $0x8] sm:$0xff] }
  0x14   : > { %3945 = vmatprep.subr.bf16.mxu1 %v4147_v13  ;;  %v4441_v22 = vld [vmem:[%s4355_s9 + $0x38] sm:$0xff]   ;;  %v4450_v24 = vpack.c.bf16 %v4436_v21, %v4433_v20  ;;  %v4453_v25 = vld [vmem:[%s4423_s10 + $0x10] sm:$0xff]  ;;  %v4466_v28 = vld [vmem:[%s4423_s10 + $0x20] sm:$0xff]  ;;  %2470 = vrot.lane.b32.xlu0 %v4433_v20, %s4293_s29 }
  0x15   : > { %3902 = vmatpush3.bf16.msra.mxu0 %v4131_v2  ;;  %v4456_v26 = vld [vmem:[%s4423_s10 + $0x18] sm:$0xff]  ;;  %v4469_v29 = vld [vmem:[%s4423_s10 + $0x28] sm:$0xff]  ;;  %v4494_v34 = vld [vmem:[%s4423_s10 + $0x30] sm:$0xff]  ;;  %2474 = vrot.lane.b32.xlu1 %v4453_v25, %s4293_s29 }
  0x16   : > { %3903 = vmatprep.subr.bf16.mxu0 %v4132_v4  ;;  %v4477_v30 = vpack.c.bf16 %v4456_v26, %v4453_v25  ;;  %v4484_v32 = vpack.c.bf16 %v4469_v29, %v4466_v28  ;;  %v4497_v35 = vld [vmem:[%s4423_s10 + $0x38] sm:$0xff]  ;;  %v4500_v36 = vld [vmem:[%s4423_s10 + $0x40] sm:$0xff]  ;;  %v4503_v37 = vld [vmem:[%s4423_s10 + $0x48] sm:$0xff] }
  0x17   : > { %3946 = vmatpush3.bf16.msra.mxu1 %v4147_v13  ;;  %v4150_v38 = vld [vmem:[%s6434_s2 + $0x18] sm:$0xff]   ;;  %v4514_v39 = vpack.c.bf16 %v4497_v35, %v4494_v34  ;;  %v4518_v40 = vpack.c.bf16 %v4503_v37, %v4500_v36  ;;  %v4525_v41 = vld [vmem:[%s4423_s10 + $0x50] sm:$0xff]  ;;  %v4531_v43 = vld [vmem:[%s4423_s10 + $0x60] sm:$0xff] }
  0x18   : > { %3947 = vmatprep.subr.bf16.mxu1 %v4148_v15  ;;  %v4528_v42 = vld [vmem:[%s4423_s10 + $0x58] sm:$0xff]  ;;  %v4534_v44 = vld [vmem:[%s4423_s10 + $0x68] sm:$0xff]  ;;  %v4556_v48 = vld [vmem:[%s4423_s10 + $0x70] sm:$0xff]  ;;  %2472 = vrot.lane.b32.xlu0 %v4436_v21, %s4293_s29 }
  0x19   : > { %3904 = vmatpush3.bf16.msra.mxu0 %v4132_v4  ;;  %v4542_v45 = vpack.c.bf16 %v4528_v42, %v4525_v41  ;;  %v4546_v46 = vpack.c.bf16 %v4534_v44, %v4531_v43  ;;  %v4559_v49 = vld [vmem:[%s4423_s10 + $0x78] sm:$0xff]  ;;  %v4158_v51 = vld [vmem:[%s6435_s3 + $0x68] sm:$0xff]   ;;  %v4160_v52 = vld [vmem:[%s6435_s3 + $0x60] sm:$0xff]   ;;  %2476 = vrot.lane.b32.xlu1 %v4456_v26, %s4293_s29 }
  0x1a   : > { %3921 = vmatprep.subr.bf16.mxu0 %v4135_v5  ;;  %v4567_v50 = vpack.c.bf16 %v4559_v49, %v4556_v48  ;;  %v4161_v53 = vld [vmem:[%s6435_s3 + $0x98] sm:$0xff]   ;;  %v4153_v54 = vld [vmem:[%s6434_s2 + $0x10] sm:$0xff]   ;;  %v4164_v57 = vld [vmem:[%s6435_s3 + $0x88] sm:$0xff]  }
  0x1b   : > { %3948 = vmatpush3.bf16.msra.mxu1 %v4148_v15  ;;  %v4156_v55 = vld [vmem:[%s6434_s2 + $0x38] sm:$0xff]   ;;  %v4163_v56 = vld [vmem:[%s6435_s3 + $0x90] sm:$0xff]   ;;  %v4166_v58 = vld [vmem:[%s6435_s3 + $0x80] sm:$0xff]  }
  0x1c   : > { %3906 = vmatmul.mubr.msk.bf16.vlgmr.msra.gmra.mxu0 %vm605_vm0, %v4371_v6  ;;  %3985 = vmatprep.subr.bf16.mxu1 %v4149_v17  ;;  %v4159_v59 = vld [vmem:[%s6434_s2 + $0x30] sm:$0xff]   ;;  %v4162_v60 = vld [vmem:[%s6434_s2 + $0x48] sm:$0xff]   ;;  %v4165_v61 = vld [vmem:[%s6434_s2 + $0x40] sm:$0xff]  }
  0x1d   : > { %3922 = vmatpush3.bf16.msra.mxu0 %v4135_v5  ;;  %3909 = vmatprep.mubr.msk.bf16.mxu0 %vm605_vm0, %v4374_v7 }
  0x1e   : > { %3923 = vmatprep.subr.bf16.mxu0 %v4140_v8  ;;  %3950 = vmatmul.mubr.msk.bf16.vlgmr.msra.gmra.mxu1 %vm605_vm0, %v4371_v6 }
  0x1f   : > { %3986 = vmatpush3.bf16.msra.mxu1 %v4149_v17  ;;  %3953 = vmatprep.mubr.msk.bf16.mxu1 %vm605_vm0, %v4374_v7 }
  0x20   : > { %3987 = vmatprep.subr.bf16.mxu1 %v4151_v19  ;;  %2478 = vrot.lane.b32.xlu0 %v4466_v28, %s4293_s29 }
  0x21   : > { %3924 = vmatpush3.bf16.msra.mxu0 %v4140_v8  ;;  %2480 = vrot.lane.b32.xlu1 %v4469_v29, %s4293_s29 }
  0x22   : > { %3965 = vmatprep.subr.bf16.mxu0 %v4143_v10 }
  0x23   : > { %3988 = vmatpush3.bf16.msra.mxu1 %v4151_v19 }
  0x24   : > { %3910 = vmatmul.mubr.msk.bf16.gmra.mxu0 %vm605_vm0, %v4393_v12  ;;  %3989 = vmatprep.subr.bf16.mxu1 %v4152_v23 }
  0x25   : > { %3913 = vmatprep.mubr.msk.bf16.mxu0 %vm605_vm0, %v4399_v14  ;;  %2482 = vrot.lane.b32.xlu0 %v4494_v34, %s4293_s29 }
  0x26   : > { %3954 = vmatmul.mubr.msk.bf16.gmra.mxu1 %vm605_vm0, %v4393_v12  ;;  %2484 = vrot.lane.b32.xlu1 %v4497_v35, %s4293_s29 }
  0x27   : > { %3957 = vmatprep.mubr.msk.bf16.mxu1 %vm605_vm0, %v4399_v14  ;;  %3990 = vmatpush3.bf16.msra.mxu1 %v4152_v23 }
  0x28   : > { %3991 = vmatprep.subr.bf16.mxu1 %v4154_v27 }
  0x29   : > { %2486 = vrot.lane.b32.xlu0 %v4500_v36, %s4293_s29 }
  0x2a   : > { %2488 = vrot.lane.b32.xlu1 %v4503_v37, %s4293_s29 }
  0x2b   : > { %3992 = vmatpush3.bf16.msra.mxu1 %v4154_v27 }
  0x2c   : > { %3914 = vmatmul.mubr.msk.bf16.gmra.mxu0 %vm605_vm0, %v4409_v16  ;;  %4029 = vmatprep.subr.bf16.mxu1 %v4155_v31 }
  0x2d   : > { %3917 = vmatprep.mubr.msk.bf16.mxu0 %vm605_vm0, %v4416_v18  ;;  %2490 = vrot.lane.b32.xlu0 %v4525_v41, %s4293_s29 }
  0x2e   : > { %3958 = vmatmul.mubr.msk.bf16.gmra.mxu1 %vm605_vm0, %v4409_v16  ;;  %2492 = vrot.lane.b32.xlu1 %v4528_v42, %s4293_s29 }
  0x2f   : > { %3961 = vmatprep.mubr.msk.bf16.mxu1 %vm605_vm0, %v4416_v18 }
  0x31   : > { %2494 = vrot.lane.b32.xlu0 %v4531_v43, %s4293_s29 }
  0x32   : > { %2496 = vrot.lane.b32.xlu1 %v4534_v44, %s4293_s29 }
  0x34   : > { %3918 = vmatmul.mubr.msk.bf16.gmra.mxu0 %vm605_vm0, %v4441_v22 }
  0x35   : > { %3925 = vmatprep.mubr.msk.bf16.mxu0 %vm6450_vm1, %v4450_v24  ;;  %2498 = vrot.lane.b32.xlu0 %v4556_v48, %s4293_s29 }
  0x36   : > { %3962 = vmatmul.mubr.msk.bf16.gmra.mxu1 %vm605_vm0, %v4441_v22  ;;  %2500 = vrot.lane.b32.xlu1 %v4559_v49, %s4293_s29 }
  0x37   : > { %3993 = vmatprep.mubr.msk.bf16.mxu1 %vm605_vm0, %v4358_v3 }
  0x3c   : > { %3926 = vmatmul.mubr.msk.bf16.vlgmr.msra.gmra.mxu0 %vm6450_vm1, %v4477_v30 }
  0x3d   : > { %3966 = vmatpush3.bf16.msra.mxu0 %v4143_v10  ;;  %3929 = vmatprep.mubr.msk.bf16.mxu0 %vm6450_vm1, %v4484_v32 }
  0x3e   : > { %3967 = vmatprep.subr.bf16.mxu0 %v4146_v33  ;;  %3994 = vmatmul.mubr.msk.bf16.vlgmr.msra.gmra.mxu1 %vm605_vm0, %v4371_v6 }
  0x3f   : > { %4030 = vmatpush3.bf16.msra.mxu1 %v4155_v31  ;;  %3997 = vmatprep.mubr.msk.bf16.mxu1 %vm605_vm0, %v4374_v7 }
  0x40   : > { %4031 = vmatprep.subr.bf16.mxu1 %v4157_v47 }
  0x41   : > { %3968 = vmatpush3.bf16.msra.mxu0 %v4146_v33 }
  0x42   : > { %4009 = vmatprep.subr.bf16.mxu0 %v4150_v38 }
  0x43   : > { %4032 = vmatpush3.bf16.msra.mxu1 %v4157_v47 }
  0x44   : > { %3930 = vmatmul.mubr.msk.bf16.gmra.mxu0 %vm6450_vm1, %v4514_v39  ;;  %4033 = vmatprep.subr.bf16.mxu1 %v4158_v51 }
  0x45   : > { %3933 = vmatprep.mubr.msk.bf16.mxu0 %vm6450_vm1, %v4518_v40 }
  0x46   : > { %3998 = vmatmul.mubr.msk.bf16.gmra.mxu1 %vm605_vm0, %v4393_v12 }
  0x47   : > { %4001 = vmatprep.mubr.msk.bf16.mxu1 %vm605_vm0, %v4399_v14  ;;  %4034 = vmatpush3.bf16.msra.mxu1 %v4158_v51 }
  0x48   : > { %4035 = vmatprep.subr.bf16.mxu1 %v4160_v52 }
  0x4b   : > { %4036 = vmatpush3.bf16.msra.mxu1 %v4160_v52 }
  0x4c   : > { %3934 = vmatmul.mubr.msk.bf16.gmra.mxu0 %vm6450_vm1, %v4542_v45  ;;  %4073 = vmatprep.subr.bf16.mxu1 %v4161_v53 }
  0x4d   : > { %3937 = vmatprep.mubr.msk.bf16.mxu0 %vm6450_vm1, %v4546_v46 }
  0x4e   : > { %4002 = vmatmul.mubr.msk.bf16.gmra.mxu1 %vm605_vm0, %v4409_v16 }
  0x4f   : > { %4005 = vmatprep.mubr.msk.bf16.mxu1 %vm605_vm0, %v4416_v18 }
  0x54   : > { %3938 = vmatmul.mubr.msk.bf16.gmra.mxu0 %vm6450_vm1, %v4567_v50 }
  0x55   : > { %3969 = vmatprep.mubr.msk.bf16.mxu0 %vm6450_vm1, %v4450_v24 }
  0x56   : > { %4006 = vmatmul.mubr.msk.bf16.gmra.mxu1 %vm605_vm0, %v4441_v22 }
  0x57   : > { %4037 = vmatprep.mubr.msk.bf16.mxu1 %vm605_vm0, %v4358_v3 }
  0x5c   : > { %3970 = vmatmul.mubr.msk.bf16.vlgmr.msra.gmra.mxu0 %vm6450_vm1, %v4477_v30 }
  0x5d   : > { %4010 = vmatpush3.bf16.msra.mxu0 %v4150_v38  ;;  %3973 = vmatprep.mubr.msk.bf16.mxu0 %vm6450_vm1, %v4484_v32 }
  0x5e   : > { %4011 = vmatprep.subr.bf16.mxu0 %v4153_v54  ;;  %4038 = vmatmul.mubr.msk.bf16.vlgmr.msra.gmra.mxu1 %vm605_vm0, %v4371_v6 }
  0x5f   : > { %4074 = vmatpush3.bf16.msra.mxu1 %v4161_v53  ;;  %4041 = vmatprep.mubr.msk.bf16.mxu1 %vm605_vm0, %v4374_v7 }
  0x60   : > { %4075 = vmatprep.subr.bf16.mxu1 %v4163_v56 }
  0x61   : > { %4012 = vmatpush3.bf16.msra.mxu0 %v4153_v54 }
  0x62   : > { %4053 = vmatprep.subr.bf16.mxu0 %v4156_v55 }
  0x63   : > { %4076 = vmatpush3.bf16.msra.mxu1 %v4163_v56 }
  0x64   : > { %3974 = vmatmul.mubr.msk.bf16.gmra.mxu0 %vm6450_vm1, %v4514_v39  ;;  %4077 = vmatprep.subr.bf16.mxu1 %v4164_v57 }
  0x65   : > { %3977 = vmatprep.mubr.msk.bf16.mxu0 %vm6450_vm1, %v4518_v40 }
  0x66   : > { %4042 = vmatmul.mubr.msk.bf16.gmra.mxu1 %vm605_vm0, %v4393_v12 }
  0x67   : > { %4045 = vmatprep.mubr.msk.bf16.mxu1 %vm605_vm0, %v4399_v14  ;;  %4078 = vmatpush3.bf16.msra.mxu1 %v4164_v57 }
  0x68   : > { %4079 = vmatprep.subr.bf16.mxu1 %v4166_v58 }
  0x6b   : > { %4080 = vmatpush3.bf16.msra.mxu1 %v4166_v58  ;;  %v318_v58 = vlaneseq }
  0x6c   : > { %3978 = vmatmul.mubr.msk.bf16.gmra.mxu0 %vm6450_vm1, %v4542_v45 }
  0x6d   : > { %3981 = vmatprep.mubr.msk.bf16.mxu0 %vm6450_vm1, %v4546_v46 }
  0x6e   : > { %4046 = vmatmul.mubr.msk.bf16.gmra.mxu1 %vm605_vm0, %v4409_v16 }
  0x6f   : > { %4049 = vmatprep.mubr.msk.bf16.mxu1 %vm605_vm0, %v4416_v18 }
  0x74   : > { %3982 = vmatmul.mubr.msk.bf16.gmra.mxu0 %vm6450_vm1, %v4567_v50 }
  0x75   : > { %4013 = vmatprep.mubr.msk.bf16.mxu0 %vm6450_vm1, %v4450_v24 }
  0x76   : > { %4050 = vmatmul.mubr.msk.bf16.gmra.mxu1 %vm605_vm0, %v4441_v22 }
  0x77   : > { %4081 = vmatprep.mubr.msk.bf16.mxu1 %vm605_vm0, %v4358_v3 }
  0x7c   : > { %4014 = vmatmul.mubr.msk.bf16.vlgmr.msra.gmra.mxu0 %vm6450_vm1, %v4477_v30 }
  0x7d   : > { %4054 = vmatpush3.bf16.msra.mxu0 %v4156_v55  ;;  %4017 = vmatprep.mubr.msk.bf16.mxu0 %vm6450_vm1, %v4484_v32 }
  0x7e   : > { %4055 = vmatprep.subr.bf16.mxu0 %v4159_v59  ;;  %4082 = vmatmul.mubr.msk.bf16.vlgmr.msra.gmra.mxu1 %vm605_vm0, %v4371_v6 }
  0x7f   : > { %4085 = vmatprep.mubr.msk.bf16.mxu1 %vm605_vm0, %v4374_v7 }
  0x81   : > { %4056 = vmatpush3.bf16.msra.mxu0 %v4159_v59 }
  0x82   : > { %4097 = vmatprep.subr.bf16.mxu0 %v4162_v60 }
  0x84   : > { %4018 = vmatmul.mubr.msk.bf16.gmra.mxu0 %vm6450_vm1, %v4514_v39 }
  0x85   : > { %4021 = vmatprep.mubr.msk.bf16.mxu0 %vm6450_vm1, %v4518_v40 }
  0x86   : > { %4086 = vmatmul.mubr.msk.bf16.gmra.mxu1 %vm605_vm0, %v4393_v12 }
  0x87   : > { %4089 = vmatprep.mubr.msk.bf16.mxu1 %vm605_vm0, %v4399_v14 }
  0x8c   : > { %4022 = vmatmul.mubr.msk.bf16.gmra.mxu0 %vm6450_vm1, %v4542_v45 }
  0x8d   : > { %4025 = vmatprep.mubr.msk.bf16.mxu0 %vm6450_vm1, %v4546_v46 }
  0x8e   : > { %4090 = vmatmul.mubr.msk.bf16.gmra.mxu1 %vm605_vm0, %v4409_v16 }
  0x8f   : > { %4093 = vmatprep.mubr.msk.bf16.mxu1 %vm605_vm0, %v4416_v18 }
  0x94   : > { %4026 = vmatmul.mubr.msk.bf16.gmra.mxu0 %vm6450_vm1, %v4567_v50 }
  0x95   : > { %4057 = vmatprep.mubr.msk.bf16.mxu0 %vm6450_vm1, %v4450_v24 }
  0x96   : > { %4094 = vmatmul.mubr.msk.bf16.gmra.mxu1 %vm605_vm0, %v4441_v22 }
  0x9c   : > { %4058 = vmatmul.mubr.msk.bf16.vlgmr.msra.gmra.mxu0 %vm6450_vm1, %v4477_v30 }
  0x9d   : > { %4098 = vmatpush3.bf16.msra.mxu0 %v4162_v60  ;;  %4061 = vmatprep.mubr.msk.bf16.mxu0 %vm6450_vm1, %v4484_v32 }
  0x9e   : > { %4099 = vmatprep.subr.bf16.mxu0 %v4165_v61 }
  0xa1   : > { %4100 = vmatpush3.bf16.msra.mxu0 %v4165_v61 }
  0xa4   : > { %4062 = vmatmul.mubr.msk.bf16.gmra.mxu0 %vm6450_vm1, %v4514_v39 }
  0xa5   : > { %4065 = vmatprep.mubr.msk.bf16.mxu0 %vm6450_vm1, %v4518_v40 }
  0xac   : > { %4066 = vmatmul.mubr.msk.bf16.gmra.mxu0 %vm6450_vm1, %v4542_v45 }
  0xad   : > { %4069 = vmatprep.mubr.msk.bf16.mxu0 %vm6450_vm1, %v4546_v46 }
  0xb4   : > { %4070 = vmatmul.mubr.msk.bf16.gmra.mxu0 %vm6450_vm1, %v4567_v50 }
  0xb5   : > { %4101 = vmatprep.mubr.msk.bf16.mxu0 %vm6450_vm1, %v4450_v24 }
  0xbc   : > { %4102 = vmatmul.mubr.msk.bf16.vlgmr.msra.gmra.mxu0 %vm6450_vm1, %v4477_v30 }
  0xbd   : > { %4105 = vmatprep.mubr.msk.bf16.mxu0 %vm6450_vm1, %v4484_v32 }
  0xc4   : > { %4106 = vmatmul.mubr.msk.bf16.gmra.mxu0 %vm6450_vm1, %v4514_v39 }
  0xc5   : > { %4109 = vmatprep.mubr.msk.bf16.mxu0 %vm6450_vm1, %v4518_v40 }
  0xcc   : > { %4110 = vmatmul.mubr.msk.bf16.gmra.mxu0 %vm6450_vm1, %v4542_v45 }
  0xcd   : > { %4113 = vmatprep.mubr.msk.bf16.mxu0 %vm6450_vm1, %v4546_v46 }
  0xd4   : > { %4114 = vmatmul.mubr.msk.bf16.gmra.mxu0 %vm6450_vm1, %v4567_v50 }
  0xdc   : > { %v3907_v62 = vpop.f32.mrf.mxu0 }
  0xde   : > { %v664_v63 = vpop.f32.mrf.mxu0  ;;  %v4742_v8 = vpop.f32.mrf.mxu1 }
  0xe0   : > { %v3908_v0 = vpop.f32.mrf.mxu0  ;;  %v4744_v10 = vpop.f32.mrf.mxu1 }
  0xe2   : > { %v667_v1 = vpop.f32.mrf.mxu0  ;;  %v4746_v12 = vpop.f32.mrf.mxu1 }
  0xe4   : > { %v3911_v2 = vpop.f32.mrf.mxu0  ;;  %v4748_v14 = vpop.f32.mrf.mxu1 }
  0xe6   : > { %v680_v3 = vpop.f32.mrf.mxu0  ;;  %v4750_v16 = vpop.f32.mrf.mxu1 }
  0xe8   : > { %v3912_v4 = vpop.f32.mrf.mxu0  ;;  %v4752_v18 = vpop.f32.mrf.mxu1 }
  0xea   : > { %v683_v5 = vpop.f32.mrf.mxu0  ;;  %v4754_v20 = vpop.f32.mrf.mxu1 }
  0xec   : > { %v3915_v6 = vpop.f32.mrf.mxu0  ;;  %v4756_v22 = vpop.f32.mrf.mxu1 }
  0xee   : > { %v696_v7 = vpop.f32.mrf.mxu0  ;;  %v4760_v25 = vpop.f32.mrf.mxu1 }
  0xf0   : > { %v3916_v9 = vpop.f32.mrf.mxu0  ;;  %v4764_v28 = vpop.f32.mrf.mxu1 }
  0xf2   : > { %v699_v11 = vpop.f32.mrf.mxu0  ;;  %v4766_v31 = vpop.f32.mrf.mxu1 }
  0xf4   : > { %v3919_v13 = vpop.f32.mrf.mxu0  ;;  %v4770_v34 = vpop.f32.mrf.mxu1 }
  0xf6   : > { %v712_v15 = vpop.f32.mrf.mxu0  ;;  %v4774_v37 = vpop.f32.mrf.mxu1 }
  0xf8   : > { %v3920_v17 = vpop.f32.mrf.mxu0  ;;  %v4778_v40 = vpop.f32.mrf.mxu1 }
  0xfa   : > { %v715_v19 = vpop.f32.mrf.mxu0  ;;  %v4782_v43 = vpop.f32.mrf.mxu1 }
  0xfc   : > { %v3927_v21 = vpop.f32.mrf.mxu0  ;;  %v4786_v46 = vpop.f32.mrf.mxu1 }
  0xfd   : > { %v4758_v23 = vadd.f32 %v3927_v21, %v3907_v62 }
  0xfe   : > { %v798_v24 = vpop.f32.mrf.mxu0  ;;  %v4790_v49 = vpop.f32.mrf.mxu1 }
  0xff   : > { %v4762_v26 = vadd.f32 %v798_v24, %v664_v63 }
 0x100   : > { %v3928_v27 = vpop.f32.mrf.mxu0  ;;  %v4794_v52 = vpop.f32.mrf.mxu1 }
 0x101   : > { %v810_v29 = vadd.f32 %v3928_v27, %v3908_v0 }
 0x102   : > { %v801_v30 = vpop.f32.mrf.mxu0  ;;  %v4798_v55 = vpop.f32.mrf.mxu1 }
 0x103   : > { %v4768_v32 = vadd.f32 %v801_v30, %v667_v1  ;;  %v4810_v1 = vshrl.u32 %v318_v58, 7 }
 0x104   : > { %v3931_v33 = vpop.f32.mrf.mxu0  ;;  %v4802_v59 = vpop.f32.mrf.mxu1 }
 0x105   : > { %v4772_v35 = vadd.f32 %v3931_v33, %v3911_v2  ;;  %vm6449_vm2 = vcmp.lt.s32.totalorder %v4810_v1, 2  ;;  %vm6460_vm11 = vcmp.lt.s32.totalorder %v4810_v1, 1 }
 0x106   : > { %v814_v36 = vpop.f32.mrf.mxu0  ;;  %v4806_v62 = vpop.f32.mrf.mxu1 }
 0x107   : > { %v4776_v38 = vadd.f32 %v814_v36, %v680_v3 }
 0x108   : > { %v3932_v39 = vpop.f32.mrf.mxu0  ;;  %v4812_v2 = vpop.f32.mrf.mxu1 }
 0x109   : > { %v4780_v41 = vadd.f32 %v3932_v39, %v3912_v4 }
 0x10a   : > { %v817_v42 = vpop.f32.mrf.mxu0 }
 0x10b   : > { %v4784_v44 = vadd.f32 %v817_v42, %v683_v5  ;;  %v4816_v5 = vpop.f32.mrf.mxu1 }
 0x10c   : > { %v3935_v45 = vpop.f32.mrf.mxu0 }
 0x10d   : > { %v4788_v47 = vadd.f32 %v3935_v45, %v3915_v6 }
 0x10e   : > { %v830_v48 = vpop.f32.mrf.mxu0 }
 0x10f   : > { %v4792_v50 = vadd.f32 %v830_v48, %v696_v7 }
 0x110   : > { %v3936_v51 = vpop.f32.mrf.mxu0 }
 0x111   : > { %v4796_v53 = vadd.f32 %v3936_v51, %v3916_v9  ;;  %v4821_v9 = vadd.s32 16, %v4810_v1 }
 0x112   : > { %v833_v54 = vpop.f32.mrf.mxu0 }
 0x113   : > { %v4800_v56 = vadd.f32 %v833_v54, %v699_v11  ;;  %v4823_v11 = vpop.f32.mrf.mxu1  ;;  %v6439_v27 = vand.u32 15, %v4821_v9 }
 0x114   : > { %v3939_v57 = vpop.f32.mrf.mxu0 }
 0x115   : > { %v4804_v60 = vadd.f32 %v3939_v57, %v3919_v13  ;;  %v4826_v21 = vpop.f32.mrf.mxu1  ;;  %vm4853_vm3 = vcmp.ge.s32.totalorder %v6439_v27, 2 }
 0x116   : > { %v846_v61 = vpop.f32.mrf.mxu0 }
 0x117   : > { %v4808_v63 = vadd.f32 %v846_v61, %v712_v15  ;;  %v4835_v30 = vpop.f32.mrf.mxu1 }
 0x118   : > { %v3940_v0 = vpop.f32.mrf.mxu0 }
 0x119   : > { %v4814_v3 = vadd.f32 %v3940_v0, %v3920_v17  ;;  %v4842_v39 = vpop.f32.mrf.mxu1 }
 0x11a   : > { %v849_v4 = vpop.f32.mrf.mxu0 }
 0x11b   : > { %v4818_v6 = vadd.f32 %v849_v4, %v715_v19  ;;  %v4833_v19 = vadd.s32 32, %v4810_v1  ;;  %v4858_v58 = vpop.f32.mrf.mxu1 }
 0x11c   : > { %v3971_v7 = vpop.f32.mrf.mxu0 }
 0x11d   : > { %v1072_v13 = vadd.f32 %v3971_v7, %v4742_v8  ;;  %v4840_v8 = vadd.s32 48, %v4810_v1  ;;  %v6440_v57 = vand.u32 15, %v4833_v19 }
 0x11e   : > { %v1063_v15 = vpop.f32.mrf.mxu0 }
 0x11f   : > { %v4829_v24 = vadd.f32 %v1063_v15, %v4744_v10  ;;  %v4847_v10 = vld [vmem:[%s6437_s5] ss:$0 sm:$0xff]  ;;  %v1128_v42 = vrot.slane %v1072_v13, 6  ;;  %v6441_v15 = vand.u32 15, %v4840_v8  ;;  %vm4893_vm4 = vcmp.ge.s32.totalorder %v6440_v57, 2 }
 0x120   : > { %v3972_v17 = vpop.f32.mrf.mxu0  ;;  %v871_v51 = vadd.f32 %v4847_v10, %v810_v29  ;;  %v869_v29 = vadd.f32 %v4847_v10, %v4768_v32 }
 0x121   : > { %v1075_v33 = vadd.f32 %v3972_v17, %v4746_v12  ;;  %v6515_v12 = vmov 0  ;;  %v6442_v61 = vrot.slane %v4829_v24, 6  ;;  %v4869_v17 = vpop.f32.mrf.mxu1  ;;  %vm4902_vm5 = vcmp.ge.s32.totalorder %v6441_v15, 2 }
 0x122   : > { %v1066_v36 = vpop.f32.mrf.mxu0  ;;  %v6516_v12 = vsel %vm4853_vm3, 4294967295, %v6515_v12 }
 0x123   : > { %v1129_v45 = vrot.slane %v1075_v33, 6  ;;  %v1067_v48 = vadd.f32 %v1066_v36, %v4748_v14  ;;  %6517 = vst [vmem:[#allocation2_spill] sm:$0xff] %v6516_v12  ;;  %v870_v33 = vadd.f32 %v4847_v10, %v4758_v23  ;;  %v4887_v23 = vpop.f32.mrf.mxu1 }
 0x124   : > { %v3975_v54 = vpop.f32.mrf.mxu0 }
 0x125   : > { %v1155_v0 = vsel %vm6449_vm2, %v1128_v42, %v1129_v45  ;;  %v1127_v4 = vrot.slane %v1067_v48, 6  ;;  %v1088_v14 = vadd.f32 %v3975_v54, %v4750_v16 }
 0x126   : > { %v4866_v7 = vadd.f32 %v1155_v0, %v871_v51  ;;  %v1079_v13 = vpop.f32.mrf.mxu0  ;;  %v4885_v0 = vadd.s32 64, %v4810_v1 }
 0x127   : > { %v1156_v36 = vsel %vm6449_vm2, %v1127_v4, %v1128_v42  ;;  %v1157_v16 = vsel %vm6449_vm2, %v6442_v61, %v1127_v4  ;;  %v1080_v32 = vadd.f32 %v1079_v13, %v4752_v18  ;;  %v6518_v4 = vmov 0 }
 0x128   : > { %v1209_v48 = vsel %vm4853_vm3, %v1156_v36, 0.0  ;;  %v4882_v51 = vadd.f32 %v1157_v16, %v869_v29  ;;  %v3976_v54 = vpop.f32.mrf.mxu0  ;;  %v6519_v4 = vsel %vm4893_vm4, 4294967295, %v6518_v4  ;;  %v872_v29 = vadd.f32 %v4847_v10, %v4776_v38 }
 0x129   : > { %v4889_v27 = vadd.f32 %v1209_v48, %v870_v33  ;;  %v1130_v42 = vrot.slane %v1080_v32, 6  ;;  %6520 = vst [vmem:[#allocation3_spill] sm:$0xff] %v6519_v4  ;;  %v1091_v18 = vadd.f32 %v3976_v54, %v4754_v20  ;;  %v6521_v36 = vmov 0  ;;  %v4906_v33 = vpop.f32.mrf.mxu1 }
 0x12a   : > { %v1082_v13 = vpop.f32.mrf.mxu0  ;;  %v6522_v36 = vsel %vm4902_vm5, 4294967295, %v6521_v36  ;;  %v1132_v16 = vrot.slane %v1088_v14, 6  ;;  %v875_v20 = vadd.f32 %v4847_v10, %v4780_v41  ;;  %v4917_v61 = vadd.s32 80, %v4810_v1 }
 0x12b   : > { %6523 = vst [vmem:[#allocation4_spill] sm:$0xff] %v6522_v36  ;;  %v1154_v32 = vsel %vm6449_vm2, %v1129_v45, %v1130_v42  ;;  %v1133_v48 = vrot.slane %v1091_v18, 6  ;;  %v1083_v57 = vadd.f32 %v1082_v13, %v4756_v22  ;;  %v4919_v12 = vpop.f32.mrf.mxu1  ;;  %v873_v41 = vadd.f32 %v4847_v10, %v4784_v44 }
 0x12c   : > { %v1211_v38 = vsel %vm4893_vm4, %v1154_v32, 0.0  ;;  %v3979_v54 = vpop.f32.mrf.mxu0  ;;  %v874_v4 = vadd.f32 %v4847_v10, %v4772_v35 }
 0x12d   : > { %v4921_v14 = vadd.f32 %v1211_v38, %v872_v29  ;;  %v1151_v45 = vsel %vm6449_vm2, %v1132_v16, %v1133_v48  ;;  %v1131_v22 = vrot.slane %v1083_v57, 6  ;;  %v1104_v18 = vadd.f32 %v3979_v54, %v4760_v25  ;;  %v4930_v15 = vpop.f32.mrf.mxu1 }
 0x12e   : > { %v4928_v13 = vadd.f32 %v1151_v45, %v875_v20  ;;  %v1095_v32 = vpop.f32.mrf.mxu0  ;;  %6524 = vst [vmem:[#allocation5_spill] sm:$0xff] %v4930_v15  ;;  %v4945_v45 = vadd.s32 96, %v4810_v1  ;;  %v879_v54 = vadd.f32 %v4847_v10, %v4796_v53 }
 0x12f   : > { %v1152_v29 = vsel %vm6449_vm2, %v1131_v22, %v1132_v16  ;;  %v1153_v38 = vsel %vm6449_vm2, %v1130_v42, %v1131_v22  ;;  %v1096_v57 = vadd.f32 %v1095_v32, %v4764_v28  ;;  %v4947_v35 = vpop.f32.mrf.mxu1  ;;  %v6526_v42 = vand.u32 15, %v4885_v0 }
 0x130   : > { %v1213_v25 = vsel %vm4902_vm5, %v1152_v29, 0.0  ;;  %v4941_v44 = vadd.f32 %v1153_v38, %v873_v41  ;;  %v3980_v20 = vpop.f32.mrf.mxu0  ;;  %6525 = vst [vmem:[#allocation6_spill] sm:$0xff] %v4947_v35  ;;  %v6527_v28 = vmov 0  ;;  %v876_v41 = vadd.f32 %v4847_v10, %v4792_v50 }
 0x131   : > { %v4949_v15 = vadd.f32 %v1213_v25, %v874_v4  ;;  %v1134_v16 = vrot.slane %v1096_v57, 6  ;;  %vm4953_vm6 = vcmp.ge.s32.totalorder %v6526_v42, 2  ;;  %v1107_v22 = vadd.f32 %v3980_v20, %v4766_v31  ;;  %v4963_v38 = vpop.f32.mrf.mxu1 }
 0x132   : > { %v6528_v28 = vsel %vm4953_vm6, 4294967295, %v6527_v28  ;;  %v1098_v32 = vpop.f32.mrf.mxu0  ;;  %v4961_v29 = vadd.s32 112, %v4810_v1  ;;  %6530 = vst [vmem:[#allocation8_spill] sm:$0xff] %v4963_v38  ;;  %v1136_v4 = vrot.slane %v1104_v18, 6  ;;  %v6531_v50 = vand.u32 15, %v4917_v61 }
 0x133   : > { %6529 = vst [vmem:[#allocation7_spill] sm:$0xff] %v6528_v28  ;;  %v1150_v57 = vsel %vm6449_vm2, %v1133_v48, %v1134_v16  ;;  %v1137_v25 = vrot.slane %v1107_v22, 6  ;;  %v1099_v42 = vadd.f32 %v1098_v32, %v4770_v34  ;;  %v6532_v20 = vmov 0  ;;  %v4979_v35 = vpop.f32.mrf.mxu1 }
 0x134   : > { %v1215_v31 = vsel %vm4953_vm6, %v1150_v57, 0.0  ;;  %vm4974_vm7 = vcmp.ge.s32.totalorder %v6531_v50, 2  ;;  %v3983_v36 = vpop.f32.mrf.mxu0  ;;  %v877_v32 = vadd.f32 %v4847_v10, %v4800_v56 }
 0x135   : > { %v6533_v20 = vsel %vm4974_vm7, 4294967295, %v6532_v20  ;;  %v4981_v48 = vadd.f32 %v1215_v31, %v876_v41  ;;  %v1147_v34 = vsel %vm6449_vm2, %v1136_v4, %v1137_v25  ;;  %v1135_v53 = vrot.slane %v1099_v42, 6  ;;  %v4992_v38 = vpop.f32.mrf.mxu1 }
 0x136   : > { %6534 = vst [vmem:[#allocation9_spill] sm:$0xff] %v6533_v20  ;;  %v1120_v22 = vadd.f32 %v3983_v36, %v4774_v37  ;;  %v4988_v57 = vadd.f32 %v1147_v34, %v879_v54  ;;  %v1111_v50 = vpop.f32.mrf.mxu0  ;;  %6535 = vst [vmem:[#allocation10_spill] sm:$0xff] %v4992_v38  ;;  %v878_v41 = vadd.f32 %v4847_v10, %v4788_v47  ;;  %v6536_v47 = vand.u32 15, %v4945_v45 }
 0x137   : > { %v1148_v42 = vsel %vm6449_vm2, %v1135_v53, %v1136_v4  ;;  %v1149_v37 = vsel %vm6449_vm2, %v1134_v16, %v1135_v53  ;;  %v1112_v56 = vadd.f32 %v1111_v50, %v4778_v40  ;;  %v5005_v34 = vpop.f32.mrf.mxu1  ;;  %v6537_v4 = vmov 0 }
 0x138   : > { %v1217_v36 = vsel %vm4974_vm7, %v1148_v42, 0.0  ;;  %v5003_v54 = vadd.f32 %v1149_v37, %v877_v32  ;;  %v3984_v31 = vpop.f32.mrf.mxu0  ;;  %vm5011_vm8 = vcmp.ge.s32.totalorder %v6536_v47, 2  ;;  %v880_v40 = vadd.f32 %v4847_v10, %v4808_v63 }
 0x139   : > { %v5007_v18 = vadd.f32 %v1217_v36, %v878_v41  ;;  %v1138_v28 = vrot.slane %v1112_v56, 6  ;;  %v6538_v4 = vsel %vm5011_vm8, 4294967295, %v6537_v4  ;;  %v1123_v16 = vadd.f32 %v3984_v31, %v4782_v43  ;;  %v5030_v37 = vpop.f32.mrf.mxu1 }
 0x13a   : > { %6539 = vst [vmem:[#allocation11_spill] sm:$0xff] %v6538_v4  ;;  %v6540_v53 = vand.u32 15, %v4810_v1  ;;  %v6541_v32 = vmov 0  ;;  %v1114_v50 = vpop.f32.mrf.mxu0  ;;  %v6544_v41 = vand.u32 15, %v4961_v29  ;;  %v6545_v42 = vmov 0 }
 0x13b   : > { %v1140_v56 = vrot.slane %v1120_v22, 6  ;;  %v1146_v43 = vsel %vm6449_vm2, %v1137_v25, %v1138_v28  ;;  %v1141_v63 = vrot.slane %v1123_v16, 6  ;;  %v1115_v36 = vadd.f32 %v1114_v50, %v4786_v46  ;;  %v5043_v22 = vpop.f32.mrf.mxu1 }
 0x13c   : > { %vm5020_vm9 = vcmp.ge.s32.totalorder %v6540_v53, 2  ;;  %vm5026_vm10 = vcmp.ge.s32.totalorder %v6544_v41, 2  ;;  %v868_v31 = vadd.f32 %v4847_v10, %v4762_v26  ;;  %v882_v47 = vadd.f32 %v4847_v10, %v4804_v60  ;;  %v4015_v20 = vpop.f32.mrf.mxu0 }
 0x13d   : > { %v6542_v32 = vsel %vm5020_vm9, 4294967295, %v6541_v32  ;;  %v6546_v42 = vsel %vm5026_vm10, 4294967295, %v6545_v42  ;;  %v883_v53 = vadd.f32 %v4847_v10, %v4814_v3  ;;  %v1219_v41 = vsel %vm5011_vm8, %v1146_v43, 0.0 }
 0x13e   : > { %6543 = vst [vmem:[#allocation12_spill] sm:$0xff] %v6542_v32  ;;  %6547 = vst [vmem:[#allocation13_spill] sm:$0xff] %v6546_v42  ;;  %v5045_v38 = vadd.f32 %v1219_v41, %v880_v40  ;;  %v1143_v46 = vsel %vm6449_vm2, %v1140_v56, %v1141_v63  ;;  %v6548_v25 = vrot.slane %v4829_v24, 6  ;;  %v1139_v60 = vrot.slane %v1115_v36, 6  ;;  %v1420_v43 = vpop.f32.mrf.mxu0  ;;  %v5060_v41 = vpop.f32.mrf.mxu1  ;;  %v6599_v42 = vld [vmem:[#allocation10_spill] sm:$0xff] }
 0x13f   : > { %v881_v3 = vadd.f32 %v4847_v10, %v4818_v6  ;;  %v5057_v50 = vadd.f32 %v1143_v46, %v883_v53  ;;  %v1429_v40 = vadd.f32 %v4015_v20, %v4790_v49  ;;  %v5069_v6 = vadd.f32 %v1420_v43, %v4794_v52 }
 0x140   : > { %v1158_v26 = vsel %vm6449_vm2, %v1141_v63, %v6548_v25  ;;  %v1144_v24 = vsel %vm6449_vm2, %v1139_v60, %v1140_v56  ;;  %v1145_v63 = vsel %vm6449_vm2, %v1138_v28, %v1139_v60  ;;  %v4016_v49 = vpop.f32.mrf.mxu0  ;;  %v5079_v56 = vpop.f32.mrf.mxu1  ;;  %v6549_v25 = vand.u32 15, %v4821_v9 }
 0x141   : > { %v1207_v16 = vsel %vm5020_vm9, %v1158_v26, 0.0  ;;  %v1221_v10 = vsel %vm5026_vm10, %v1144_v24, 0.0  ;;  %v5073_v36 = vadd.f32 %v1145_v63, %v881_v3  ;;  %v1485_v46 = vrot.slane %v1429_v40, 7 }
 0x142   : > { %v5062_v4 = vadd.f32 %v1207_v16, %v868_v31  ;;  %v5075_v20 = vadd.f32 %v1221_v10, %v882_v47  ;;  %v1432_v31 = vadd.f32 %v4016_v49, %v4798_v55  ;;  %v1423_v53 = vpop.f32.mrf.mxu0  ;;  %vm5084_vm12 = vcmp.ge.s32.totalorder %v6549_v25, 1 }
 0x143   : > { %v1424_v52 = vadd.f32 %v1423_v53, %v4802_v59  ;;  %v6550_v26 = vmov 0  ;;  %v1483_v47 = vrot.slane %v5069_v6, 7  ;;  %v5095_v59 = vpop.f32.mrf.mxu1  ;;  %v6553_v53 = vand.u32 15, %v4833_v19 }
 0x144   : > { %v1486_v28 = vrot.slane %v1432_v31, 7  ;;  %v6551_v26 = vsel %vm5084_vm12, 4294967295, %v6550_v26  ;;  %v4019_v60 = vpop.f32.mrf.mxu0  ;;  %v6557_v19 = vand.u32 15, %v4840_v8 }
 0x145   : > { %6552 = vst [vmem:[#allocation14_spill] sm:$0xff] %v6551_v26  ;;  %v1484_v3 = vrot.slane %v1424_v52, 7  ;;  %v1445_v16 = vadd.f32 %v4019_v60, %v4806_v62  ;;  %vm5114_vm13 = vcmp.ge.s32.totalorder %v6553_v53, 1  ;;  %v5119_v25 = vpop.f32.mrf.mxu1  ;;  %v6596_v26 = vmov 0 }
 0x146   : > { %v1512_v55 = vsel %vm6460_vm11, %v1485_v46, %v1486_v28  ;;  %v1436_v43 = vpop.f32.mrf.mxu0  ;;  %vm5128_vm14 = vcmp.ge.s32.totalorder %v6557_v19, 1 }
 0x147   : > { %v5093_v40 = vadd.f32 %v1512_v55, %v4866_v7  ;;  %v1513_v9 = vsel %vm6460_vm11, %v1484_v3, %v1485_v46  ;;  %v1514_v24 = vsel %vm6460_vm11, %v1483_v47, %v1484_v3  ;;  %v1437_v63 = vadd.f32 %v1436_v43, %v4812_v2 }
 0x148   : > { %v1566_v10 = vsel %vm5084_vm12, %v1513_v9, 0.0  ;;  %v5107_v62 = vadd.f32 %v1514_v24, %v4882_v51  ;;  %v4020_v7 = vpop.f32.mrf.mxu0  ;;  %v6554_v46 = vmov 0  ;;  %v1489_v60 = vrot.slane %v1445_v16, 7 }
 0x149   : > { %v5110_v49 = vadd.f32 %v1566_v10, %v4889_v27  ;;  %v1487_v31 = vrot.slane %v1437_v63, 7  ;;  %v6555_v46 = vsel %vm5114_vm13, 4294967295, %v6554_v46  ;;  %v1448_v52 = vadd.f32 %v4020_v7, %v4816_v5  ;;  %v5141_v10 = vpop.f32.mrf.mxu1 }
 0x14a   : > { %6556 = vst [vmem:[#allocation15_spill] sm:$0xff] %v6555_v46  ;;  %v1439_v2 = vpop.f32.mrf.mxu0  ;;  %v6558_v43 = vmov 0 }
 0x14b   : > { %v1511_v51 = vsel %vm6460_vm11, %v1486_v28, %v1487_v31  ;;  %v1490_v55 = vrot.slane %v1448_v52, 7  ;;  %v1440_v27 = vadd.f32 %v1439_v2, %v4823_v11  ;;  %v6559_v43 = vsel %vm5128_vm14, 4294967295, %v6558_v43 }
 0x14c   : > { %v1568_v3 = vsel %vm5114_vm13, %v1511_v51, 0.0  ;;  %6560 = vst [vmem:[#allocation16_spill] sm:$0xff] %v6559_v43  ;;  %v4023_v5 = vpop.f32.mrf.mxu0  ;;  %v6561_v51 = vand.u32 15, %v4885_v0 }
 0x14d   : > { %v5133_v9 = vadd.f32 %v1568_v3, %v4921_v14  ;;  %v1508_v16 = vsel %vm6460_vm11, %v1489_v60, %v1490_v55  ;;  %v1488_v28 = vrot.slane %v1440_v27, 7  ;;  %v1461_v24 = vadd.f32 %v4023_v5, %v4826_v21 }
 0x14e   : > { %v5139_v11 = vadd.f32 %v1508_v16, %v4928_v13  ;;  %v1452_v63 = vpop.f32.mrf.mxu0  ;;  %vm5158_vm15 = vcmp.ge.s32.totalorder %v6561_v51, 1  ;;  %v6565_v27 = vand.u32 15, %v4917_v61  ;;  %v6566_v3 = vmov 0  ;;  %v4167_v61 = vld [vmem:[%s6436_s4 + $0x10] ss:$8 sps:$4 sm:$0xff]  }
 0x14f   : > { %v1509_v8 = vsel %vm6460_vm11, %v1488_v28, %v1489_v60  ;;  %v1510_v7 = vsel %vm6460_vm11, %v1487_v31, %v1488_v28  ;;  %v1453_v14 = vadd.f32 %v1452_v63, %v4835_v30  ;;  %v6562_v60 = vmov 0  ;;  %v4169_v28 = vld [vmem:[%s6436_s4 + $0x14] ss:$8 sps:$4 sm:$0xff]  }
 0x150   : > { %v1570_v53 = vsel %vm5128_vm14, %v1509_v8, 0.0  ;;  %v5151_v52 = vadd.f32 %v1510_v7, %v4941_v44  ;;  %v4024_v21 = vpop.f32.mrf.mxu0  ;;  %v6563_v60 = vsel %vm5158_vm15, 4294967295, %v6562_v60  ;;  %vm5165_vm0 = vcmp.ge.s32.totalorder %v6565_v27, 1  ;;  %v5169_v44 = vpop.f32.mrf.mxu1  ;;  %v4172_v8 = vld [vmem:[%s6436_s4 + $0x4] ss:$8 sps:$4 sm:$0xff]   ;;  %2626 = vmatprep.subr.bf16.mxu1 %v4169_v28 }
 0x151   : > { %v5154_v13 = vadd.f32 %v1570_v53, %v4949_v15  ;;  %v1491_v2 = vrot.slane %v1453_v14, 7  ;;  %6564 = vst [vmem:[#allocation17_spill] sm:$0xff] %v6563_v60  ;;  %v1464_v31 = vadd.f32 %v4024_v21, %v4842_v39  ;;  %v6567_v3 = vsel %vm5165_vm0, 4294967295, %v6566_v3  ;;  %2627 = vmatpush1.bf16.msra.mxu1 %v4167_v61  ;;  %v6587_v60 = vld [vmem:[#allocation5_spill] sm:$0xff] }
 0x152   : > { %v1455_v30 = vpop.f32.mrf.mxu0  ;;  %6568 = vst [vmem:[#allocation18_spill] sm:$0xff] %v6567_v3  ;;  %v1493_v15 = vrot.slane %v1461_v24, 7  ;;  %v6452_v7 = vmov 0   ;;  %v5195_v21 = vpop.f32.mrf.mxu1  ;;  %2628 = vmatprep.subr.bf16.mxu1 %v4172_v8  ;;  %v6578_v8 = vmov 0  ;;  %v5302_v3 = vadd.s32 88, %v4810_v1 }
 0x153   : > { %v1507_v19 = vsel %vm6460_vm11, %v1490_v55, %v1491_v2  ;;  %v1494_v0 = vrot.slane %v1464_v31, 7  ;;  %v1456_v5 = vadd.f32 %v1455_v30, %v4858_v58  ;;  %2646 = vmatprep.mubr.bf16.mxu1 %v6452_v7  ;;  %v4170_v31 = vld [vmem:[%s6436_s4] ss:$8 sps:$4 sm:$0xff]   ;;  %v5320_v7 = vadd.s32 120, %v4810_v1 }
 0x154   : > { %v1572_v16 = vsel %vm5158_vm15, %v1507_v19, 0.0  ;;  %v4027_v39 = vpop.f32.mrf.mxu0  ;;  %v5226_v61 = vpop.f32.mrf.mxu1  ;;  %vm6606_vm14 = vcmp.lt.s32.totalorder %v4810_v1, 7 }
 0x155   : > { %v5183_v24 = vadd.f32 %v1572_v16, %v4981_v48  ;;  %v1504_v55 = vsel %vm6460_vm11, %v1493_v15, %v1494_v0  ;;  %v1492_v63 = vrot.slane %v1456_v5, 7  ;;  %v1477_v58 = vadd.f32 %v4027_v39, %v4869_v17  ;;  %2629 = vmatpush1.bf16.msra.mxu1 %v4170_v31  ;;  %vm6607_vm13 = vmmov %vm6606_vm14 }
 0x156   : > { %v5193_v14 = vadd.f32 %v1504_v55, %v4988_v57  ;;  %v1468_v53 = vpop.f32.mrf.mxu0  ;;  %v6573_v16 = vand.u32 15, %v4810_v1  ;;  %v6574_v39 = vmov 0  ;;  %v5253_v31 = vpop.f32.mrf.mxu1  ;;  %vm6608_vm12 = vmmov %vm6607_vm13 }
 0x157   : > { %v1505_v48 = vsel %vm6460_vm11, %v1492_v63, %v1493_v15  ;;  %v1506_v17 = vsel %vm6460_vm11, %v1491_v2, %v1492_v63  ;;  %v1469_v51 = vadd.f32 %v1468_v53, %v4887_v23  ;;  %v6569_v2 = vand.u32 15, %v4945_v45  ;;  %vm6613_vm9 = vmmov %vm6608_vm12 }
 0x158   : > { %v1574_v57 = vsel %vm5165_vm0, %v1505_v48, 0.0  ;;  %v5208_v30 = vadd.f32 %v1506_v17, %v5003_v54  ;;  %v4028_v27 = vpop.f32.mrf.mxu0  ;;  %v6570_v23 = vmov 0  ;;  %vm5222_vm1 = vcmp.ge.s32.totalorder %v6573_v16, 1  ;;  %v5270_v16 = vpop.f32.mrf.mxu1 }
 0x159   : > { %v5211_v15 = vadd.f32 %v1574_v57, %v5007_v18  ;;  %v1495_v19 = vrot.slane %v1469_v51, 7  ;;  %vm5215_vm2 = vcmp.ge.s32.totalorder %v6569_v2, 1  ;;  %v1480_v5 = vadd.f32 %v4028_v27, %v4906_v33 }
 0x15a   : > { %v6571_v23 = vsel %vm5215_vm2, 4294967295, %v6570_v23  ;;  %v6575_v39 = vsel %vm5222_vm1, 4294967295, %v6574_v39  ;;  %v1471_v54 = vpop.f32.mrf.mxu0  ;;  %v1497_v18 = vrot.slane %v1477_v58, 7  ;;  %v6577_v63 = vand.u32 15, %v4961_v29 }
 0x15b   : > { %6572 = vst [vmem:[#allocation19_spill] sm:$0xff] %v6571_v23  ;;  %6576 = vst [vmem:[#allocation20_spill] sm:$0xff] %v6575_v39  ;;  %v1503_v28 = vsel %vm6460_vm11, %v1494_v0, %v1495_v19  ;;  %v1498_v45 = vrot.slane %v1480_v5, 7  ;;  %v1472_v55 = vadd.f32 %v1471_v54, %v4919_v12 }
 0x15c   : > { %v1576_v33 = vsel %vm5215_vm2, %v1503_v28, 0.0  ;;  %vm5235_vm0 = vcmp.ge.s32.totalorder %v6577_v63, 1  ;;  %v4059_v53 = vpop.f32.mrf.mxu0  ;;  %v5272_v28 = vpop.f32.mrf.mxu1 }
 0x15d   : > { %v6579_v8 = vsel %vm5235_vm0, 4294967295, %v6578_v8  ;;  %v5240_v48 = vadd.f32 %v1576_v33, %v5045_v38  ;;  %v1500_v0 = vsel %vm6460_vm11, %v1497_v18, %v1498_v45  ;;  %v1515_v12 = vsel %vm6460_vm11, %v1498_v45, %v1483_v47 }
 0x15e   : > { %6580 = vst [vmem:[#allocation21_spill] sm:$0xff] %v6579_v8  ;;  %v1496_v58 = vrot.slane %v1472_v55, 7  ;;  %v1564_v29 = vsel %vm5222_vm1, %v1515_v12, 0.0  ;;  %v5251_v17 = vadd.f32 %v1500_v0, %v5057_v50  ;;  %v1777_v51 = vpop.f32.mrf.mxu0  ;;  %v5277_v55 = vpop.f32.mrf.mxu1  ;;  %v5288_v0 = vadd.s32 56, %v4810_v1 }
 0x15f   : > { %6581 = vst [vmem:[#allocation22_spill] sm:$0xff] %v5240_v48  ;;  %v5256_v38 = vadd.f32 %v1564_v29, %v5062_v4  ;;  %v5292_v29 = vadd.s32 72, %v4810_v1  ;;  %v1786_v43 = vadd.f32 %v4059_v53, %v6587_v60 }
 0x160   : > { %6582 = vst [vmem:[#allocation23_spill] sm:$0xff] %v5251_v17  ;;  %v1501_v57 = vsel %vm6460_vm11, %v1496_v58, %v1497_v18  ;;  %v1502_v6 = vsel %vm6460_vm11, %v1495_v19, %v1496_v58  ;;  %v4060_v50 = vpop.f32.mrf.mxu0  ;;  %v5275_v19 = vadd.s32 8, %v4810_v1  ;;  %v5285_v63 = vpop.f32.mrf.mxu1  ;;  %6584 = vst [vmem:[#allocation25_spill] sm:$0xff] %v5288_v0 }
 0x161   : > { %v1578_v47 = vsel %vm5235_vm0, %v1501_v57, 0.0  ;;  %v5265_v27 = vadd.f32 %v1502_v6, %v5073_v36  ;;  %v5280_v36 = vadd.s32 24, %v4810_v1  ;;  %6585 = vst [vmem:[#allocation26_spill] sm:$0xff] %v5292_v29  ;;  %v6586_v57 = vld [vmem:[#allocation8_spill] sm:$0xff] }
 0x162   : > { %v5268_v2 = vadd.f32 %v1578_v47, %v5075_v20  ;;  %v1780_v5 = vpop.f32.mrf.mxu0  ;;  %v5283_v20 = vadd.s32 40, %v4810_v1  ;;  %v1789_v6 = vadd.f32 %v4060_v50, %v6586_v57  ;;  %v5304_v12 = vpop.f32.mrf.mxu1  ;;  %v6593_v50 = vmov 0 }
 0x163   : > { %6583 = vst [vmem:[#allocation24_spill] sm:$0xff] %v5265_v27  ;;  %v1781_v47 = vadd.f32 %v1780_v5, %v4979_v35  ;;  %v6588_v35 = vld [vmem:[#allocation6_spill] sm:$0xff]  ;;  %v6592_v46 = vand.u32 15, %v5280_v36 }
 0x164   : > { %v4063_v4 = vpop.f32.mrf.mxu0  ;;  %v5310_v5 = vadd.f32 %v1777_v51, %v6588_v35  ;;  %v1843_v60 = vrot.slane %v1789_v6, 1  ;;  %v6595_v57 = vand.u32 15, %v5283_v20  ;;  %v5338_v32 = vpop.f32.mrf.mxu1 }
 0x165   : > { %v1841_v53 = vrot.slane %v1781_v47, 1  ;;  %vm5324_vm11 = vcmp.lt.s32.totalorder %v6592_v46, 15  ;;  %6598 = vst [vmem:[#allocation8_spill] sm:$0xff] %v5338_v32  ;;  %v1842_v46 = vrot.slane %v1786_v43, 1  ;;  %v1802_v27 = vadd.f32 %v4063_v4, %v6599_v42 }
 0x166   : > { %v1793_v54 = vpop.f32.mrf.mxu0  ;;  %v6594_v50 = vsel %vm5324_vm11, 4294967295, %v6593_v50  ;;  %vm5333_vm0 = vcmp.lt.s32.totalorder %v6595_v57, 15  ;;  %v6603_v47 = vand.u32 15, %v5292_v29  ;;  %v6604_v43 = vmov 0 }
 0x167   : > { %v5298_v39 = vadd.f32 %v1793_v54, %v5005_v34  ;;  %v6589_v34 = vand.u32 15, %v5275_v19  ;;  %v6590_v54 = vmov 0  ;;  %v6597_v26 = vsel %vm5333_vm0, 4294967295, %v6596_v26 }
 0x168   : > { %v4064_v18 = vpop.f32.mrf.mxu0  ;;  %vm5355_vm15 = vcmp.lt.s32.totalorder %v6603_v47, 15  ;;  %v1869_v4 = vsel %vm6606_vm14, %v1842_v46, %v1843_v60  ;;  %v1846_v48 = vrot.slane %v1802_v27, 1  ;;  %v6609_v32 = vand.u32 15, %v5302_v3 }
 0x169   : > { %vm5314_vm1 = vcmp.lt.s32.totalorder %v6589_v34, 15  ;;  %v1805_v51 = vadd.f32 %v4064_v18, %v5030_v37  ;;  %v1844_v35 = vrot.slane %v5298_v39, 1  ;;  %v6600_v39 = vand.u32 15, %v5288_v0 }
 0x16a   : > { %v1796_v45 = vpop.f32.mrf.mxu0  ;;  %v6591_v54 = vsel %vm5314_vm1, 4294967295, %v6590_v54  ;;  %v5349_v18 = vadd.s32 104, %v4810_v1  ;;  %v6605_v43 = vsel %vm5355_vm15, 4294967295, %v6604_v43 }
 0x16b   : > { %v1797_v34 = vadd.f32 %v1796_v45, %v5043_v22  ;;  %vm5344_vm2 = vcmp.lt.s32.totalorder %v6600_v39, 15  ;;  %v6601_v22 = vmov 0  ;;  %v1847_v39 = vrot.slane %v1805_v51, 1 }
 0x16c   : > { %v4067_v33 = vpop.f32.mrf.mxu0  ;;  %v6602_v22 = vsel %vm5344_vm2, 4294967295, %v6601_v22  ;;  %v6610_v51 = vmov 0 }
 0x16d   : > { %v1818_v47 = vadd.f32 %v4067_v33, %v5060_v41 }
 0x16e   : > { %v1809_v58 = vpop.f32.mrf.mxu0 }
 0x16f   : > { %v1810_v37 = vadd.f32 %v1809_v58, %v5079_v56  ;;  %v1870_v58 = vsel %vm6607_vm13, %v1841_v53, %v1842_v46  ;;  %v5371_v56 = vpop.f32.mrf.mxu1  ;;  %vm5375_vm13 = vcmp.lt.s32.totalorder %v6609_v32, 15  ;;  %v1939_v32 = vadd.f32 %v1869_v4, %v5110_v49 }
 0x170   : > { %v4068_v23 = vpop.f32.mrf.mxu0  ;;  %v6611_v51 = vsel %vm5375_vm13, 4294967295, %v6610_v51  ;;  %v1865_v46 = vsel %vm6613_vm9, %v1846_v48, %v1847_v39 }
 0x171   : > { %v1821_v29 = vadd.f32 %v4068_v23, %v5095_v59  ;;  %v1848_v17 = vrot.slane %v1810_v37, 1  ;;  %v1922_v59 = vsel %vm5314_vm1, %v1870_v58, 0.0  ;;  %vm6618_vm1 = vmmov %vm6613_vm9  ;;  %v5403_v58 = vpop.f32.mrf.mxu1  ;;  %v6621_v37 = vand.u32 15, %v5275_v19 }
 0x172   : > { %v1812_v8 = vpop.f32.mrf.mxu0  ;;  %vm6619_vm9 = vmmov %vm6618_vm1 }
 0x173   : > { %v1813_v57 = vadd.f32 %v1812_v8, %v5119_v25  ;;  %v1868_v25 = vsel %vm6608_vm12, %v1843_v60, %v1844_v35  ;;  %v1845_v8 = vrot.slane %v1797_v34, 1  ;;  %v6612_v60 = vrot.slane %v5310_v5, 1  ;;  %vm6620_vm14 = vmmov %vm6618_vm1 }
 0x174   : > { %v4071_v6 = vpop.f32.mrf.mxu0  ;;  %v1924_v34 = vsel %vm5324_vm11, %v1868_v25, 0.0  ;;  %vm6624_vm11 = vmmov %vm6619_vm9 }
 0x175   : > { %v1871_v41 = vsel %vm6608_vm12, %v6612_v60, %v1841_v53  ;;  %v1849_v23 = vrot.slane %v1813_v57, 1  ;;  %v6614_v53 = vand.u32 15, %v5320_v7  ;;  %v1851_v57 = vrot.slane %v1821_v29, 1 }
 0x176   : > { %v1825_v42 = vpop.f32.mrf.mxu0  ;;  %v1834_v49 = vadd.f32 %v4071_v6, %v5141_v10  ;;  %v1937_v25 = vadd.f32 %v1871_v41, %v5256_v38  ;;  %v1938_v60 = vadd.f32 %v1922_v59, %v5107_v62  ;;  %v5418_v10 = vadd.f32 %v1924_v34, %v5093_v40 }
 0x177   : > { %v5365_v45 = vadd.f32 %v1825_v42, %v5169_v44  ;;  %vm5396_vm12 = vcmp.lt.s32.totalorder %v6614_v53, 15  ;;  %v6615_v42 = vmov 0  ;;  %v1867_v53 = vsel %vm6619_vm9, %v1844_v35, %v1845_v8 }
 0x178   : > { %v4072_v0 = vpop.f32.mrf.mxu0  ;;  %v6616_v42 = vsel %vm5396_vm12, 4294967295, %v6615_v42  ;;  %v1864_v44 = vsel %vm6620_vm14, %v1847_v39, %v1848_v17  ;;  %v5421_v29 = vadd.f32 %v1865_v46, %v5154_v13  ;;  %vm6626_vm14 = vmmov %vm6619_vm9  ;;  %v6627_v40 = vand.u32 15, %v5349_v18 }
 0x179   : > { %v1837_v27 = vadd.f32 %v4072_v0, %v5195_v21  ;;  %6617 = vst [vmem:[#allocation5_spill] sm:$0xff] %v6616_v42  ;;  %v1866_v21 = vsel %vm6618_vm1, %v1845_v8, %v1846_v48  ;;  %v1850_v0 = vrot.slane %v1818_v47, 1  ;;  %vm5413_vm1 = vcmp.lt.s32.totalorder %v6621_v37, 14 }
 0x17a   : > { %v1828_v33 = vpop.f32.mrf.mxu0  ;;  %v1926_v6 = vsel %vm5333_vm0, %v1866_v21, 0.0  ;;  %v6625_v19 = vrot.slane %v5365_v45, 1  ;;  %vm5434_vm9 = vcmp.lt.s32.totalorder %v6627_v40, 15  ;;  %v6628_v13 = vmov 0 }
 0x17b   : > { %v1862_v62 = vsel %vm6624_vm11, %v1849_v23, %v1850_v0  ;;  %v1855_v38 = vrot.slane %v1837_v27, 1  ;;  %v1829_v8 = vadd.f32 %v1828_v33, %v5226_v61  ;;  %v6629_v13 = vsel %vm5434_vm9, 4294967295, %v6628_v13  ;;  %v5446_v61 = vpop.f32.mrf.mxu1 }
 0x17c   : > { %v4103_v4 = vpop.f32.mrf.mxu0  ;;  %v1860_v39 = vsel %vm6626_vm14, %v1851_v57, %v6625_v19  ;;  %6630 = vst [vmem:[#allocation6_spill] sm:$0xff] %v6629_v13  ;;  %v5440_v41 = vadd.f32 %v1867_v53, %v5133_v9  ;;  %v1928_v59 = vsel %vm5344_vm2, %v1864_v44, 0.0  ;;  %v1861_v27 = vsel %vm6624_vm11, %v1850_v0, %v1851_v57  ;;  %vm6631_vm14 = vmmov %vm6624_vm11 }
 0x17d   : > { %v2143_v47 = vadd.f32 %v4103_v4, %v5253_v31  ;;  %v1854_v34 = vrot.slane %v1834_v49, 1  ;;  %v1863_v33 = vsel %vm6631_vm14, %v1848_v17, %v1849_v23  ;;  %v1930_v37 = vsel %vm5355_vm15, %v1862_v62, 0.0  ;;  %vm6636_vm14 = vmmov %vm6624_vm11 }
 0x17e   : > { %v2134_v35 = vpop.f32.mrf.mxu0  ;;  %v6632_v44 = vand.u32 15, %v5280_v36  ;;  %v5463_v0 = vadd.f32 %v1926_v6, %v5151_v52  ;;  %v1932_v17 = vsel %vm5375_vm13, %v1860_v39, 0.0  ;;  %v1853_v36 = vrot.slane %v1829_v8, 1 }
 0x17f   : > { %v5453_v31 = vadd.f32 %v2134_v35, %v5270_v16  ;;  %v1857_v23 = vsel %vm6624_vm11, %v1854_v34, %v1855_v38  ;;  %v6635_v16 = vrot.slane %v5310_v5, 1  ;;  %v2199_v49 = vrot.slane %v2143_v47, 2 }
 0x180   : > { %v4104_v46 = vpop.f32.mrf.mxu0  ;;  %vm5458_vm2 = vcmp.lt.s32.totalorder %v6632_v44, 14  ;;  %v5475_v52 = vadd.f32 %v1928_v59, %v5139_v11  ;;  %v5478_v62 = vadd.f32 %v1861_v27, %v5211_v15  ;;  %v5481_v35 = vadd.f32 %v1863_v33, %v5183_v24 }
 0x181   : > { %v2146_v9 = vadd.f32 %v4104_v46, %v5272_v28  ;;  %v1872_v28 = vsel %vm6636_vm14, %v1855_v38, %v6635_v16  ;;  %v5484_v5 = vadd.f32 %v1930_v37, %v5208_v30  ;;  %v5486_v38 = vpop.f32.mrf.mxu1  ;;  %v2197_v19 = vrot.slane %v5453_v31, 2  ;;  %v6649_v16 = vld [vmem:[#allocation8_spill] sm:$0xff] }
 0x182   : > { %v2137_v57 = vpop.f32.mrf.mxu0  ;;  %vm6637_vm11 = vcmp.lt.s32.totalorder %v4810_v1, 6  ;;  %v6638_v15 = vand.u32 15, %v5283_v20  ;;  %v5499_v24 = vadd.f32 %v1932_v17, %v5193_v14  ;;  %v1936_v30 = vsel %vm5396_vm12, %v1872_v28, 0.0 }
 0x183   : > { %v2200_v4 = vrot.slane %v2146_v9, 2  ;;  %v2138_v53 = vadd.f32 %v2137_v57, %v5277_v55  ;;  %v5504_v40 = vadd.f32 %v1857_v23, %v5268_v2  ;;  %vm6643_vm13 = vcmp.lt.s32.totalorder %v4810_v1, 6  ;;  %v2060_v9 = vpop.f32.mrf.mxu1 }
 0x184   : > { %v4107_v6 = vpop.f32.mrf.mxu0  ;;  %vm5494_vm14 = vcmp.lt.s32.totalorder %v6638_v15, 14  ;;  %vm6644_vm15 = vmmov %vm6643_vm13  ;;  %v6645_v46 = vrot.slane %v5365_v45, 1  ;;  %v6650_v45 = vld [vmem:[#allocation23_spill] sm:$0xff] }
 0x185   : > { %v2226_v55 = vsel %vm6637_vm11, %v2199_v49, %v2200_v4  ;;  %v2198_v39 = vrot.slane %v2138_v53, 2  ;;  %v2159_v11 = vadd.f32 %v4107_v6, %v5285_v63  ;;  %vm6642_vm11 = vcmp.lt.s32.totalorder %v4810_v1, 7 }
 0x186   : > { %v5506_v47 = vadd.f32 %v2226_v55, %v1939_v32  ;;  %v2150_v59 = vpop.f32.mrf.mxu0  ;;  %v1858_v63 = vsel %vm6642_vm11, %v1853_v36, %v1854_v34  ;;  %vm6646_vm12 = vmmov %vm6642_vm11  ;;  %v5532_v28 = vadd.f32 %v1936_v30, %v6650_v45 }
 0x187   : > { %v2227_v20 = vsel %vm6643_vm13, %v2198_v39, %v2199_v49  ;;  %v2228_v14 = vsel %vm6644_vm15, %v2197_v19, %v2198_v39  ;;  %v2151_v27 = vadd.f32 %v2150_v59, %v5304_v12  ;;  %v1859_v2 = vsel %vm6646_vm12, %v6645_v46, %v1853_v36  ;;  %vm6651_vm15 = vmmov %vm6643_vm13  ;;  %v6652_v39 = vld [vmem:[#allocation22_spill] sm:$0xff] }
 0x188   : > { %6641 = vst [vmem:[#allocation10_spill] sm:$0xff] %v5506_v47  ;;  %v2312_v32 = vsub.f32 0.0, %v5506_v47  ;;  %v2279_v34 = vsel %vm5413_vm1, %v2227_v20, 0.0  ;;  %v5524_v33 = vadd.f32 %v2228_v14, %v1937_v25  ;;  %v4108_v37 = vpop.f32.mrf.mxu0  ;;  %v2203_v17 = vrot.slane %v2159_v11, 2  ;;  %v6653_v20 = vld [vmem:[#allocation25_spill] sm:$0xff]  ;;  %vm6658_vm12 = vmmov %vm6651_vm15 }
 0x189   : > { %v5526_v44 = vadd.f32 %v2279_v34, %v1938_v60  ;;  %v2201_v23 = vrot.slane %v2151_v27, 2  ;;  %v5529_v12 = vadd.f32 %v4108_v37, %v6649_v16  ;;  %v1934_v57 = vsel %vm5434_vm9, %v1858_v63, 0.0  ;;  %v6659_v34 = vld [vmem:[#allocation26_spill] sm:$0xff] }
 0x18a   : > { %6647 = vst [vmem:[#allocation27_spill] sm:$0xff] %v5524_v33  ;;  %v2328_v36 = vmin.f32 %v2312_v32, 80.0  ;;  %v2310_v49 = vsub.f32 0.0, %v5524_v33  ;;  %v2153_v25 = vpop.f32.mrf.mxu0  ;;  %v5543_v11 = vadd.f32 %v1859_v2, %v6652_v39  ;;  %v6654_v14 = vand.u32 15, %v6653_v20 }
 0x18b   : > { %6648 = vst [vmem:[#allocation28_spill] sm:$0xff] %v5526_v44  ;;  %v2311_v53 = vsub.f32 0.0, %v5526_v44  ;;  %v2225_v60 = vsel %vm6651_vm15, %v2200_v4, %v2201_v23  ;;  %v2204_v6 = vrot.slane %v5529_v12, 2  ;;  %v2154_v55 = vadd.f32 %v2153_v25, %v5371_v56  ;;  %v4095_v4 = vpop.f32.mrf.mxu1  ;;  %vm6663_vm15 = vmmov %vm6658_vm12 }
 0x18c   : > { %v2346_v15 = vmul.f32 1.442695, %v2328_v36  ;;  %v2326_v30 = vmin.f32 %v2310_v49, 80.0  ;;  %v2281_v59 = vsel %vm5458_vm2, %v2225_v60, 0.0  ;;  %v4111_v63 = vpop.f32.mrf.mxu0  ;;  %vm5549_vm13 = vcmp.lt.s32.totalorder %v6654_v14, 14 }
 0x18d   : > { %v2327_v46 = vmin.f32 %v2311_v53, 80.0  ;;  %v5554_v32 = vadd.f32 %v2281_v59, %v5418_v10  ;;  %v2222_v56 = vsel %vm6658_vm12, %v2203_v17, %v2204_v6  ;;  %v2202_v2 = vrot.slane %v2154_v55, 2  ;;  %v6664_v55 = vld [vmem:[#allocation24_spill] sm:$0xff]  ;;  %v2073_v59 = vpop.f32.mrf.mxu1 }
 0x18e   : > { %v6660_v37 = vand.u32 15, %v6659_v34  ;;  %4173 = vpow2.f32 %v2346_v15  ;;  %v2342_v12 = vmul.f32 1.442695, %v2326_v30  ;;  %v5565_v45 = vadd.f32 %v2222_v56, %v5421_v29  ;;  %v2166_v49 = vpop.f32.mrf.mxu0 }
 0x18f   : > { %6657 = vst [vmem:[#allocation8_spill] sm:$0xff] %v5554_v32  ;;  %v2175_v36 = vadd.f32 %v4111_v63, %v5403_v58  ;;  %v2344_v10 = vmul.f32 1.442695, %v2327_v46  ;;  %v2313_v25 = vsub.f32 0.0, %v5554_v32  ;;  %v2223_v53 = vsel %vm6663_vm15, %v2202_v2, %v2203_v17 }
 0x190   : > { %vm5560_vm11 = vcmp.lt.s32.totalorder %v6660_v37, 14  ;;  %v2224_v60 = vsel %vm6658_vm12, %v2201_v23, %v2202_v2  ;;  %v5574_v39 = vadd.f32 %v1934_v57, %v6664_v55  ;;  %v2316_v15 = vsub.f32 0.0, %v5565_v45  ;;  %v4112_v30 = vpop.f32.mrf.mxu0 }
 0x191   : > { %v2283_v29 = vsel %vm5494_vm14, %v2223_v53, 0.0  ;;  %v5580_v58 = vadd.f32 %v2224_v60, %v5440_v41  ;;  %4175 = vpow2.f32 %v2342_v12  ;;  %v2329_v63 = vmin.f32 %v2313_v25, 80.0 }
 0x192   : > { %v5583_v17 = vadd.f32 %v2283_v29, %v5463_v0  ;;  %v2207_v20 = vrot.slane %v2175_v36, 2  ;;  %v2332_v23 = vmin.f32 %v2316_v15, 80.0  ;;  %v2167_v14 = vadd.f32 %v2166_v49, %v5446_v61  ;;  %v2169_v56 = vpop.f32.mrf.mxu0  ;;  %v4096_v61 = vpop.f32.mrf.mxu1 }
 0x193   : > { %v2314_v57 = vsub.f32 0.0, %v5580_v58  ;;  %v2178_v46 = vadd.f32 %v4112_v30, %v5486_v38  ;;  %4177 = vpow2.f32 %v2344_v10  ;;  %v2348_v2 = vmul.f32 1.442695, %v2329_v63 }
 0x194   : > { %v2315_v41 = vsub.f32 0.0, %v5583_v17  ;;  %v2170_v34 = vadd.f32 %v2169_v56, %v2060_v9  ;;  %v2354_v37 = vmul.f32 1.442695, %v2332_v23  ;;  %v2205_v25 = vrot.slane %v2167_v14, 2  ;;  %v4115_v0 = vpop.f32.mrf.mxu0 }
 0x195   : > { %v2330_v12 = vmin.f32 %v2314_v57, 80.0  ;;  %v2208_v53 = vrot.slane %v2178_v46, 2  ;;  %v6665_v36 = vand.u32 15, %v5302_v3  ;;  %4179 = vpow2.f32 %v2348_v2  ;;  %v2076_v2 = vpop.f32.mrf.mxu1 }
 0x196   : > { %v2331_v38 = vmin.f32 %v2315_v41, 80.0  ;;  %v2206_v49 = vrot.slane %v2170_v34, 2  ;;  %v2191_v10 = vadd.f32 %v4115_v0, %v4095_v4  ;;  %v6668_v55 = vand.u32 15, %v5320_v7  ;;  %v2182_v30 = vpop.f32.mrf.mxu0 }
 0x197   : > { %vm5591_vm15 = vcmp.lt.s32.totalorder %v6665_v36, 14  ;;  %v6669_v9 = vmov 0  ;;  %4181 = vpow2.f32 %v2354_v37  ;;  %v2350_v15 = vmul.f32 1.442695, %v2330_v12 }
 0x198   : > { %vm5597_vm12 = vcmp.lt.s32.totalorder %v6668_v55, 14  ;;  %vm6672_vm9 = vcmp.lt.s32.totalorder %v4810_v1, 6  ;;  %v2352_v63 = vmul.f32 1.442695, %v2331_v38  ;;  %v6675_v57 = vand.u32 15, %v5349_v18  ;;  %v4116_v56 = vpop.f32.mrf.mxu0 }
 0x199   : > { %v6670_v9 = vsel %vm5597_vm12, 4294967295, %v6669_v9  ;;  %v2221_v3 = vsel %vm6672_vm9, %v2204_v6, %v2205_v25  ;;  %vm6673_vm0 = vmmov %vm6672_vm9  ;;  %v6676_v14 = vmov 0  ;;  %4183 = vpow2.f32 %v2350_v15 }
 0x19a   : > { %6671 = vst [vmem:[#allocation23_spill] sm:$0xff] %v6670_v9  ;;  %v2218_v29 = vsel %vm6673_vm0, %v2207_v20, %v2208_v53  ;;  %v2285_v23 = vsel %vm5549_vm13, %v2221_v3, 0.0  ;;  %vm6674_vm10 = vmmov %vm6673_vm0  ;;  %vm5614_vm8 = vcmp.lt.s32.totalorder %v6675_v57, 14  ;;  %v2220_v46 = vsel %vm6673_vm0, %v2205_v25, %v2206_v49  ;;  %v2185_v25 = vpop.f32.mrf.mxu0 }
 0x19b   : > { %v5608_v4 = vadd.f32 %v2218_v29, %v5478_v62  ;;  %v2219_v7 = vsel %vm6674_vm10, %v2206_v49, %v2207_v20  ;;  %v6677_v14 = vsel %vm5614_vm8, 4294967295, %v6676_v14  ;;  %v5619_v6 = vadd.f32 %v2285_v23, %v5475_v52  ;;  %v4174_v0 = vpop.eup %4173  ;;  %vm6678_vm10 = vmmov %vm6673_vm0 }
 0x19c   : > { %v2287_v62 = vsel %vm5560_vm11, %v2219_v7, 0.0  ;;  %4185 = vpow2.f32 %v2352_v63  ;;  %v5627_v18 = vadd.f32 %v2220_v46, %v5481_v35  ;;  %v2211_v34 = vrot.slane %v2191_v10, 2  ;;  %vm6679_vm9 = vmmov %vm6673_vm0 }
 0x19d   : > { %v2320_v20 = vsub.f32 0.0, %v5608_v4  ;;  %v5630_v41 = vadd.f32 %v2287_v62, %v5484_v5  ;;  %v2317_v52 = vsub.f32 0.0, %v5619_v6  ;;  %v2183_v37 = vadd.f32 %v2182_v30, %v2073_v59 }
 0x19e   : > { %v2194_v12 = vadd.f32 %v4116_v56, %v4096_v61  ;;  %v2318_v38 = vsub.f32 0.0, %v5627_v18  ;;  %v2186_v55 = vadd.f32 %v2185_v25, %v2076_v2  ;;  %v5635_v29 = vadd.f32 1.0, %v4174_v0  ;;  %v4176_v10 = vpop.eup %4175 }
 0x19f   : > { %v2336_v36 = vmin.f32 %v2320_v20, 80.0  ;;  %v2319_v49 = vsub.f32 0.0, %v5630_v41  ;;  %v2333_v15 = vmin.f32 %v2317_v52, 80.0  ;;  %v2209_v3 = vrot.slane %v2183_v37, 2 }
 0x1a0   : > { %v2212_v35 = vrot.slane %v2194_v12, 2  ;;  %v2334_v63 = vmin.f32 %v2318_v38, 80.0  ;;  %v2210_v7 = vrot.slane %v2186_v55, 2  ;;  %v4178_v2 = vpop.eup %4177  ;;  %v5662_v12 = vpop.permute.xlu0 %2470  ;;  %v2374_v55 = vadd.f32 1.0, %v4176_v10 }
 0x1a1   : > { %v2362_v5 = vmul.f32 1.442695, %v2336_v36  ;;  %v2335_v23 = vmin.f32 %v2319_v49, 80.0  ;;  %v2356_v59 = vmul.f32 1.442695, %v2333_v15  ;;  %v2217_v61 = vsel %vm6678_vm10, %v2208_v53, %v2209_v3  ;;  %vm6682_vm10 = vmmov %vm6673_vm0 }
 0x1a2   : > { %v2214_v30 = vsel %vm6679_vm9, %v2211_v34, %v2212_v35  ;;  %v2229_v57 = vsel %vm6673_vm0, %v2212_v35, %v2197_v19  ;;  %v2358_v46 = vmul.f32 1.442695, %v2334_v63  ;;  %v2289_v56 = vsel %vm5591_vm15, %v2217_v61, 0.0  ;;  %vm6683_vm9 = vmmov %vm6673_vm0  ;;  %v4180_v25 = vpop.eup %4179 }
 0x1a3   : > { %4187 = vpow2.f32 %v2362_v5  ;;  %v2360_v62 = vmul.f32 1.442695, %v2335_v23  ;;  %v5648_v20 = vadd.f32 %v2289_v56, %v5499_v24  ;;  %v2293_v53 = vsel %vm5597_vm12, %v2229_v57, 0.0  ;;  %v5664_v24 = vpop.permute.xlu1 %2474 }
 0x1a4   : > { %4189 = vpow2.f32 %v2356_v59  ;;  %v5653_v52 = vadd.f32 %v2214_v30, %v5504_v40  ;;  %v5656_v31 = vadd.f32 %v2293_v53, %v5532_v28  ;;  %v2215_v19 = vsel %vm6682_vm10, %v2210_v7, %v2211_v34  ;;  %v4182_v36 = vpop.eup %4181  ;;  %v2473_v10 = vpop.permute.xlu0 %2472 }
 0x1a5   : > { %4191 = vpow2.f32 %v2358_v46  ;;  %v2216_v37 = vsel %vm6683_vm9, %v2209_v3, %v2210_v7  ;;  %v2321_v0 = vsub.f32 0.0, %v5648_v20  ;;  %v2291_v28 = vsel %vm5614_vm8, %v2215_v19, 0.0 }
 0x1a6   : > { %6680 = vst [vmem:[#allocation22_spill] sm:$0xff] %v5653_v52  ;;  %6681 = vst [vmem:[#allocation25_spill] sm:$0xff] %v5656_v31  ;;  %4193 = vpow2.f32 %v2360_v62  ;;  %v2324_v40 = vsub.f32 0.0, %v5653_v52  ;;  %v2325_v38 = vsub.f32 0.0, %v5656_v31  ;;  %v5672_v34 = vadd.f32 %v2216_v37, %v5543_v11  ;;  %v4184_v5 = vpop.eup %4183 }
 0x1a7   : > { %v5675_v49 = vadd.f32 %v2291_v28, %v5574_v39  ;;  %v2337_v15 = vmin.f32 %v2321_v0, 80.0  ;;  %4195 = vrcp.f32 %v5635_v29  ;;  %v2375_v35 = vadd.f32 1.0, %v4178_v2  ;;  %v5680_v46 = vpop.permute.xlu1 %2476 }
 0x1a8   : > { %6684 = vst [vmem:[#allocation26_spill] sm:$0xff] %v5672_v34  ;;  %v2340_v3 = vmin.f32 %v2324_v40, 80.0  ;;  %v2341_v63 = vmin.f32 %v2325_v38, 80.0  ;;  %v2322_v23 = vsub.f32 0.0, %v5672_v34  ;;  %4197 = vrcp.f32 %v2374_v55  ;;  %v5682_v28 = vpop.permute.xlu0 %2478 }
 0x1a9   : > { %v2323_v7 = vsub.f32 0.0, %v5675_v49  ;;  %v4186_v59 = vpop.eup %4185  ;;  %v2364_v61 = vmul.f32 1.442695, %v2337_v15  ;;  %4199 = vrcp.f32 %v2375_v35  ;;  %v2377_v2 = vadd.f32 1.0, %v4180_v25 }
 0x1aa   : > { %v2370_v11 = vmul.f32 1.442695, %v2340_v3  ;;  %v2372_v30 = vmul.f32 1.442695, %v2341_v63  ;;  %v2338_v39 = vmin.f32 %v2322_v23, 80.0  ;;  %v2378_v53 = vadd.f32 1.0, %v4184_v5 }
 0x1ab   : > { %v2339_v57 = vmin.f32 %v2323_v7, 80.0  ;;  %4201 = vpow2.f32 %v2364_v61  ;;  %v2379_v19 = vadd.f32 1.0, %v4186_v59  ;;  %v2380_v0 = vadd.f32 1.0, %v4182_v36  ;;  %v5684_v38 = vpop.permute.xlu1 %2480 }
 0x1ac   : > { %4203 = vpow2.f32 %v2370_v11  ;;  %v2366_v62 = vmul.f32 1.442695, %v2338_v39  ;;  %v5693_v11 = vpop.permute.xlu0 %2482  ;;  %vm6692_vm0 = vcmask 261120  }
 0x1ad   : > { %v2368_v56 = vmul.f32 1.442695, %v2339_v57  ;;  %4205 = vpow2.f32 %v2372_v30  ;;  %vm6694_vm10 = vmmov %vm6692_vm0 }
 0x1ae   : > { %4207 = vpow2.f32 %v2366_v62  ;;  %vm6695_vm9 = vmmov %vm6692_vm0 }
 0x1af   : > { %4209 = vpow2.f32 %v2368_v56  ;;  %v5695_v30 = vpop.permute.xlu1 %2484  ;;  %vm6696_vm12 = vmmov %vm6692_vm0 }
 0x1b0   : > { %v4188_v37 = vpop.eup %4187  ;;  %4211 = vrcp.f32 %v2377_v2  ;;  %vm6697_vm8 = vmmov %vm6692_vm0 }
 0x1b1   : > { %v4190_v40 = vpop.eup %4189  ;;  %4213 = vrcp.f32 %v2378_v53  ;;  %v5690_v5 = vadd.f32 1.0, %v4188_v37 }
 0x1b2   : > { %v4192_v15 = vpop.eup %4191  ;;  %v2381_v3 = vadd.f32 1.0, %v4190_v40  ;;  %4215 = vrcp.f32 %v2379_v19 }
 0x1b3   : > { %v4194_v63 = vpop.eup %4193  ;;  %v5686_v23 = vadd.f32 1.0, %v4192_v15  ;;  %4217 = vrcp.f32 %v2380_v0 }
 0x1b4   : > { %v5688_v25 = vadd.f32 1.0, %v4194_v63  ;;  %v4196_v7 = vpop.eup %4195  ;;  %4219 = vrcp.f32 %v2381_v3 }
 0x1b5   : > { %v4198_v36 = vpop.eup %4197  ;;  %4221 = vrcp.f32 %v5686_v23  ;;  %v2408_v39 = vmul.f32 %v4196_v7, %v5635_v29 }
 0x1b6   : > { %v4200_v59 = vpop.eup %4199  ;;  %v2406_v61 = vmul.f32 %v4198_v36, %v2374_v55  ;;  %4223 = vrcp.f32 %v5688_v25 }
 0x1b7   : > { %v2407_v57 = vmul.f32 %v4200_v59, %v2375_v35  ;;  %4225 = vrcp.f32 %v5690_v5  ;;  %v2424_v44 = vsub.f32 2.0, %v2408_v39 }
 0x1b8   : > { %v4202_v62 = vpop.eup %4201  ;;  %v2422_v56 = vsub.f32 2.0, %v2406_v61 }
 0x1b9   : > { %v4204_v37 = vpop.eup %4203  ;;  %v2423_v40 = vsub.f32 2.0, %v2407_v57  ;;  %v5700_v15 = vadd.f32 1.0, %v4202_v62  ;;  %v2487_v57 = vpop.permute.xlu0 %2486 }
 0x1ba   : > { %v4206_v63 = vpop.eup %4205  ;;  %v5702_v32 = vmul.f32 %v4198_v36, %v2422_v56  ;;  %v5704_v55 = vadd.f32 1.0, %v4204_v37  ;;  %v2489_v62 = vpop.permute.xlu1 %2488 }
 0x1bb   : > { %v4208_v47 = vpop.eup %4207  ;;  %v5706_v9 = vmul.f32 %v4200_v59, %v2423_v40  ;;  %4227 = vrcp.f32 %v5700_v15  ;;  %v5709_v29 = vadd.f32 1.0, %v4206_v63  ;;  %v5721_v63 = vmul.f32 %v4196_v7, %v2424_v44 }
 0x1bc   : > { %6685 = vst [vmem:[#allocation24_spill] sm:$0xff] %v5702_v32  ;;  %v4210_v35 = vpop.eup %4209  ;;  %v2518_v61 = vmul.f32 %v5662_v12, %v5702_v32  ;;  %v5713_v42 = vadd.f32 1.0, %v4208_v47  ;;  %4229 = vrcp.f32 %v5704_v55 }
 0x1bd   : > { %6686 = vst [vmem:[#allocation29_spill] sm:$0xff] %v5706_v9  ;;  %v4212_v36 = vpop.eup %4211  ;;  %v2519_v56 = vmul.f32 %v2473_v10, %v5706_v9  ;;  %v5717_v39 = vadd.f32 1.0, %v4210_v35  ;;  %4231 = vrcp.f32 %v5709_v29  ;;  %v2491_v44 = vpop.permute.xlu0 %2490 }
 0x1be   : > { %v4214_v59 = vpop.eup %4213  ;;  %v2409_v37 = vmul.f32 %v4212_v36, %v2377_v2  ;;  %4233 = vrcp.f32 %v5713_v42  ;;  %v2493_v7 = vpop.permute.xlu1 %2492 }
 0x1bf   : > { %v4216_v40 = vpop.eup %4215  ;;  %v2534_v12 = vpack.c.bf16 %v2519_v56, %v2518_v61  ;;  %v2410_v32 = vmul.f32 %v4214_v59, %v2378_v53  ;;  %4235 = vrcp.f32 %v5717_v39  ;;  %v2520_v53 = vmul.f32 %v5664_v24, %v5721_v63 }
 0x1c0   : > { %v4218_v47 = vpop.eup %4217  ;;  %v2425_v33 = vsub.f32 2.0, %v2409_v37  ;;  %v2411_v52 = vmul.f32 %v4216_v40, %v2379_v19 }
 0x1c1   : > { %v4220_v31 = vpop.eup %4219  ;;  %v2426_v10 = vsub.f32 2.0, %v2410_v32  ;;  %v2412_v35 = vmul.f32 %v4218_v47, %v2380_v0  ;;  %2554 = vrot.lane.b32.xlu0 %v2534_v12, %s4295_s17 }
 0x1c2   : > { %v4222_v9 = vpop.eup %4221  ;;  %v5725_v2 = vmul.f32 %v4212_v36, %v2425_v33  ;;  %v2427_v13 = vsub.f32 2.0, %v2411_v52  ;;  %v2413_v34 = vmul.f32 %v4220_v31, %v2381_v3 }
 0x1c3   : > { %v4224_v61 = vpop.eup %4223  ;;  %v5729_v56 = vmul.f32 %v4214_v59, %v2426_v10  ;;  %v2428_v19 = vsub.f32 2.0, %v2412_v35  ;;  %v2414_v32 = vmul.f32 %v4222_v9, %v5686_v23 }
 0x1c4   : > { %v4226_v0 = vpop.eup %4225  ;;  %v2521_v37 = vmul.f32 %v5680_v46, %v5725_v2  ;;  %v5734_v12 = vmul.f32 %v4216_v40, %v2427_v13  ;;  %v2429_v33 = vsub.f32 2.0, %v2413_v34  ;;  %v2415_v52 = vmul.f32 %v4224_v61, %v5688_v25 }
 0x1c5   : > { %v2522_v3 = vmul.f32 %v5682_v28, %v5729_v56  ;;  %v5739_v36 = vmul.f32 %v4218_v47, %v2428_v19  ;;  %v2430_v24 = vsub.f32 2.0, %v2414_v32  ;;  %v2416_v59 = vmul.f32 %v4226_v0, %v5690_v5 }
 0x1c6   : > { %v2535_v10 = vpack.c.bf16 %v2521_v37, %v2520_v53  ;;  %v2523_v23 = vmul.f32 %v5684_v38, %v5734_v12  ;;  %v5744_v35 = vmul.f32 %v4220_v31, %v2429_v33  ;;  %v2431_v46 = vsub.f32 2.0, %v2415_v52  ;;  %v2495_v53 = vpop.permute.xlu0 %2494  ;;  %v2497_v38 = vpop.permute.xlu1 %2496 }
 0x1c7   : > { %v5746_v13 = vmul.f32 %v4222_v9, %v2430_v24  ;;  %v2432_v34 = vsub.f32 2.0, %v2416_v59  ;;  %v2524_v28 = vmul.f32 %v5693_v11, %v5739_v36 }
 0x1c8   : > { %v4228_v40 = vpop.eup %4227  ;;  %v2536_v25 = vpack.c.bf16 %v2523_v23, %v2522_v3  ;;  %v2525_v47 = vmul.f32 %v5695_v30, %v5744_v35  ;;  %2556 = vrot.lane.b32.xlu1 %v2535_v10, %s4295_s17  ;;  %v5753_v5 = vmul.f32 %v4224_v61, %v2431_v46 }
 0x1c9   : > { %v4230_v31 = vpop.eup %4229  ;;  %v2526_v19 = vmul.f32 %v2487_v57, %v5746_v13  ;;  %v2417_v9 = vmul.f32 %v4228_v40, %v5700_v15  ;;  %v5760_v52 = vmul.f32 %v4226_v0, %v2432_v34 }
 0x1ca   : > { %v4232_v32 = vpop.eup %4231  ;;  %v2537_v37 = vpack.c.bf16 %v2525_v47, %v2524_v28  ;;  %v2527_v33 = vmul.f32 %v2489_v62, %v5753_v5  ;;  %2558 = vrot.lane.b32.xlu0 %v2536_v25, %s4295_s17  ;;  %v2420_v11 = vmul.f32 %v4230_v31, %v5704_v55  ;;  %v2499_v55 = vpop.permute.xlu0 %2498 }
 0x1cb   : > { %v4234_v30 = vpop.eup %4233  ;;  %v2433_v61 = vsub.f32 2.0, %v2417_v9  ;;  %v2421_v3 = vmul.f32 %v4232_v32, %v5709_v29  ;;  %v2501_v0 = vpop.permute.xlu1 %2500  ;;  %v2528_v29 = vmul.f32 %v2491_v44, %v5760_v52 }
 0x1cc   : > { %v4236_v24 = vpop.eup %4235  ;;  %v2538_v59 = vpack.c.bf16 %v2527_v33, %v2526_v19  ;;  %v2418_v57 = vmul.f32 %v4234_v30, %v5713_v42  ;;  %2560 = vrot.lane.b32.xlu1 %v2537_v37, %s4295_s17  ;;  %v2436_v15 = vsub.f32 2.0, %v2420_v11  ;;  %v6693_v33 = vmov 0  }
 0x1cd   : > { %v5765_v10 = vmul.f32 %v4228_v40, %v2433_v61  ;;  %v2419_v62 = vmul.f32 %v4236_v24, %v5717_v39  ;;  %v2437_v23 = vsub.f32 2.0, %v2421_v3 }
 0x1ce   : > { %v2434_v46 = vsub.f32 2.0, %v2418_v57  ;;  %v5768_v25 = vmul.f32 %v4230_v31, %v2436_v15  ;;  %2562 = vrot.lane.b32.xlu0 %v2538_v59, %s4295_s17 }
 0x1cf   : > { %6687 = vst [vmem:[#allocation30_spill] sm:$0xff] %v5765_v10  ;;  %v2529_v34 = vmul.f32 %v2493_v7, %v5765_v10  ;;  %v2435_v42 = vsub.f32 2.0, %v2419_v62  ;;  %v5773_v28 = vmul.f32 %v4232_v32, %v2437_v23 }
 0x1d0   : > { %6688 = vst [vmem:[#allocation31_spill] sm:$0xff] %v5768_v25  ;;  %v5775_v47 = vmul.f32 %v4234_v30, %v2434_v46  ;;  %v2532_v39 = vmul.f32 %v2499_v55, %v5768_v25 }
 0x1d1   : > { %6689 = vst [vmem:[#allocation32_spill] sm:$0xff] %v5773_v28  ;;  %v2539_v40 = vpack.c.bf16 %v2529_v34, %v2528_v29  ;;  %v5777_v19 = vmul.f32 %v4236_v24, %v2435_v42  ;;  %v2533_v31 = vmul.f32 %v2501_v0, %v5773_v28 }
 0x1d2   : > { %6690 = vst [vmem:[#allocation33_spill] sm:$0xff] %v5775_v47  ;;  %v2530_v9 = vmul.f32 %v2495_v53, %v5775_v47 }
 0x1d3   : > { %6691 = vst [vmem:[#allocation34_spill] sm:$0xff] %v5777_v19  ;;  %v2531_v37 = vmul.f32 %v2497_v38, %v5777_v19  ;;  %2564 = vrot.lane.b32.xlu1 %v2539_v40, %s4295_s17  ;;  %v2541_v7 = vpack.c.bf16 %v2533_v31, %v2532_v39 }
 0x1d5   : > { %v2540_v44 = vpack.c.bf16 %v2531_v37, %v2530_v9 }
 0x1d7   : > { %2568 = vrot.lane.b32.xlu1 %v2541_v7, %s4295_s17  ;;  %2566 = vrot.lane.b32.xlu0 %v2540_v44, %s4295_s17 }
 0x233   : > { %v2555_v32 = vpop.permute.xlu0 %2554 }
 0x234   : > { %3777 = vmatmul.mubr.msk.bf16.vlgmr.msra.gmra.mxu1 %vm6692_vm0, %v2555_v32 }
 0x235   : > { %2656 = vmatprep.mubr.bf16.mxu1 %v6693_v33 }
 0x23a   : > { %v2557_v11 = vpop.permute.xlu1 %2556 }
 0x23c   : > { %3778 = vmatmul.mubr.msk.bf16.gmra.mxu1 %vm6694_vm10, %v2557_v11  ;;  %v2559_v53 = vpop.permute.xlu0 %2558  ;;  %vm6698_vm10 = vmmov %vm6692_vm0 }
 0x23d   : > { %2666 = vmatprep.mubr.bf16.mxu1 %v6693_v33 }
 0x23e   : > { %v2561_v38 = vpop.permute.xlu1 %2560 }
 0x240   : > { %v2563_v30 = vpop.permute.xlu0 %2562 }
 0x244   : > { %3779 = vmatmul.mubr.msk.bf16.gmra.mxu1 %vm6695_vm9, %v2559_v53  ;;  %vm6699_vm9 = vmmov %vm6692_vm0 }
 0x245   : > { %2676 = vmatprep.mubr.bf16.mxu1 %v6693_v33  ;;  %v2565_v61 = vpop.permute.xlu1 %2564 }
 0x249   : > { %v2567_v3 = vpop.permute.xlu0 %2566  ;;  %v2569_v24 = vpop.permute.xlu1 %2568 }
 0x24c   : > { %3780 = vmatmul.mubr.msk.bf16.gmra.mxu1 %vm6696_vm12, %v2561_v38  ;;  %vm6701_vm12 = vcmp.lt.s32.totalorder %v4810_v1, 6 }
 0x24d   : > { %2686 = vmatprep.mubr.bf16.mxu1 %v6693_v33 }
 0x254   : > { %3781 = vmatmul.mubr.msk.bf16.gmra.mxu1 %vm6697_vm8, %v2563_v30  ;;  %vm6700_vm8 = vcmp.lt.s32.totalorder %v4810_v1, 2 }
 0x255   : > { %2696 = vmatprep.mubr.bf16.mxu1 %v6693_v33 }
 0x25c   : > { %3782 = vmatmul.mubr.msk.bf16.gmra.mxu1 %vm6692_vm0, %v2565_v61  ;;  %vm6702_vm0 = vmmov %vm6700_vm8 }
 0x25d   : > { %2706 = vmatprep.mubr.bf16.mxu1 %v6693_v33 }
 0x264   : > { %3783 = vmatmul.mubr.msk.bf16.gmra.mxu1 %vm6698_vm10, %v2567_v3  ;;  %vm6704_vm10 = vmmov %vm6701_vm12 }
 0x265   : > { %2716 = vmatprep.mubr.bf16.mxu1 %v6693_v33 }
 0x26c   : > { %3784 = vmatmul.mubr.msk.bf16.gmra.mxu1 %vm6699_vm9, %v2569_v24  ;;  %vm6707_vm9 = vmmov %vm6702_vm0 }
 0x2f4   : > { %v5801_v59 = vpop.f32.mrf.mxu1 }
 0x2f5   : > { %2887 = vrot.lane.b32.xlu1 %v5801_v59, %s4295_s17  ;;  %v2743_v62 = vrot.slane %v5801_v59, 6 }
 0x2f6   : > { %v5805_v57 = vpop.f32.mrf.mxu1 }
 0x2f7   : > { %v6502_v42 = vrot.slane %v5805_v57, 2 }
 0x2f8   : > { %v5807_v15 = vpop.f32.mrf.mxu1 }
 0x2f9   : > { %v2744_v23 = vrot.slane %v5807_v15, 6  ;;  %3063 = vrot.lane.b32.xlu1 %v5801_v59, %s4293_s29  ;;  %2889 = vrot.lane.b32.xlu0 %v5807_v15, %s4295_s17 }
 0x2fa   : > { %v2654_v46 = vpop.f32.mrf.mxu1 }
 0x2fb   : > { %v2773_v55 = vsel %vm6700_vm8, %v2743_v62, %v2744_v23  ;;  %v3240_v0 = vrot.slane %v2654_v46, 2 }
 0x2fc   : > { %v5819_v29 = vpop.f32.mrf.mxu1 }
 0x2fd   : > { %v2745_v34 = vrot.slane %v5819_v29, 6  ;;  %3065 = vrot.lane.b32.xlu0 %v5807_v15, %s4293_s29  ;;  %2809 = vrot.lane.b32.xlu1 %v2773_v55, %s4296_s18  ;;  %v3269_v39 = vsel %vm6701_vm12, %v6502_v42, %v3240_v0  ;;  %vm6712_vm12 = vmmov %vm6702_vm0 }
 0x2fe   : > { %v2660_v40 = vpop.f32.mrf.mxu1 }
 0x2ff   : > { %v3241_v31 = vrot.slane %v2660_v40, 2  ;;  %v2772_v9 = vsel %vm6702_vm0, %v2744_v23, %v2745_v34 }
 0x300   : > { %v5835_v37 = vpop.f32.mrf.mxu1  ;;  %v2777_v7 = vsel %vm4853_vm3, %v2772_v9, 0.0  ;;  %vm6705_vm3 = vmmov %vm6702_vm0 }
 0x301   : > { %3303 = vrot.lane.b32.xlu0 %v3269_v39, %s4296_s18  ;;  %2891 = vrot.lane.b32.xlu1 %v5819_v29, %s4295_s17  ;;  %v3268_v32 = vsel %vm6704_vm10, %v3240_v0, %v3241_v31  ;;  %v2746_v11 = vrot.slane %v5835_v37, 6 }
 0x302   : > { %v2664_v33 = vpop.f32.mrf.mxu1  ;;  %v3272_v53 = vsel %vm5413_vm1, %v3268_v32, 0.0  ;;  %vm6706_vm1 = vmmov %vm6704_vm10 }
 0x303   : > { %v3242_v30 = vrot.slane %v2664_v33, 2  ;;  %v2771_v61 = vsel %vm6705_vm3, %v2745_v34, %v2746_v11  ;;  %vm6709_vm8 = vmmov %vm6706_vm1 }
 0x304   : > { %v5850_v38 = vpop.f32.mrf.mxu1  ;;  %vm6717_vm10 = vmmov %vm6705_vm3 }
 0x305   : > { %3067 = vrot.lane.b32.xlu1 %v5819_v29, %s4293_s29  ;;  %2811 = vrot.lane.b32.xlu0 %v2777_v7, %s4296_s18  ;;  %v2747_v3 = vrot.slane %v5850_v38, 6  ;;  %v3267_v24 = vsel %vm6706_vm1, %v3241_v31, %v3242_v30 }
 0x306   : > { %v2670_v48 = vpop.f32.mrf.mxu1 }
 0x307   : > { %v3243_v23 = vrot.slane %v2670_v48, 2  ;;  %v2770_v46 = vsel %vm6707_vm9, %v2746_v11, %v2747_v3 }
 0x308   : > { %v5865_v55 = vpop.f32.mrf.mxu1  ;;  %v2779_v34 = vsel %vm4893_vm4, %v2770_v46, 0.0  ;;  %vm6710_vm4 = vmmov %vm6702_vm0 }
 0x309   : > { %3305 = vrot.lane.b32.xlu1 %v3272_v53, %s4296_s18  ;;  %2893 = vrot.lane.b32.xlu0 %v5835_v37, %s4295_s17  ;;  %v3266_v40 = vsel %vm6709_vm8, %v3242_v30, %v3243_v23  ;;  %v2748_v31 = vrot.slane %v5865_v55, 6  ;;  %vm6714_vm0 = vmmov %vm6706_vm1 }
 0x30a   : > { %v2674_v39 = vpop.f32.mrf.mxu1  ;;  %v3274_v9 = vsel %vm5458_vm2, %v3266_v40, 0.0  ;;  %vm6711_vm2 = vmmov %vm6706_vm1 }
 0x30b   : > { %v3244_v7 = vrot.slane %v2674_v39, 2  ;;  %v2769_v32 = vsel %vm6710_vm4, %v2747_v3, %v2748_v31  ;;  %vm6722_vm1 = vmmov %vm6710_vm4 }
 0x30c   : > { %v5880_v44 = vpop.f32.mrf.mxu1  ;;  %vm6724_vm9 = vmmov %vm6714_vm0 }
 0x30d   : > { %3069 = vrot.lane.b32.xlu0 %v5835_v37, %s4293_s29  ;;  %2813 = vrot.lane.b32.xlu1 %v2771_v61, %s4296_s18  ;;  %v2749_v33 = vrot.slane %v5880_v44, 6  ;;  %v3265_v11 = vsel %vm6711_vm2, %v3243_v23, %v3244_v7  ;;  %vm6726_vm8 = vmmov %vm6714_vm0 }
 0x30e   : > { %v2680_v21 = vpop.f32.mrf.mxu1 }
 0x30f   : > { %v3245_v53 = vrot.slane %v2680_v21, 2  ;;  %v2768_v30 = vsel %vm6712_vm12, %v2748_v31, %v2749_v33  ;;  %vm6731_vm12 = vmmov %vm6722_vm1 }
 0x310   : > { %v5895_v61 = vpop.f32.mrf.mxu1  ;;  %v2781_v48 = vsel %vm4902_vm5, %v2768_v30, 0.0  ;;  %vm6715_vm5 = vmmov %vm6705_vm3 }
 0x311   : > { %3307 = vrot.lane.b32.xlu0 %v3267_v24, %s4296_s18  ;;  %2895 = vrot.lane.b32.xlu1 %v5850_v38, %s4295_s17  ;;  %v3264_v24 = vsel %vm6714_vm0, %v3244_v7, %v3245_v53  ;;  %v2750_v46 = vrot.slane %v5895_v61, 6  ;;  %vm6719_vm3 = vmmov %vm6714_vm0 }
 0x312   : > { %v2684_v23 = vpop.f32.mrf.mxu1  ;;  %v3276_v0 = vsel %vm5494_vm14, %v3264_v24, 0.0  ;;  %vm6716_vm14 = vmmov %vm6714_vm0 }
 0x313   : > { %v3246_v40 = vrot.slane %v2684_v23, 2  ;;  %v2767_v39 = vsel %vm6715_vm5, %v2749_v33, %v2750_v46  ;;  %vm6733_vm5 = vnez %v6677_v14 }
 0x315   : > { %3071 = vrot.lane.b32.xlu1 %v5850_v38, %s4293_s29  ;;  %2815 = vrot.lane.b32.xlu0 %v2779_v34, %s4296_s18  ;;  %v5910_v34 = vpop.f32.mrf.mxu1 }
 0x316   : > { %v2751_v31 = vrot.slane %v5910_v34, 6 }
 0x317   : > { %v2690_v8 = vpop.f32.mrf.mxu1 }
 0x318   : > { %v3247_v7 = vrot.slane %v2690_v8, 2 }
 0x319   : > { %3309 = vrot.lane.b32.xlu1 %v3274_v9, %s4296_s18  ;;  %2897 = vrot.lane.b32.xlu0 %v5865_v55, %s4295_s17  ;;  %v3263_v9 = vsel %vm6716_vm14, %v3245_v53, %v3246_v40  ;;  %v5925_v33 = vpop.f32.mrf.mxu1  ;;  %vm6734_vm14 = vmmov %vm6722_vm1 }
 0x31a   : > { %v3262_v53 = vsel %vm6719_vm3, %v3246_v40, %v3247_v7  ;;  %v2752_v3 = vrot.slane %v5925_v33, 6  ;;  %vm6737_vm3 = vmmov %vm6722_vm1 }
 0x31b   : > { %v2694_v30 = vpop.f32.mrf.mxu1 }
 0x31c   : > { %v3248_v23 = vrot.slane %v2694_v30, 2 }
 0x31d   : > { %3073 = vrot.lane.b32.xlu0 %v5865_v55, %s4293_s29  ;;  %2817 = vrot.lane.b32.xlu1 %v2769_v32, %s4296_s18  ;;  %v2766_v32 = vsel %vm6717_vm10, %v2750_v46, %v2751_v31  ;;  %v5940_v24 = vpop.f32.mrf.mxu1 }
 0x31f   : > { %v2700_v27 = vpop.f32.mrf.mxu1 }
 0x321   : > { %3311 = vrot.lane.b32.xlu0 %v3265_v11, %s4296_s18  ;;  %2899 = vrot.lane.b32.xlu1 %v5880_v44, %s4295_s17  ;;  %v2783_v11 = vsel %vm4953_vm6, %v2766_v32, 0.0  ;;  %vm6720_vm6 = vmmov %vm6710_vm4  ;;  %v5955_v8 = vpop.f32.mrf.mxu1 }
 0x322   : > { %v2765_v46 = vsel %vm6720_vm6, %v2751_v31, %v2752_v3  ;;  %vm6728_vm4 = vmmov %vm6722_vm1 }
 0x323   : > { %v2704_v21 = vpop.f32.mrf.mxu1  ;;  %vm6738_vm6 = vmmov %vm6722_vm1 }
 0x325   : > { %3075 = vrot.lane.b32.xlu1 %v5880_v44, %s4293_s29  ;;  %2819 = vrot.lane.b32.xlu0 %v2781_v48, %s4296_s18  ;;  %v3278_v48 = vsel %vm5549_vm13, %v3262_v53, 0.0  ;;  %vm6721_vm13 = vmmov %vm6714_vm0  ;;  %v5970_v30 = vpop.f32.mrf.mxu1 }
 0x326   : > { %v3261_v40 = vsel %vm6721_vm13, %v3247_v7, %v3248_v23 }
 0x329   : > { %3313 = vrot.lane.b32.xlu1 %v3276_v0, %s4296_s18  ;;  %2901 = vrot.lane.b32.xlu0 %v5895_v61, %s4295_s17  ;;  %v2753_v0 = vrot.slane %v5940_v24, 6 }
 0x32b   : > { %v2764_v31 = vsel %vm6722_vm1, %v2752_v3, %v2753_v0  ;;  %v3250_v3 = vrot.slane %v2704_v21, 2 }
 0x32c   : > { %v2785_v32 = vsel %vm4974_vm7, %v2764_v31, 0.0  ;;  %vm6725_vm7 = vmmov %vm6722_vm1  ;;  %vm6741_vm1 = vcmp.lt.s32.totalorder %v4810_v1, 1 }
 0x32d   : > { %3077 = vrot.lane.b32.xlu0 %v5895_v61, %s4293_s29  ;;  %2821 = vrot.lane.b32.xlu1 %v2767_v39, %s4296_s18  ;;  %v3249_v39 = vrot.slane %v2700_v27, 2 }
 0x32f   : > { %v3260_v7 = vsel %vm6724_vm9, %v3248_v23, %v3249_v39  ;;  %v2710_v23 = vpop.f32.mrf.mxu1  ;;  %v3259_v16 = vsel %vm6726_vm8, %v3249_v39, %v3250_v3  ;;  %vm6742_vm9 = vcmp.lt.s32.totalorder %v4810_v1, 7 }
 0x330   : > { %v3280_v53 = vsel %vm5560_vm11, %v3260_v7, 0.0  ;;  %vm6727_vm11 = vmmov %vm6714_vm0 }
 0x331   : > { %3315 = vrot.lane.b32.xlu0 %v3263_v9, %s4296_s18  ;;  %2903 = vrot.lane.b32.xlu1 %v5910_v34, %s4295_s17  ;;  %v5982_v27 = vpop.f32.mrf.mxu1 }
 0x332   : > { %v2756_v31 = vrot.slane %v5982_v27, 6 }
 0x333   : > { %v2714_v39 = vpop.f32.mrf.mxu1 }
 0x334   : > { %v3252_v21 = vrot.slane %v2714_v39, 2 }
 0x335   : > { %3079 = vrot.lane.b32.xlu1 %v5910_v34, %s4293_s29  ;;  %2823 = vrot.lane.b32.xlu0 %v2783_v11, %s4296_s18  ;;  %v2754_v11 = vrot.slane %v5955_v8, 6  ;;  %v5999_v7 = vpop.f32.mrf.mxu1 }
 0x337   : > { %v6007_v60 = vpop.f32.mrf.mxu1 }
 0x339   : > { %3317 = vrot.lane.b32.xlu1 %v3278_v48, %s4296_s18  ;;  %2905 = vrot.lane.b32.xlu0 %v5925_v33, %s4295_s17  ;;  %v2763_v48 = vsel %vm6725_vm7, %v2753_v0, %v2754_v11  ;;  %vm6743_vm7 = vmmov %vm6741_vm1 }
 0x33d   : > { %3081 = vrot.lane.b32.xlu0 %v5925_v33, %s4293_s29  ;;  %2825 = vrot.lane.b32.xlu1 %v2765_v46, %s4296_s18  ;;  %v3251_v46 = vrot.slane %v2710_v23, 2 }
 0x33f   : > { %v3258_v0 = vsel %vm6727_vm11, %v3250_v3, %v3251_v46  ;;  %vm6746_vm11 = vmmov %vm6742_vm9 }
 0x340   : > { %v3282_v9 = vsel %vm5591_vm15, %v3258_v0, 0.0  ;;  %vm6732_vm15 = vmmov %vm6714_vm0 }
 0x341   : > { %3319 = vrot.lane.b32.xlu0 %v3261_v40, %s4296_s18  ;;  %2907 = vrot.lane.b32.xlu1 %v5940_v24, %s4295_s17  ;;  %v2755_v40 = vrot.slane %v5970_v30, 6  ;;  %v3257_v23 = vsel %vm6732_vm15, %v3251_v46, %v3252_v21  ;;  %vm6750_vm15 = vmmov %vm6741_vm1 }
 0x345   : > { %3083 = vrot.lane.b32.xlu1 %v5940_v24, %s4293_s29  ;;  %2827 = vrot.lane.b32.xlu0 %v2785_v32, %s4296_s18  ;;  %v2762_v32 = vsel %vm6728_vm4, %v2754_v11, %v2755_v40  ;;  %v6501_v11 = vrot.slane %v6007_v60, 2  ;;  %vm6747_vm4 = vnez %v6591_v54 }
 0x347   : > { %v3256_v46 = vsel %vm6714_vm0, %v3252_v21, %v6501_v11  ;;  %v6735_v21 = vld [vmem:[#allocation13_spill] sm:$0xff] }
 0x348   : > { %vm6736_vm10 = vnez %v6735_v21  ;;  %v6739_v21 = vld [vmem:[#allocation12_spill] sm:$0xff] }
 0x349   : > { %3321 = vrot.lane.b32.xlu1 %v3280_v53, %s4296_s18  ;;  %2909 = vrot.lane.b32.xlu0 %v5955_v8, %s4295_s17  ;;  %v6729_v53 = vld [vmem:[#allocation11_spill] sm:$0xff]  ;;  %vm6740_vm13 = vnez %v6739_v21 }
 0x34a   : > { %vm6730_vm2 = vnez %v6729_v53 }
 0x34b   : > { %v2787_v3 = vsel %vm6730_vm2, %v2762_v32, 0.0  ;;  %vm6748_vm2 = vmmov %vm6741_vm1 }
 0x34d   : > { %3085 = vrot.lane.b32.xlu0 %v5955_v8, %s4293_s29  ;;  %2829 = vrot.lane.b32.xlu1 %v2763_v48, %s4296_s18  ;;  %v2761_v48 = vsel %vm6731_vm12, %v2755_v40, %v2756_v31  ;;  %v2757_v40 = vrot.slane %v5999_v7, 6  ;;  %vm6749_vm12 = vmmov %vm6742_vm9 }
 0x34f   : > { %v2760_v32 = vsel %vm6734_vm14, %v2756_v31, %v2757_v40  ;;  %vm6754_vm14 = vnez %v6594_v50 }
 0x351   : > { %3323 = vrot.lane.b32.xlu0 %v3259_v16, %s4296_s18  ;;  %2911 = vrot.lane.b32.xlu1 %v5970_v30, %s4295_s17  ;;  %v6015_v16 = vpop.f32.mrf.mxu1 }
 0x352   : > { %v2758_v39 = vrot.slane %v6015_v16, 6 }
 0x354   : > { %v2759_v11 = vsel %vm6737_vm3, %v2757_v40, %v2758_v39  ;;  %v2774_v14 = vsel %vm6738_vm6, %v2758_v39, %v2743_v62  ;;  %vm6757_vm6 = vmmov %vm6741_vm1 }
 0x355   : > { %3087 = vrot.lane.b32.xlu1 %v5970_v30, %s4293_s29  ;;  %2913 = vrot.lane.b32.xlu0 %v5982_v27, %s4295_s17 }
 0x359   : > { %3325 = vrot.lane.b32.xlu1 %v3282_v9, %s4296_s18  ;;  %3089 = vrot.lane.b32.xlu0 %v5982_v27, %s4293_s29  ;;  %v3284_v9 = vsel %vm6733_vm5, %v3256_v46, 0.0  ;;  %vm6753_vm5 = vmmov %vm6742_vm9 }
 0x35a   : > { %vm6756_vm3 = vmmov %vm6753_vm5 }
 0x35d   : > { %2831 = vrot.lane.b32.xlu0 %v2787_v3, %s4296_s18  ;;  %2833 = vrot.lane.b32.xlu1 %v2761_v48, %s4296_s18 }
 0x361   : > { %3327 = vrot.lane.b32.xlu0 %v3257_v23, %s4296_s18  ;;  %2915 = vrot.lane.b32.xlu1 %v5999_v7, %s4295_s17  ;;  %v2789_v23 = vsel %vm6736_vm10, %v2760_v32, 0.0  ;;  %v2775_v32 = vsel %vm6740_vm13, %v2774_v14, 0.0  ;;  %vm6755_vm10 = vmmov %vm6741_vm1 }
 0x365   : > { %3091 = vrot.lane.b32.xlu1 %v5999_v7, %s4293_s29  ;;  %2917 = vrot.lane.b32.xlu0 %v6015_v16, %s4295_s17 }
 0x367   : > { %v6026_v0 = vpop.permute.xlu1 %2887 }
 0x368   : > { %v6503_v31 = vrot.slane %v6026_v0, 7 }
 0x369   : > { %3329 = vrot.lane.b32.xlu1 %v3284_v9, %s4296_s18  ;;  %3093 = vrot.lane.b32.xlu0 %v6015_v16, %s4293_s29 }
 0x36b   : > { %v6036_v53 = vpop.permute.xlu1 %3063  ;;  %v2890_v3 = vpop.permute.xlu0 %2889 }
 0x36c   : > { %v2936_v48 = vrot.slane %v2890_v3, 7  ;;  %v6506_v62 = vrot.slane %v6036_v53, 1 }
 0x36d   : > { %2835 = vrot.lane.b32.xlu0 %v2789_v23, %s4296_s18  ;;  %2837 = vrot.lane.b32.xlu1 %v2759_v11, %s4296_s18 }
 0x36e   : > { %v2965_v40 = vsel %vm6741_vm1, %v6503_v31, %v2936_v48  ;;  %vm6760_vm1 = vmmov %vm6756_vm3 }
 0x36f   : > { %v6049_v46 = vpop.permute.xlu1 %2809  ;;  %v3066_v9 = vpop.permute.xlu0 %3065 }
 0x370   : > { %v3112_v3 = vrot.slane %v3066_v9, 1 }
 0x371   : > { %2807 = vrot.lane.b32.xlu0 %v2775_v32, %s4296_s18  ;;  %3001 = vrot.lane.b32.xlu1 %v2965_v40, %s4296_s18  ;;  %v6744_v40 = vld [vmem:[#allocation14_spill] sm:$0xff] }
 0x372   : > { %v3141_v14 = vsel %vm6742_vm9, %v6506_v62, %v3112_v3  ;;  %vm6745_vm8 = vnez %v6744_v40  ;;  %vm6761_vm9 = vnez %v6597_v26 }
 0x373   : > { %v2892_v11 = vpop.permute.xlu1 %2891  ;;  %v6060_v39 = vpop.permute.xlu0 %3303 }
 0x374   : > { %v2937_v23 = vrot.slane %v2892_v11, 7 }
 0x375   : > { %3175 = vrot.lane.b32.xlu0 %v3141_v14, %s4296_s18 }
 0x376   : > { %v2964_v9 = vsel %vm6743_vm7, %v2936_v48, %v2937_v23  ;;  %vm6762_vm7 = vmmov %vm6748_vm2 }
 0x377   : > { %v3068_v21 = vpop.permute.xlu1 %3067  ;;  %v6069_v32 = vpop.permute.xlu0 %2811  ;;  %v2969_v42 = vsel %vm6745_vm8, %v2964_v9, 0.0  ;;  %vm6763_vm8 = vmmov %vm6760_vm1 }
 0x378   : > { %v3113_v31 = vrot.slane %v3068_v21, 1 }
 0x379   : > { %3003 = vrot.lane.b32.xlu0 %v2969_v42, %s4296_s18 }
 0x37a   : > { %v3140_v11 = vsel %vm6746_vm11, %v3112_v3, %v3113_v31  ;;  %vm6764_vm11 = vmmov %vm6748_vm2 }
 0x37b   : > { %v6076_v25 = vpop.permute.xlu1 %3305  ;;  %v2894_v62 = vpop.permute.xlu0 %2893  ;;  %v3144_v14 = vsel %vm6747_vm4, %v3140_v11, 0.0  ;;  %v2731_v11 = vadd.f32 %v5850_v38, %v5580_v58  ;;  %v2732_v38 = vadd.f32 %v5865_v55, %v5583_v17  ;;  %v2733_v17 = vadd.f32 %v5880_v44, %v5565_v45 }
 0x37c   : > { %v2938_v28 = vrot.slane %v2894_v62, 7  ;;  %3177 = vrot.lane.b32.xlu1 %v3144_v14, %s4296_s18 }
 0x37e   : > { %v2963_v48 = vsel %vm6748_vm2, %v2937_v23, %v2938_v28  ;;  %vm6767_vm2 = vmmov %vm6760_vm1 }
 0x37f   : > { %v6083_v40 = vpop.permute.xlu1 %2813  ;;  %v3070_v9 = vpop.permute.xlu0 %3069 }
 0x380   : > { %v3114_v21 = vrot.slane %v3070_v9, 1  ;;  %3005 = vrot.lane.b32.xlu1 %v2963_v48, %s4296_s18  ;;  %v6751_v9 = vld [vmem:[#allocation15_spill] sm:$0xff] }
 0x381   : > { %vm6752_vm0 = vnez %v6751_v9 }
 0x382   : > { %v3139_v42 = vsel %vm6749_vm12, %v3113_v31, %v3114_v21  ;;  %vm6768_vm12 = vnez %v6602_v22 }
 0x383   : > { %v2896_v3 = vpop.permute.xlu1 %2895  ;;  %3179 = vrot.lane.b32.xlu0 %v3139_v42, %s4296_s18  ;;  %v6089_v54 = vpop.permute.xlu0 %3307 }
 0x384   : > { %v2939_v62 = vrot.slane %v2896_v3, 7 }
 0x386   : > { %v2962_v23 = vsel %vm6750_vm15, %v2938_v28, %v2939_v62  ;;  %vm6769_vm15 = vmmov %vm6757_vm6 }
 0x387   : > { %v3072_v14 = vpop.permute.xlu1 %3071  ;;  %v2816_v19 = vpop.permute.xlu0 %2815  ;;  %v2971_v48 = vsel %vm6752_vm0, %v2962_v23, 0.0  ;;  %vm6770_vm0 = vmmov %vm6760_vm1 }
 0x388   : > { %v3115_v47 = vrot.slane %v3072_v14, 1  ;;  %v6097_v10 = vadd.f32 %v2816_v19, %v2731_v11  ;;  %3007 = vrot.lane.b32.xlu0 %v2971_v48, %s4296_s18 }
 0x38a   : > { %v3138_v31 = vsel %vm6753_vm5, %v3114_v21, %v3115_v47  ;;  %vm6771_vm5 = vmmov %vm6757_vm6 }
 0x38b   : > { %v6102_v42 = vpop.permute.xlu1 %3309  ;;  %v2898_v3 = vpop.permute.xlu0 %2897  ;;  %v3146_v58 = vsel %vm6754_vm14, %v3138_v31, 0.0 }
 0x38c   : > { %v2940_v28 = vrot.slane %v2898_v3, 7  ;;  %3181 = vrot.lane.b32.xlu1 %v3146_v58, %s4296_s18  ;;  %v6758_v58 = vld [vmem:[#allocation16_spill] sm:$0xff] }
 0x38d   : > { %vm6759_vm13 = vnez %v6758_v58 }
 0x38e   : > { %v2961_v19 = vsel %vm6755_vm10, %v2939_v62, %v2940_v28  ;;  %vm6774_vm10 = vmmov %vm6770_vm0 }
 0x38f   : > { %v2818_v11 = vpop.permute.xlu1 %2817  ;;  %v3074_v23 = vpop.permute.xlu0 %3073 }
 0x390   : > { %v6111_v14 = vadd.f32 %v2818_v11, %v2732_v38  ;;  %v3116_v21 = vrot.slane %v3074_v23, 1  ;;  %3009 = vrot.lane.b32.xlu1 %v2961_v19, %s4296_s18 }
 0x392   : > { %v3137_v50 = vsel %vm6756_vm3, %v3115_v47, %v3116_v21  ;;  %vm6775_vm3 = vnez %v6605_v43 }
 0x393   : > { %v2900_v9 = vpop.permute.xlu1 %2899  ;;  %3183 = vrot.lane.b32.xlu0 %v3137_v50, %s4296_s18  ;;  %v6117_v48 = vpop.permute.xlu0 %3311 }
 0x394   : > { %v2941_v31 = vrot.slane %v2900_v9, 7 }
 0x396   : > { %v2960_v55 = vsel %vm6757_vm6, %v2940_v28, %v2941_v31  ;;  %v2734_v28 = vadd.f32 %v5895_v61, %v5619_v6  ;;  %v2735_v6 = vadd.f32 %v5910_v34, %v5627_v18  ;;  %vm6776_vm6 = vmmov %vm6771_vm5 }
 0x397   : > { %v3076_v62 = vpop.permute.xlu1 %3075  ;;  %v2820_v3 = vpop.permute.xlu0 %2819  ;;  %v2973_v38 = vsel %vm6759_vm13, %v2960_v55, 0.0  ;;  %vm6777_vm13 = vmmov %vm6770_vm0 }
 0x398   : > { %v3117_v19 = vrot.slane %v3076_v62, 1  ;;  %v6125_v11 = vadd.f32 %v2820_v3, %v2733_v17  ;;  %3011 = vrot.lane.b32.xlu0 %v2973_v38, %s4296_s18 }
 0x39a   : > { %v3136_v47 = vsel %vm6760_vm1, %v3116_v21, %v3117_v19  ;;  %vm6778_vm1 = vmmov %vm6771_vm5 }
 0x39b   : > { %v6130_v23 = vpop.permute.xlu1 %3313  ;;  %v2902_v50 = vpop.permute.xlu0 %2901  ;;  %v3148_v45 = vsel %vm6761_vm9, %v3136_v47, 0.0 }
 0x39c   : > { %v2942_v44 = vrot.slane %v2902_v50, 7  ;;  %3185 = vrot.lane.b32.xlu1 %v3148_v45, %s4296_s18  ;;  %v6765_v50 = vld [vmem:[#allocation17_spill] sm:$0xff] }
 0x39d   : > { %vm6766_vm4 = vnez %v6765_v50 }
 0x39e   : > { %v2959_v9 = vsel %vm6762_vm7, %v2941_v31, %v2942_v44  ;;  %vm6781_vm7 = vmmov %vm6770_vm0 }
 0x39f   : > { %v2822_v17 = vpop.permute.xlu1 %2821  ;;  %v3078_v55 = vpop.permute.xlu0 %3077 }
 0x3a0   : > { %v6139_v62 = vadd.f32 %v2822_v17, %v2734_v28  ;;  %v3118_v21 = vrot.slane %v3078_v55, 1  ;;  %3013 = vrot.lane.b32.xlu1 %v2959_v9, %s4296_s18 }
 0x3a2   : > { %v3135_v26 = vsel %vm6763_vm8, %v3117_v19, %v3118_v21  ;;  %vm6782_vm8 = vnez %v6611_v51 }
 0x3a3   : > { %v2904_v3 = vpop.permute.xlu1 %2903  ;;  %3187 = vrot.lane.b32.xlu0 %v3135_v26, %s4296_s18  ;;  %v6145_v58 = vpop.permute.xlu0 %3315 }
 0x3a4   : > { %v2943_v38 = vrot.slane %v2904_v3, 7 }
 0x3a6   : > { %v2958_v61 = vsel %vm6764_vm11, %v2942_v44, %v2943_v38  ;;  %v2736_v44 = vadd.f32 %v5925_v33, %v5630_v41  ;;  %v2737_v41 = vadd.f32 %v5940_v24, %v5608_v4  ;;  %vm6783_vm11 = vmmov %vm6770_vm0 }
 0x3a7   : > { %v3080_v31 = vpop.permute.xlu1 %3079  ;;  %v2824_v47 = vpop.permute.xlu0 %2823  ;;  %v2975_v45 = vsel %vm6766_vm4, %v2958_v61, 0.0  ;;  %vm6785_vm4 = vmmov %vm6778_vm1 }
 0x3a8   : > { %v3119_v28 = vrot.slane %v3080_v31, 1  ;;  %v6153_v9 = vadd.f32 %v2824_v47, %v2735_v6  ;;  %3015 = vrot.lane.b32.xlu0 %v2975_v45, %s4296_s18 }
 0x3aa   : > { %v3134_v19 = vsel %vm6767_vm2, %v3118_v21, %v3119_v28  ;;  %vm6786_vm2 = vmmov %vm6778_vm1 }
 0x3ab   : > { %v6158_v17 = vpop.permute.xlu1 %3317  ;;  %v2906_v55 = vpop.permute.xlu0 %2905  ;;  %v3150_v18 = vsel %vm6768_vm12, %v3134_v19, 0.0  ;;  %v6772_v19 = vld [vmem:[#allocation18_spill] sm:$0xff] }
 0x3ac   : > { %v2944_v34 = vrot.slane %v2906_v55, 7  ;;  %3189 = vrot.lane.b32.xlu1 %v3150_v18, %s4296_s18  ;;  %vm6773_vm14 = vnez %v6772_v19  ;;  %v6779_v19 = vld [vmem:[#allocation19_spill] sm:$0xff] }
 0x3ad   : > { %vm6780_vm9 = vnez %v6779_v19 }
 0x3ae   : > { %v2957_v26 = vsel %vm6769_vm15, %v2943_v38, %v2944_v34  ;;  %vm6789_vm15 = vmmov %vm6770_vm0 }
 0x3af   : > { %v2826_v3 = vpop.permute.xlu1 %2825  ;;  %v3082_v6 = vpop.permute.xlu0 %3081 }
 0x3b0   : > { %v6167_v61 = vadd.f32 %v2826_v3, %v2736_v44  ;;  %v3120_v21 = vrot.slane %v3082_v6, 1  ;;  %3017 = vrot.lane.b32.xlu1 %v2957_v26, %s4296_s18 }
 0x3b2   : > { %v3133_v22 = vsel %vm6770_vm0, %v3119_v28, %v3120_v21 }
 0x3b3   : > { %v2908_v31 = vpop.permute.xlu1 %2907  ;;  %3191 = vrot.lane.b32.xlu0 %v3133_v22, %s4296_s18  ;;  %v6173_v47 = vpop.permute.xlu0 %3319 }
 0x3b4   : > { %v2945_v50 = vrot.slane %v2908_v31, 7 }
 0x3b6   : > { %v2956_v33 = vsel %vm6771_vm5, %v2944_v34, %v2945_v50  ;;  %v2738_v34 = vadd.f32 %v5955_v8, %v5648_v20  ;;  %vm6793_vm5 = vmmov %vm6781_vm7 }
 0x3b7   : > { %v3084_v38 = vpop.permute.xlu1 %3083  ;;  %v2828_v45 = vpop.permute.xlu0 %2827  ;;  %v2977_v55 = vsel %vm6773_vm14, %v2956_v33, 0.0  ;;  %vm6795_vm14 = vmmov %vm6778_vm1 }
 0x3b8   : > { %v3121_v18 = vrot.slane %v3084_v38, 1  ;;  %v6181_v44 = vadd.f32 %v2828_v45, %v2737_v41  ;;  %3019 = vrot.lane.b32.xlu0 %v2977_v55, %s4296_s18 }
 0x3ba   : > { %v3132_v28 = vsel %vm6774_vm10, %v3120_v21, %v3121_v18  ;;  %vm6797_vm10 = vmmov %vm6778_vm1 }
 0x3bb   : > { %v6186_v26 = vpop.permute.xlu1 %3321  ;;  %v2910_v3 = vpop.permute.xlu0 %2909  ;;  %v3152_v4 = vsel %vm6775_vm3, %v3132_v28, 0.0  ;;  %vm6799_vm3 = vmmov %vm6793_vm5 }
 0x3bc   : > { %v2946_v24 = vrot.slane %v2910_v3, 7  ;;  %3193 = vrot.lane.b32.xlu1 %v3152_v4, %s4296_s18 }
 0x3be   : > { %v2955_v6 = vsel %vm6776_vm6, %v2945_v50, %v2946_v24 }
 0x3bf   : > { %v2830_v22 = vpop.permute.xlu1 %2829  ;;  %v3086_v31 = vpop.permute.xlu0 %3085 }
 0x3c0   : > { %v6195_v41 = vadd.f32 %v2830_v22, %v2738_v34  ;;  %v3122_v21 = vrot.slane %v3086_v31, 1  ;;  %3021 = vrot.lane.b32.xlu1 %v2955_v6, %s4296_s18 }
 0x3c2   : > { %v3131_v43 = vsel %vm6777_vm13, %v3121_v18, %v3122_v21 }
 0x3c3   : > { %v2912_v33 = vpop.permute.xlu1 %2911  ;;  %3195 = vrot.lane.b32.xlu0 %v3131_v43, %s4296_s18  ;;  %v6201_v38 = vpop.permute.xlu0 %3323  ;;  %v6784_v43 = vld [vmem:[#allocation26_spill] sm:$0xff] }
 0x3c4   : > { %v2947_v45 = vrot.slane %v2912_v33, 7  ;;  %v2739_v33 = vadd.f32 %v5970_v30, %v6784_v43 }
 0x3c6   : > { %v2954_v20 = vsel %vm6778_vm1, %v2946_v24, %v2947_v45  ;;  %v2740_v24 = vadd.f32 %v5982_v27, %v5675_v49  ;;  %vm6806_vm1 = vcmp.lt.s32.totalorder %v4810_v1, 6  ;;  %v6812_v1 = vld [vmem:[#allocation10_spill] sm:$0xff] }
 0x3c7   : > { %v3088_v8 = vpop.permute.xlu1 %3087  ;;  %v2914_v50 = vpop.permute.xlu0 %2913  ;;  %v2979_v55 = vsel %vm6780_vm9, %v2954_v20, 0.0  ;;  %vm6808_vm9 = vmmov %vm6806_vm1 }
 0x3c8   : > { %v3123_v28 = vrot.slane %v3088_v8, 1  ;;  %3023 = vrot.lane.b32.xlu0 %v2979_v55, %s4296_s18  ;;  %v2948_v3 = vrot.slane %v2914_v50, 7 }
 0x3ca   : > { %v3130_v18 = vsel %vm6781_vm7, %v3122_v21, %v3123_v28  ;;  %v2953_v51 = vsel %vm6785_vm4, %v2947_v45, %v2948_v3 }
 0x3cb   : > { %v6210_v4 = vpop.permute.xlu1 %3325  ;;  %v3090_v34 = vpop.permute.xlu0 %3089  ;;  %v3154_v6 = vsel %vm6782_vm8, %v3130_v18, 0.0  ;;  %v6787_v18 = vld [vmem:[#allocation21_spill] sm:$0xff]  ;;  %vm6815_vm8 = vcmask 261120  }
 0x3cc   : > { %v3124_v22 = vrot.slane %v3090_v34, 1  ;;  %3197 = vrot.lane.b32.xlu1 %v3154_v6, %s4296_s18  ;;  %vm6788_vm12 = vnez %v6787_v18  ;;  %vm6817_vm4 = vmmov %vm6815_vm8 }
 0x3ce   : > { %v3129_v31 = vsel %vm6783_vm11, %v3123_v28, %v3124_v22  ;;  %vm6816_vm11 = vmmov %vm6815_vm8 }
 0x3cf   : > { %v2834_v21 = vpop.permute.xlu1 %2833  ;;  %3199 = vrot.lane.b32.xlu0 %v3129_v31, %s4296_s18  ;;  %v2832_v20 = vpop.permute.xlu0 %2831 }
 0x3d0   : > { %v6224_v8 = vadd.f32 %v2834_v21, %v2740_v24  ;;  %v6226_v50 = vadd.f32 %v2832_v20, %v2739_v33  ;;  %3025 = vrot.lane.b32.xlu1 %v2953_v51, %s4296_s18  ;;  %v6790_v33 = vld [vmem:[#allocation6_spill] sm:$0xff]  ;;  %v6792_v51 = vld [vmem:[#allocation25_spill] sm:$0xff] }
 0x3d1   : > { %vm6791_vm0 = vnez %v6790_v33 }
 0x3d3   : > { %v2916_v49 = vpop.permute.xlu1 %2915  ;;  %v6229_v27 = vpop.permute.xlu0 %3327 }
 0x3d4   : > { %v2949_v19 = vrot.slane %v2916_v49, 7  ;;  %v2742_v49 = vadd.f32 %v6015_v16, %v6792_v51  ;;  %v6800_v51 = vld [vmem:[#allocation20_spill] sm:$0xff] }
 0x3d5   : > { %vm6801_vm6 = vnez %v6800_v51 }
 0x3d6   : > { %v2952_v30 = vsel %vm6786_vm2, %v2948_v3, %v2949_v19  ;;  %v2724_v3 = vpop.f32.mrf.mxu1  ;;  %vm6818_vm2 = vmmov %vm6817_vm4 }
 0x3d7   : > { %v3092_v55 = vpop.permute.xlu1 %3091  ;;  %v2918_v28 = vpop.permute.xlu0 %2917  ;;  %v2981_v34 = vsel %vm6788_vm12, %v2952_v30, 0.0  ;;  %v3254_v33 = vrot.slane %v2724_v3, 2  ;;  %v6803_v3 = vld [vmem:[#allocation5_spill] sm:$0xff]  ;;  %vm6819_vm12 = vmmov %vm6818_vm2 }
 0x3d8   : > { %v3125_v6 = vrot.slane %v3092_v55, 1  ;;  %3027 = vrot.lane.b32.xlu0 %v2981_v34, %s4296_s18  ;;  %v2950_v24 = vrot.slane %v2918_v28, 7  ;;  %v6794_v55 = vld [vmem:[#allocation22_spill] sm:$0xff]  ;;  %vm6804_vm13 = vnez %v6803_v3 }
 0x3da   : > { %v3128_v45 = vsel %vm6789_vm15, %v3124_v22, %v3125_v6  ;;  %v2741_v22 = vadd.f32 %v5999_v7, %v6794_v55  ;;  %v2951_v34 = vsel %vm6795_vm14, %v2949_v19, %v2950_v24  ;;  %v6798_v7 = vrot.slane %v6036_v53, 1  ;;  %vm6820_vm15 = vmmov %vm6818_vm2 }
 0x3db   : > { %v6238_v31 = vpop.permute.xlu1 %3329  ;;  %v3094_v43 = vpop.permute.xlu0 %3093  ;;  %v3156_v21 = vsel %vm6791_vm0, %v3128_v45, 0.0  ;;  %v6796_v45 = vrot.slane %v6026_v0, 7  ;;  %v6805_v55 = vrot.slane %v5805_v57, 2  ;;  %v6811_v57 = vld [vmem:[#allocation28_spill] sm:$0xff]  ;;  %vm6821_vm0 = vmmov %vm6818_vm2 }
 0x3dc   : > { %v3126_v20 = vrot.slane %v3094_v43, 1  ;;  %3201 = vrot.lane.b32.xlu1 %v3156_v21, %s4296_s18  ;;  %vm6823_vm14 = vmmov %vm6821_vm0 }
 0x3dd   : > { %v2966_v43 = vsel %vm6797_vm10, %v2950_v24, %v6796_v45  ;;  %v3270_v53 = vsel %vm6806_vm1, %v3254_v33, %v6805_v55  ;;  %vm6824_vm10 = vmmov %vm6821_vm0 }
 0x3de   : > { %v3127_v30 = vsel %vm6793_vm5, %v3125_v6, %v3126_v20  ;;  %v3142_v6 = vsel %vm6799_vm3, %v3126_v20, %v6798_v7  ;;  %v2967_v19 = vsel %vm6801_vm6, %v2966_v43, 0.0  ;;  %v6807_v20 = vrot.slane %v6007_v60, 2  ;;  %vm6822_vm5 = vmmov %vm6821_vm0 }
 0x3df   : > { %v2838_v28 = vpop.permute.xlu1 %2837  ;;  %3203 = vrot.lane.b32.xlu0 %v3127_v30, %s4296_s18  ;;  %v2836_v18 = vpop.permute.xlu0 %2835  ;;  %v6802_v30 = vld [vmem:[#allocation27_spill] sm:$0xff]  ;;  %vm6827_vm3 = vmmov %vm6821_vm0 }
 0x3e0   : > { %v6256_v16 = vadd.f32 %v2838_v28, %v2742_v49  ;;  %v6258_v21 = vadd.f32 %v2836_v18, %v2741_v22  ;;  %3029 = vrot.lane.b32.xlu1 %v2951_v34, %s4296_s18  ;;  %v2727_v0 = vadd.f32 %v5801_v59, %v6802_v30  ;;  %v3158_v49 = vsel %vm6804_vm13, %v3142_v6, 0.0  ;;  %v6809_v28 = vld [vmem:[#allocation23_spill] sm:$0xff]  ;;  %vm6828_vm6 = vmmov %vm6821_vm0 }
 0x3e1   : > { %v3255_v59 = vsel %vm6808_vm9, %v6807_v20, %v3254_v33  ;;  %vm6810_vm7 = vnez %v6809_v28  ;;  %v2728_v34 = vadd.f32 %v5807_v15, %v6811_v57  ;;  %v2729_v33 = vadd.f32 %v5819_v29, %v6812_v1  ;;  %vm6830_vm13 = vmmov %vm6821_vm0 }
 0x3e2   : > { %v3286_v18 = vsel %vm6810_vm7, %v3270_v53, 0.0  ;;  %vm6834_vm1 = vmmov %vm6821_vm0 }
 0x3e3   : > { %2999 = vrot.lane.b32.xlu0 %v2967_v19, %s4296_s18  ;;  %v2808_v24 = vpop.permute.xlu0 %2807  ;;  %v3002_v45 = vpop.permute.xlu1 %3001  ;;  %v2856_v43 = vadd.f32 %v6049_v46, %v2728_v34  ;;  %v6813_v46 = vld [vmem:[#allocation8_spill] sm:$0xff]  ;;  %vm6835_vm9 = vmmov %vm6821_vm0 }
 0x3e4   : > { %v6276_v22 = vadd.f32 %v2808_v24, %v2727_v0  ;;  %3205 = vrot.lane.b32.xlu1 %v3158_v49, %s4296_s18  ;;  %v2857_v0 = vadd.f32 %v6069_v32, %v2729_v33  ;;  %v2730_v55 = vadd.f32 %v5835_v37, %v6813_v46  ;;  %vm6836_vm7 = vmmov %vm6821_vm0 }
 0x3e5   : > { %v3048_v6 = vadd.f32 %v3002_v45, %v2856_v43 }
 0x3e6   : > { %v2858_v20 = vadd.f32 %v6083_v40, %v2730_v55 }
 0x3e7   : > { %3331 = vrot.lane.b32.xlu0 %v3255_v59, %s4296_s18  ;;  %v6290_v7 = vpop.permute.xlu0 %3175 }
 0x3e8   : > { %3333 = vrot.lane.b32.xlu1 %v3286_v18, %s4296_s18 }
 0x3eb   : > { %v3004_v19 = vpop.permute.xlu0 %3003 }
 0x3ec   : > { %v3049_v24 = vadd.f32 %v3004_v19, %v2857_v0 }
 0x3ee   : > { %v3178_v60 = vpop.permute.xlu1 %3177 }
 0x3ef   : > { %v3224_v51 = vadd.f32 %v3178_v60, %v3048_v6 }
 0x3f1   : > { %v3352_v30 = vadd.f32 %v6076_v25, %v3224_v51 }
 0x3f2   : > { %v3006_v53 = vpop.permute.xlu1 %3005 }
 0x3f3   : > { %4237 = vtanh.f32 %v3352_v30  ;;  %v3050_v59 = vadd.f32 %v3006_v53, %v2858_v20 }
 0x3f5   : > { %v3180_v3 = vpop.permute.xlu0 %3179 }
 0x3f6   : > { %v3225_v15 = vadd.f32 %v3180_v3, %v3049_v24 }
 0x3f8   : > { %v3353_v49 = vadd.f32 %v6089_v54, %v3225_v15 }
 0x3fa   : > { %4239 = vtanh.f32 %v3353_v49  ;;  %v3008_v25 = vpop.permute.xlu0 %3007 }
 0x3fb   : > { %v3051_v57 = vadd.f32 %v3008_v25, %v6097_v10 }
 0x3fe   : > { %v3182_v29 = vpop.permute.xlu1 %3181 }
 0x3ff   : > { %v3226_v28 = vadd.f32 %v3182_v29, %v3050_v59 }
 0x400   : > { %v4238_v18 = vpop.eup %4237 }
 0x401   : > { %v3354_v32 = vadd.f32 %v6102_v42, %v3226_v28  ;;  %3433 = vrot.lane.b32.xlu1 %v4238_v18, %s4296_s18 }
 0x402   : > { %v3010_v40 = vpop.permute.xlu1 %3009 }
 0x403   : > { %4241 = vtanh.f32 %v3354_v32  ;;  %v3052_v43 = vadd.f32 %v3010_v40, %v6111_v14 }
 0x405   : > { %v3184_v54 = vpop.permute.xlu0 %3183 }
 0x406   : > { %v3227_v34 = vadd.f32 %v3184_v54, %v3051_v57 }
 0x407   : > { %v4240_v45 = vpop.eup %4239 }
 0x408   : > { %v3355_v37 = vadd.f32 %v6117_v48, %v3227_v34  ;;  %3435 = vrot.lane.b32.xlu0 %v4240_v45, %s4296_s18 }
 0x40a   : > { %4243 = vtanh.f32 %v3355_v37  ;;  %v3012_v42 = vpop.permute.xlu0 %3011 }
 0x40b   : > { %v3053_v10 = vadd.f32 %v3012_v42, %v6125_v11 }
 0x40e   : > { %v3186_v6 = vpop.permute.xlu1 %3185 }
 0x40f   : > { %v3228_v60 = vadd.f32 %v3186_v6, %v3052_v43 }
 0x410   : > { %v4242_v51 = vpop.eup %4241 }
 0x411   : > { %v3356_v1 = vadd.f32 %v6130_v23, %v3228_v60  ;;  %3437 = vrot.lane.b32.xlu1 %v4242_v51, %s4296_s18 }
 0x412   : > { %v3014_v0 = vpop.permute.xlu1 %3013 }
 0x413   : > { %4245 = vtanh.f32 %v3356_v1  ;;  %v3054_v14 = vadd.f32 %v3014_v0, %v6139_v62 }
 0x415   : > { %v3188_v33 = vpop.permute.xlu0 %3187 }
 0x416   : > { %v3229_v19 = vadd.f32 %v3188_v33, %v3053_v10 }
 0x417   : > { %v4244_v48 = vpop.eup %4243 }
 0x418   : > { %v3357_v30 = vadd.f32 %v6145_v58, %v3229_v19  ;;  %3439 = vrot.lane.b32.xlu0 %v4244_v48, %s4296_s18 }
 0x41a   : > { %4247 = vtanh.f32 %v3357_v30  ;;  %v3016_v23 = vpop.permute.xlu0 %3015 }
 0x41b   : > { %v3055_v11 = vadd.f32 %v3016_v23, %v6153_v9 }
 0x41e   : > { %v3190_v24 = vpop.permute.xlu1 %3189 }
 0x41f   : > { %v3230_v3 = vadd.f32 %v3190_v24, %v3054_v14 }
 0x420   : > { %v4246_v15 = vpop.eup %4245 }
 0x421   : > { %v3358_v49 = vadd.f32 %v6158_v17, %v3230_v3  ;;  %3441 = vrot.lane.b32.xlu1 %v4246_v15, %s4296_s18 }
 0x422   : > { %v3018_v20 = vpop.permute.xlu1 %3017 }
 0x423   : > { %4249 = vtanh.f32 %v3358_v49  ;;  %v3056_v62 = vadd.f32 %v3018_v20, %v6167_v61 }
 0x425   : > { %v3192_v46 = vpop.permute.xlu0 %3191 }
 0x426   : > { %v3231_v55 = vadd.f32 %v3192_v46, %v3055_v11 }
 0x427   : > { %v4248_v58 = vpop.eup %4247 }
 0x428   : > { %v3359_v53 = vadd.f32 %v6173_v47, %v3231_v55  ;;  %3443 = vrot.lane.b32.xlu0 %v4248_v58, %s4296_s18 }
 0x42a   : > { %4251 = vtanh.f32 %v3359_v53  ;;  %v3020_v17 = vpop.permute.xlu0 %3019  ;;  %v4269_v53 = vld [vmem:[%s4423_s10 + $0x8] sm:$0xff] }
 0x42b   : > { %v3057_v9 = vadd.f32 %v3020_v17, %v6181_v44  ;;  %v4270_v17 = vld [vmem:[%s4423_s10 + $0x10] sm:$0xff] }
 0x42e   : > { %v3194_v59 = vpop.permute.xlu1 %3193 }
 0x42f   : > { %v3232_v29 = vadd.f32 %v3194_v59, %v3056_v62 }
 0x430   : > { %v4250_v28 = vpop.eup %4249 }
 0x431   : > { %v3360_v18 = vadd.f32 %v6186_v26, %v3232_v29  ;;  %3445 = vrot.lane.b32.xlu1 %v4250_v28, %s4296_s18  ;;  %v3385_v29 = vsub.f32 1.0, %v5721_v63 }
 0x432   : > { %v3022_v54 = vpop.permute.xlu1 %3021 }
 0x433   : > { %4253 = vtanh.f32 %v3360_v18  ;;  %v3058_v61 = vadd.f32 %v3022_v54, %v6195_v41  ;;  %v3401_v18 = vmul.f32 %v4270_v17, %v3385_v29 }
 0x435   : > { %v3196_v25 = vpop.permute.xlu0 %3195 }
 0x436   : > { %v3233_v32 = vadd.f32 %v3196_v25, %v3057_v9 }
 0x437   : > { %v4252_v47 = vpop.eup %4251 }
 0x438   : > { %v3361_v57 = vadd.f32 %v6201_v38, %v3233_v32  ;;  %3447 = vrot.lane.b32.xlu0 %v4252_v47, %s4296_s18  ;;  %v3386_v32 = vsub.f32 1.0, %v5725_v2 }
 0x43a   : > { %4255 = vtanh.f32 %v3361_v57  ;;  %v3024_v34 = vpop.permute.xlu0 %3023  ;;  %v4271_v57 = vld [vmem:[%s4423_s10 + $0x18] sm:$0xff] }
 0x43b   : > { %v3059_v40 = vadd.f32 %v3024_v34, %v6226_v50  ;;  %v3402_v54 = vmul.f32 %v4271_v57, %v3386_v32 }
 0x43e   : > { %v3198_v45 = vpop.permute.xlu1 %3197 }
 0x43f   : > { %v3234_v37 = vadd.f32 %v3198_v45, %v3058_v61  ;;  %v3387_v45 = vsub.f32 1.0, %v5729_v56 }
 0x440   : > { %v4254_v26 = vpop.eup %4253 }
 0x441   : > { %v3362_v43 = vadd.f32 %v6210_v4, %v3234_v37  ;;  %3449 = vrot.lane.b32.xlu1 %v4254_v26, %s4296_s18  ;;  %v3200_v44 = vpop.permute.xlu0 %3199  ;;  %v4272_v37 = vld [vmem:[%s4423_s10 + $0x20] sm:$0xff] }
 0x442   : > { %v3235_v6 = vadd.f32 %v3200_v44, %v3059_v40  ;;  %v3026_v41 = vpop.permute.xlu1 %3025  ;;  %v3403_v26 = vmul.f32 %v4272_v37, %v3387_v45  ;;  %v3388_v44 = vsub.f32 1.0, %v5734_v12 }
 0x443   : > { %4257 = vtanh.f32 %v3362_v43  ;;  %v3060_v51 = vadd.f32 %v3026_v41, %v6224_v8 }
 0x444   : > { %v3363_v38 = vadd.f32 %v6229_v27, %v3235_v6  ;;  %v4273_v6 = vld [vmem:[%s4423_s10 + $0x28] sm:$0xff] }
 0x446   : > { %4259 = vtanh.f32 %v3363_v38  ;;  %v3404_v38 = vmul.f32 %v4273_v6, %v3388_v44 }
 0x447   : > { %v4256_v60 = vpop.eup %4255 }
 0x448   : > { %3451 = vrot.lane.b32.xlu0 %v4256_v60, %s4296_s18 }
 0x44a   : > { %v3028_v42 = vpop.permute.xlu0 %3027 }
 0x44b   : > { %v3061_v14 = vadd.f32 %v3028_v42, %v6258_v21  ;;  %v4274_v42 = vld [vmem:[%s4423_s10 + $0x30] sm:$0xff] }
 0x44e   : > { %v3202_v1 = vpop.permute.xlu1 %3201 }
 0x44f   : > { %v3236_v10 = vadd.f32 %v3202_v1, %v3060_v51  ;;  %v3389_v51 = vsub.f32 1.0, %v5739_v36 }
 0x450   : > { %v4258_v50 = vpop.eup %4257 }
 0x451   : > { %v3364_v4 = vadd.f32 %v6238_v31, %v3236_v10  ;;  %3453 = vrot.lane.b32.xlu1 %v4258_v50, %s4296_s18  ;;  %v3204_v33 = vpop.permute.xlu0 %3203  ;;  %v3405_v1 = vmul.f32 %v4274_v42, %v3389_v51 }
 0x452   : > { %v3030_v19 = vpop.permute.xlu1 %3029  ;;  %v3237_v15 = vadd.f32 %v3204_v33, %v3061_v14  ;;  %v4275_v33 = vld [vmem:[%s4423_s10 + $0x38] sm:$0xff] }
 0x453   : > { %v4260_v48 = vpop.eup %4259  ;;  %4261 = vtanh.f32 %v3364_v4  ;;  %v3062_v8 = vadd.f32 %v3030_v19, %v6256_v16  ;;  %v3390_v4 = vsub.f32 1.0, %v5744_v35 }
 0x454   : > { %3455 = vrot.lane.b32.xlu0 %v4260_v48, %s4296_s18 }
 0x455   : > { %v3000_v27 = vpop.permute.xlu0 %2999  ;;  %v3406_v19 = vmul.f32 %v4275_v33, %v3390_v4 }
 0x456   : > { %v3047_v30 = vadd.f32 %v3000_v27, %v6276_v22  ;;  %v3206_v0 = vpop.permute.xlu1 %3205 }
 0x457   : > { %v3238_v3 = vadd.f32 %v3206_v0, %v3062_v8  ;;  %v4276_v0 = vld [vmem:[%s4423_s10 + $0x40] sm:$0xff] }
 0x458   : > { %v3223_v24 = vadd.f32 %v6290_v7, %v3047_v30  ;;  %v3391_v30 = vsub.f32 1.0, %v5746_v13 }
 0x459   : > { %v3332_v31 = vpop.permute.xlu0 %3331 }
 0x45a   : > { %v3351_v23 = vadd.f32 %v6060_v39, %v3223_v24  ;;  %v3334_v49 = vpop.permute.xlu1 %3333  ;;  %v3365_v46 = vadd.f32 %v3332_v31, %v3237_v15  ;;  %v6814_v39 = vld [vmem:[#allocation29_spill] sm:$0xff]  ;;  %v3407_v8 = vmul.f32 %v4276_v0, %v3391_v30 }
 0x45b   : > { %v3366_v11 = vadd.f32 %v3334_v49, %v3238_v3  ;;  %v3384_v55 = vsub.f32 1.0, %v6814_v39  ;;  %v3392_v3 = vsub.f32 1.0, %v5753_v5 }
 0x45c   : > { %4263 = vtanh.f32 %v3351_v23 }
 0x45d   : > { %4265 = vtanh.f32 %v3366_v11  ;;  %v3400_v20 = vmul.f32 %v4269_v53, %v3384_v55  ;;  %v3393_v11 = vsub.f32 1.0, %v5760_v52  ;;  %v6826_v55 = vld [vmem:[#allocation33_spill] sm:$0xff] }
 0x45e   : > { %4267 = vtanh.f32 %v3365_v46  ;;  %v4279_v53 = vld [vmem:[%s4423_s10 + $0x58] sm:$0xff] }
 0x460   : > { %v4262_v22 = vpop.eup %4261 }
 0x461   : > { %3457 = vrot.lane.b32.xlu1 %v4262_v22, %s4296_s18 }
 0x469   : > { %v4264_v16 = vpop.eup %4263 }
 0x46a   : > { %3431 = vrot.lane.b32.xlu0 %v4264_v16, %s4296_s18  ;;  %v4266_v21 = vpop.eup %4265 }
 0x46b   : > { %3461 = vrot.lane.b32.xlu1 %v4266_v21, %s4296_s18  ;;  %v4268_v7 = vpop.eup %4267 }
 0x46e   : > { %3459 = vrot.lane.b32.xlu0 %v4268_v7, %s4296_s18  ;;  %v6825_v7 = vld [vmem:[#allocation30_spill] sm:$0xff] }
 0x473   : > { %v3434_v58 = vpop.permute.xlu1 %3433 }
 0x474   : > { %v3480_v62 = vmul.f32 %v3434_v58, %v6814_v39  ;;  %v3394_v39 = vsub.f32 1.0, %v6825_v7  ;;  %v3395_v58 = vsub.f32 1.0, %v6826_v55 }
 0x476   : > { %v3496_v59 = vadd.f32 %v3480_v62, %v3400_v20  ;;  %v3410_v20 = vmul.f32 %v4279_v53, %v3394_v39 }
 0x478   : > { %3512 = vst.msk [vmem:[%s6350_s22 + $0x8] sm:$0xff] %vm6815_vm8, %v3496_v59 }
 0x47a   : > { %v3436_v28 = vpop.permute.xlu0 %3435 }
 0x47b   : > { %v3481_v9 = vmul.f32 %v3436_v28, %v5721_v63  ;;  %v4280_v28 = vld [vmem:[%s4423_s10 + $0x60] sm:$0xff] }
 0x47d   : > { %v3497_v25 = vadd.f32 %v3481_v9, %v3401_v18  ;;  %v6829_v9 = vld [vmem:[#allocation34_spill] sm:$0xff] }
 0x47f   : > { %3513 = vst.msk [vmem:[%s6350_s22 + $0x10] sm:$0xff] %vm6816_vm11, %v3497_v25  ;;  %v3396_v25 = vsub.f32 1.0, %v6829_v9 }
 0x483   : > { %v3438_v47 = vpop.permute.xlu1 %3437 }
 0x484   : > { %v3482_v61 = vmul.f32 %v3438_v47, %v5725_v2  ;;  %v4281_v47 = vld [vmem:[%s4423_s10 + $0x68] sm:$0xff] }
 0x485   : > { %v3412_v57 = vmul.f32 %v4281_v47, %v3396_v25 }
 0x486   : > { %v3498_v34 = vadd.f32 %v3482_v61, %v3402_v54 }
 0x488   : > { %3514 = vst.msk [vmem:[%s6350_s22 + $0x18] sm:$0xff] %vm6817_vm4, %v3498_v34  ;;  %v6831_v34 = vld [vmem:[#allocation24_spill] sm:$0xff] }
 0x489   : > { %v3383_v45 = vsub.f32 1.0, %v6831_v34 }
 0x48a   : > { %v3440_v63 = vpop.permute.xlu0 %3439 }
 0x48b   : > { %v3483_v40 = vmul.f32 %v3440_v63, %v5729_v56  ;;  %v6832_v63 = vld [vmem:[#allocation32_spill] sm:$0xff] }
 0x48c   : > { %v3398_v37 = vsub.f32 1.0, %v6832_v63 }
 0x48d   : > { %v3499_v43 = vadd.f32 %v3483_v40, %v3403_v26  ;;  %v4282_v40 = vld [vmem:[%s4423_s10] sm:$0xff] }
 0x48f   : > { %3515 = vst.msk [vmem:[%s6350_s22 + $0x20] sm:$0xff] %vm6818_vm2, %v3499_v43  ;;  %v3399_v43 = vmul.f32 %v4282_v40, %v3383_v45 }
 0x493   : > { %v3442_v2 = vpop.permute.xlu1 %3441 }
 0x494   : > { %v3484_v60 = vmul.f32 %v3442_v2, %v5734_v12  ;;  %v6833_v2 = vld [vmem:[#allocation31_spill] sm:$0xff] }
 0x495   : > { %v3397_v6 = vsub.f32 1.0, %v6833_v2 }
 0x496   : > { %v3500_v41 = vadd.f32 %v3484_v60, %v3404_v38 }
 0x498   : > { %3516 = vst.msk [vmem:[%s6350_s22 + $0x28] sm:$0xff] %vm6819_vm12, %v3500_v41  ;;  %v4283_v41 = vld [vmem:[%s4423_s10 + $0x78] sm:$0xff] }
 0x499   : > { %v3414_v51 = vmul.f32 %v4283_v41, %v3398_v37 }
 0x49a   : > { %v3444_v56 = vpop.permute.xlu0 %3443 }
 0x49b   : > { %v3485_v10 = vmul.f32 %v3444_v56, %v5739_v36 }
 0x49d   : > { %v3501_v50 = vadd.f32 %v3485_v10, %v3405_v1  ;;  %v4284_v10 = vld [vmem:[%s4423_s10 + $0x70] sm:$0xff] }
 0x49f   : > { %3517 = vst.msk [vmem:[%s6350_s22 + $0x30] sm:$0xff] %vm6820_vm15, %v3501_v50  ;;  %v3413_v50 = vmul.f32 %v4284_v10, %v3397_v6 }
 0x4a3   : > { %v3446_v12 = vpop.permute.xlu1 %3445 }
 0x4a4   : > { %v3486_v48 = vmul.f32 %v3446_v12, %v5744_v35  ;;  %v4277_v35 = vld [vmem:[%s4423_s10 + $0x48] sm:$0xff] }
 0x4a5   : > { %v3408_v15 = vmul.f32 %v4277_v35, %v3392_v3 }
 0x4a6   : > { %v3502_v27 = vadd.f32 %v3486_v48, %v3406_v19 }
 0x4a8   : > { %3518 = vst.msk [vmem:[%s6350_s22 + $0x38] sm:$0xff] %vm6821_vm0, %v3502_v27 }
 0x4aa   : > { %v3448_v36 = vpop.permute.xlu0 %3447 }
 0x4ab   : > { %v3487_v14 = vmul.f32 %v3448_v36, %v5746_v13  ;;  %v4278_v13 = vld [vmem:[%s4423_s10 + $0x50] sm:$0xff] }
 0x4ac   : > { %v3409_v22 = vmul.f32 %v4278_v13, %v3393_v11 }
 0x4ad   : > { %v3503_v24 = vadd.f32 %v3487_v14, %v3407_v8 }
 0x4af   : > { %3519 = vst.msk [vmem:[%s6350_s22 + $0x40] sm:$0xff] %vm6822_vm5, %v3503_v24 }
 0x4b3   : > { %v3450_v31 = vpop.permute.xlu1 %3449 }
 0x4b4   : > { %v3488_v23 = vmul.f32 %v3450_v31, %v5753_v5 }
 0x4b6   : > { %v3504_v49 = vadd.f32 %v3488_v23, %v3408_v15 }
 0x4b8   : > { %3520 = vst.msk [vmem:[%s6350_s22 + $0x48] sm:$0xff] %vm6823_vm14, %v3504_v49 }
 0x4ba   : > { %v3452_v46 = vpop.permute.xlu0 %3451 }
 0x4bb   : > { %v3489_v16 = vmul.f32 %v3452_v46, %v5760_v52  ;;  %v3411_v52 = vmul.f32 %v4280_v28, %v3395_v58 }
 0x4bd   : > { %v3505_v21 = vadd.f32 %v3489_v16, %v3409_v22 }
 0x4bf   : > { %3521 = vst.msk [vmem:[%s6350_s22 + $0x50] sm:$0xff] %vm6824_vm10, %v3505_v21 }
 0x4c3   : > { %v3454_v5 = vpop.permute.xlu1 %3453 }
 0x4c4   : > { %v3490_v62 = vmul.f32 %v3454_v5, %v6825_v7 }
 0x4c6   : > { %v3506_v59 = vadd.f32 %v3490_v62, %v3410_v20  ;;  %v3456_v29 = vpop.permute.xlu0 %3455 }
 0x4c7   : > { %v3491_v17 = vmul.f32 %v3456_v29, %v6826_v55 }
 0x4c8   : > { %3522 = vst.msk [vmem:[%s6350_s22 + $0x58] sm:$0xff] %vm6827_vm3, %v3506_v59 }
 0x4c9   : > { %v3507_v18 = vadd.f32 %v3491_v17, %v3411_v52 }
 0x4cb   : > { %3523 = vst.msk [vmem:[%s6350_s22 + $0x60] sm:$0xff] %vm6828_vm6, %v3507_v18 }
 0x4d3   : > { %v3458_v32 = vpop.permute.xlu1 %3457 }
 0x4d4   : > { %v3492_v54 = vmul.f32 %v3458_v32, %v6829_v9 }
 0x4d6   : > { %v3508_v61 = vadd.f32 %v3492_v54, %v3412_v57 }
 0x4d8   : > { %3524 = vst.msk [vmem:[%s6350_s22 + $0x68] sm:$0xff] %vm6830_vm13, %v3508_v61 }
 0x4dc   : > { %v3432_v26 = vpop.permute.xlu0 %3431 }
 0x4dd   : > { %v3479_v44 = vmul.f32 %v3432_v26, %v6831_v34  ;;  %v3462_v38 = vpop.permute.xlu1 %3461 }
 0x4de   : > { %v3494_v56 = vmul.f32 %v3462_v38, %v6832_v63 }
 0x4df   : > { %v3495_v60 = vadd.f32 %v3479_v44, %v3399_v43 }
 0x4e0   : > { %v3460_v42 = vpop.permute.xlu0 %3459  ;;  %v3510_v1 = vadd.f32 %v3494_v56, %v3414_v51 }
 0x4e1   : > { %3511 = vst.msk [vmem:[%s6350_s22] sm:$0xff] %vm6834_vm1, %v3495_v60  ;;  %v3493_v4 = vmul.f32 %v3460_v42, %v6833_v2 }
 0x4e2   : > { %3526 = vst.msk [vmem:[%s6350_s22 + $0x78] sm:$0xff] %vm6835_vm9, %v3510_v1 }
 0x4e3   : > { %v3509_v12 = vadd.f32 %v3493_v4, %v3413_v50 }
 0x4e5   : > { %3525 = vst.msk [vmem:[%s6350_s22 + $0x70] sm:$0xff] %vm6836_vm7, %v3509_v12 }
 0x4e6 PF: > { %s16_s21 = sadd.s32 1, %s4291_s21  }
 0x4e7   : > { %p13_p4 = scmp.ge.s32.totalorder %s16_s21, 6  }
 0x4e9   :  { %15 = sbr.rel (!%p13_p4) target bundleno = 1 (0x1), region = 85 }

</bundles_post_ra>
